<compile_context>
chip_gen: v7x
topology: tpu7x:2x2x1
jax: 0.10.0
libtpu: 0.0.40
codegen_flags: <defaults>
</compile_context>

<pallas_src>
import functools

import jax
import jax.numpy as jnp
from jax import lax
from jax.experimental import pallas as pl
from jax.experimental.pallas import tpu as pltpu


# ------------------------------- small helpers -------------------------------
def _round_up(n, m):
    return ((n + m - 1) // m) * m


def _vmem_capacity_bytes():
    """Physical VMEM per TensorCore; conservative 64 MiB if the query fails."""
    try:
        info = pltpu.get_tpu_info()
        for name in ("vmem_capacity_bytes", "vmem_size_bytes", "vmem_bytes"):
            cap = getattr(info, name, None)
            if cap:
                return int(cap)
    except Exception:
        pass
    return 64 * 2**20


def _tensorcores_per_chip():
    try:
        kind = jax.devices()[0].device_kind.lower()
        return 2 if "v7" in kind else 1
    except Exception:
        return 1


@functools.lru_cache(maxsize=None)
def _single_buffered_weights_ok():
    """Probe whether pipeline_mode=pl.Buffered(1) lowers on this jax/libtpu.

    Constant-index weight operands are only DMA'd once but are still
    double-buffered by default; Buffered(1) reclaims one full weight copy of
    VMEM (matters at large hidden sizes on v7x's 64 MiB).  Falls back silently
    if unsupported so the kernel always runs.
    """
    try:
        def _probe_kernel(x_ref, o_ref):
            o_ref[...] = x_ref[...]

        spec = pl.BlockSpec((8, 128), lambda i: (0, 0),
                            pipeline_mode=pl.Buffered(1))
        f = pl.pallas_call(
            _probe_kernel,
            out_shape=jax.ShapeDtypeStruct((8, 128), jnp.float32),
            grid=(1,),
            in_specs=[spec],
            out_specs=pl.BlockSpec((8, 128), lambda i: (0, 0)),
        )
        jax.block_until_ready(f(jnp.zeros((8, 128), jnp.float32)))
        return True
    except Exception:
        return False


def _const_spec(shape, single_buffered):
    """BlockSpec for a grid-invariant (weight) operand."""
    if single_buffered:
        return pl.BlockSpec(shape, lambda b, t: (0,) * len(shape),
                            pipeline_mode=pl.Buffered(1))
    return pl.BlockSpec(shape, lambda b, t: (0,) * len(shape))


def _plan_tiles(B, T, i_pad_max, h_pad):
    """Pick (B_pad, T_pad, b_tile, t_chunk, vmem_limit) under a VMEM budget."""
    cap = _vmem_capacity_bytes()
    budget = int(0.70 * cap)

    # Give v7x's second TensorCore its own batch tile via the leading
    # "parallel" grid axis; v5e/v6e (1 TC) keep one big tile (bigger M helps
    # the recurrence matmul there).
    want_tiles = 2 if (_tensorcores_per_chip() >= 2 and B > 16) else 1

    t_chunk = max(1, min(16, T))
    b_tile = min(512, _round_up(max(1, pl.cdiv(B, want_tiles)), 16))

    def est(tc, bt):
        f32, bf16, db = 4, 2, 2
        e = db * tc * bt * i_pad_max * bf16           # x blocks (bf16, dbl-buf)
        e += db * tc * bt * h_pad * bf16              # y blocks
        e += db * i_pad_max * 4 * h_pad * bf16        # W_ih^T (worst case 2 bufs)
        e += db * h_pad * 4 * h_pad * bf16            # W_hh^T
        e += db * 4 * h_pad * f32                     # fused bias
        e += db * bt * h_pad * f32                    # h_last output block
        e += bt * h_pad * f32                         # c carry scratch
        e += tc * bt * 4 * h_pad * f32                # x-projection scratch
        return e

    while est(t_chunk, b_tile) > budget:
        if b_tile > 128:
            b_tile = _round_up(b_tile // 2, 16)
        elif t_chunk > 4:
            t_chunk //= 2
        elif b_tile > 16:
            b_tile = _round_up(b_tile // 2, 16)
        elif t_chunk > 1:
            t_chunk //= 2
        else:
            break

    B_pad = _round_up(B, b_tile)
    T_pad = _round_up(T, t_chunk)
    est_val = est(t_chunk, b_tile)
    vmem_limit = int(min(max(2 * est_val, 32 * 2**20), 0.90 * cap))
    return B_pad, T_pad, b_tile, t_chunk, vmem_limit


# ----------------------------- LSTM layer kernel -----------------------------
# Grid = (batch_tiles, time_chunks).  Batch tiles are independent ("parallel",
# so v7x can split them across its 2 TCs); time is the recurrence
# ("arbitrary").  The h carry lives in the resident h_last output block and
# the c carry in a VMEM scratch; both persist across time chunks.
def _lstm_layer_kernel(x_ref, wih_ref, whh_ref, b_ref, *rest, emit_y, seq_len):
    if emit_y:
        y_ref, h_ref, c_sc, proj_sc = rest
    else:
        y_ref = None
        h_ref, c_sc, proj_sc = rest

    t_chunk, b_tile, i_pad = x_ref.shape
    hp = whh_ref.shape[0]
    tc = pl.program_id(1)

    @pl.when(tc == 0)
    def _init():
        h_ref[...] = jnp.zeros_like(h_ref)
        c_sc[...] = jnp.zeros_like(c_sc)

    # Hoisted input projection: ONE big MXU matmul per chunk,
    #   (t_chunk*b_tile, I_pad)bf16 @ (I_pad, 4*H_pad)bf16 -> f32, + fused bias.
    x_flat = x_ref[...].reshape(t_chunk * b_tile, i_pad)
    proj_sc[...] = jnp.dot(x_flat, wih_ref[...],
                           preferred_element_type=jnp.float32) + b_ref[...]
    # TODO(synk): software-pipeline this projection one chunk ahead of the
    # recurrence (2-slot scratch + skewed grid) once producer/consumer slots
    # can be made provably disjoint to the scheduler; serialized for now.

    whh = whh_ref[...]                     # hoisted: load the RHS once per chunk
    needs_mask = (seq_len % t_chunk) != 0  # only tail chunk of a padded T
    if needs_mask:
        valid = jnp.minimum(t_chunk, seq_len - tc * t_chunk)

    # Recurrence: per step only h_prev @ W_hh^T + elementwise gates.
    def step(s, carry):
        h_prev, c_prev = carry
        row = pl.multiple_of(s * b_tile, b_tile)
        gates = proj_sc[pl.ds(row, b_tile), :] + jnp.dot(
            h_prev.astype(jnp.bfloat16), whh,
            preferred_element_type=jnp.float32)
        # Gates are packed (i, f, o, g): the three sigmoids are one contiguous
        # lane slice, the tanh gate is the last H_pad lanes.
        sig = jax.nn.sigmoid(gates[:, : 3 * hp])
        i_g = sig[:, 0 * hp:1 * hp]
        f_g = sig[:, 1 * hp:2 * hp]
        o_g = sig[:, 2 * hp:3 * hp]
        g_g = jnp.tanh(gates[:, 3 * hp:])
        c_new = f_g * c_prev + i_g * g_g
        h_new = o_g * jnp.tanh(c_new)
        if needs_mask:                      # padded tail timesteps: freeze state
            keep = s < valid
            c_new = jnp.where(keep, c_new, c_prev)
            h_new = jnp.where(keep, h_new, h_prev)
        if y_ref is not None:
            y_ref[s] = h_new.astype(y_ref.dtype)
        return h_new, c_new

    h_fin, c_fin = lax.fori_loop(0, t_chunk, step, (h_ref[...], c_sc[...]),
                                 unroll=True)
    h_ref[...] = h_fin
    c_sc[...] = c_fin


def lstm_layer(x_tbf, wih_t, whh_t, bias, *, seq_len, t_chunk, b_tile,
               vmem_limit, emit_y):
    """One LSTM layer on padded data.

    x_tbf: (T_pad, B_pad, I_pad) bf16; wih_t: (I_pad, 4*H_pad) bf16;
    whh_t: (H_pad, 4*H_pad) bf16; bias: (1, 4*H_pad) f32 (b_ih + b_hh).
    Returns (y, h_last): y is (T_pad, B_pad, H_pad) bf16 (None if emit_y=False,
    i.e. for the last layer), h_last is (B_pad, H_pad) f32.
    """
    T_pad, B_pad, I_pad = x_tbf.shape
    H_pad = whh_t.shape[0]
    grid = (B_pad // b_tile, T_pad // t_chunk)

    sb = _single_buffered_weights_ok()
    in_specs = [
        pl.BlockSpec((t_chunk, b_tile, I_pad), lambda b, t: (t, b, 0)),
        _const_spec((I_pad, 4 * H_pad), sb),
        _const_spec((H_pad, 4 * H_pad), sb),
        _const_spec((1, 4 * H_pad), sb),
    ]
    h_spec = pl.BlockSpec((b_tile, H_pad), lambda b, t: (b, 0))
    h_shape = jax.ShapeDtypeStruct((B_pad, H_pad), jnp.float32)
    if emit_y:
        out_shape = (jax.ShapeDtypeStruct((T_pad, B_pad, H_pad), jnp.bfloat16),
                     h_shape)
        out_specs = (pl.BlockSpec((t_chunk, b_tile, H_pad),
                                  lambda b, t: (t, b, 0)), h_spec)
    else:
        out_shape = h_shape
        out_specs = h_spec

    kernel = functools.partial(_lstm_layer_kernel, emit_y=emit_y,
                               seq_len=seq_len)
    result = pl.pallas_call(
        kernel,
        out_shape=out_shape,
        grid_spec=pltpu.PrefetchScalarGridSpec(
            num_scalar_prefetch=0,
            grid=grid,
            in_specs=in_specs,
            out_specs=out_specs,
            scratch_shapes=[
                pltpu.VMEM((b_tile, H_pad), jnp.float32),                # c carry
                pltpu.VMEM((t_chunk * b_tile, 4 * H_pad), jnp.float32),  # x-proj
            ],
        ),
        compiler_params=pltpu.CompilerParams(
            dimension_semantics=("parallel", "arbitrary"),
            vmem_limit_bytes=vmem_limit,
        ),
    )(x_tbf, wih_t, whh_t, bias)
    if emit_y:
        return result
    return None, result


# ------------------------------ Full forward ---------------------------------
@functools.partial(jax.jit, static_argnames=("num_layers", "num_classes"))
def lstm_model_forward(x, prep, num_layers, num_classes):
    """x: (B, T, input_size) float32, batch_first — same as the torch module."""
    B, T, I = x.shape
    I_pad0 = prep["wih_t_l0"].shape[0]
    H_pad = prep["whh_t_l0"].shape[0]
    C_pad = prep["wfc_t"].shape[1]

    B_pad, T_pad, b_tile, t_chunk, vmem_limit = _plan_tiles(
        B, T, max(I_pad0, H_pad), H_pad)

    # Activations flow layer-to-layer in bf16 (halves the dominant HBM
    # traffic); padding is inert (zero weight rows/cols, masked tail steps).
    x_p = jnp.pad(x.astype(jnp.bfloat16),
                  ((0, B_pad - B), (0, T_pad - T), (0, I_pad0 - I)))
    inp = jnp.transpose(x_p, (1, 0, 2))               # (T_pad, B_pad, I_pad)

    h_finals = []
    for layer in range(num_layers):
        emit_y = layer < num_layers - 1               # last layer: no y writeback
        y, h_last = lstm_layer(inp,
                               prep[f"wih_t_l{layer}"],
                               prep[f"whh_t_l{layer}"],
                               prep[f"bias_l{layer}"],
                               seq_len=T, t_chunk=t_chunk, b_tile=b_tile,
                               vmem_limit=vmem_limit, emit_y=emit_y)
        h_finals.append(h_last)
        inp = y

    # torch: h_n is (num_layers, B, H); h_n.view(-1, H) is layer-major.
    h_out = jnp.concatenate(h_finals, axis=0)         # (num_layers*B_pad, H_pad)
    # FC head: far too small to amortize a separate kernel dispatch -> plain XLA.
    logits = jnp.dot(h_out.astype(jnp.bfloat16), prep["wfc_t"],
                     preferred_element_type=jnp.float32) + prep["bfc"]
    out = logits.reshape(num_layers, B_pad, C_pad)[:, :B, :num_classes]
    return out.reshape(num_layers * B, num_classes)


# ------------------------------ Parameter prep -------------------------------
def init_params(key, num_layers, input_size, hidden_size, num_classes):
    """Deterministic synthetic params with PyTorch nn.LSTM / nn.Linear shapes."""
    params = {}
    k = 1.0 / jnp.sqrt(hidden_size)
    for layer in range(num_layers):
        in_feat = input_size if layer == 0 else hidden_size
        key, k1, k2, k3, k4 = jax.random.split(key, 5)
        params[f"w_ih_l{layer}"] = jax.random.uniform(
            k1, (4 * hidden_size, in_feat), jnp.float32, -k, k)
        params[f"w_hh_l{layer}"] = jax.random.uniform(
            k2, (4 * hidden_size, hidden_size), jnp.float32, -k, k)
        params[f"b_ih_l{layer}"] = jax.random.uniform(
            k3, (4 * hidden_size,), jnp.float32, -k, k)
        params[f"b_hh_l{layer}"] = jax.random.uniform(
            k4, (4 * hidden_size,), jnp.float32, -k, k)
    key, k5, k6 = jax.random.split(key, 3)
    params["w_fc"] = jax.random.uniform(
        k5, (num_classes, hidden_size), jnp.float32, -k, k)
    params["b_fc"] = jax.random.uniform(
        k6, (num_classes,), jnp.float32, -k, k)
    return params


# Packed gate column blocks are (i, f, o, g) <- torch row blocks (i, f, g, o),
# so the three sigmoid gates are lane-contiguous inside the kernel.
_GATE_SRC = (0, 1, 3, 2)


def prepare_params(raw, num_layers, input_size, hidden_size, num_classes):
    """One-time prep: transpose, pad to (8,128)-friendly shapes, fuse biases,
    reorder gates to (i, f, o, g) and cast matmul weights to bf16.  Padded
    weight rows/cols and bias lanes are zero, so padded h/c lanes stay 0."""
    H = hidden_size
    Hp = _round_up(H, 128)
    Cp = _round_up(num_classes, 128)
    prep = {}
    for layer in range(num_layers):
        in_feat = input_size if layer == 0 else hidden_size
        Ip = _round_up(in_feat, 128)
        w_ih = raw[f"w_ih_l{layer}"]                       # (4H, in_feat)
        w_hh = raw[f"w_hh_l{layer}"]                       # (4H, H)
        b = raw[f"b_ih_l{layer}"] + raw[f"b_hh_l{layer}"]  # (4H,)
        wih_t = jnp.zeros((Ip, 4 * Hp), jnp.float32)
        whh_t = jnp.zeros((Hp, 4 * Hp), jnp.float32)
        bias = jnp.zeros((1, 4 * Hp), jnp.float32)
        for dst, src in enumerate(_GATE_SRC):
            wih_t = wih_t.at[:in_feat, dst * Hp:dst * Hp + H].set(
                w_ih[src * H:(src + 1) * H, :].T)
            whh_t = whh_t.at[:H, dst * Hp:dst * Hp + H].set(
                w_hh[src * H:(src + 1) * H, :].T)
            bias = bias.at[0, dst * Hp:dst * Hp + H].set(b[src * H:(src + 1) * H])
        prep[f"wih_t_l{layer}"] = wih_t.astype(jnp.bfloat16)
        prep[f"whh_t_l{layer}"] = whh_t.astype(jnp.bfloat16)
        prep[f"bias_l{layer}"] = bias
    wfc_t = jnp.zeros((Hp, Cp), jnp.float32).at[:H, :num_classes].set(
        raw["w_fc"].T)
    bfc = jnp.zeros((1, Cp), jnp.float32).at[0, :num_classes].set(raw["b_fc"])
    prep["wfc_t"] = wfc_t.astype(jnp.bfloat16)
    prep["bfc"] = bfc
    return prep


# ------------------------- pure-JAX f32 reference ----------------------------
def _reference_forward(x, raw, num_layers, hidden_size):
    """PyTorch nn.LSTM semantics (gate order i, f, g, o), f32 throughout."""
    B, T, _ = x.shape
    H = hidden_size
    inp = x
    h_last = []
    for layer in range(num_layers):
        w_ih = raw[f"w_ih_l{layer}"]
        w_hh = raw[f"w_hh_l{layer}"]
        b = raw[f"b_ih_l{layer}"] + raw[f"b_hh_l{layer}"]
        h = jnp.zeros((B, H), jnp.float32)
        c = jnp.zeros((B, H), jnp.float32)
        ys = []
        for t in range(T):
            g = inp[:, t, :] @ w_ih.T + h @ w_hh.T + b
            i_g = jax.nn.sigmoid(g[:, 0:H])
            f_g = jax.nn.sigmoid(g[:, H:2 * H])
            g_g = jnp.tanh(g[:, 2 * H:3 * H])
            o_g = jax.nn.sigmoid(g[:, 3 * H:4 * H])
            c = f_g * c + i_g * g_g
            h = o_g * jnp.tanh(c)
            ys.append(h)
        inp = jnp.stack(ys, axis=1)
        h_last.append(h)
    h_out = jnp.concatenate(h_last, axis=0)
    return h_out @ raw["w_fc"].T + raw["b_fc"]


if __name__ == "__main__":
    # Small, forward-consistent shapes.
    batch = 2
    seq_len = 8
    input_size = 16
    hidden_size = 32
    num_layers = 2
    num_classes = 4

    key = jax.random.PRNGKey(0)
    key, kx, kp = jax.random.split(key, 3)
    x = jax.random.normal(kx, (batch, seq_len, input_size), jnp.float32)
    raw = init_params(kp, num_layers, input_size, hidden_size, num_classes)
    prep = prepare_params(raw, num_layers, input_size, hidden_size, num_classes)

    _single_buffered_weights_ok()   # run the tiny probe outside the jit trace

    out = lstm_model_forward(x, prep, num_layers=num_layers,
                             num_classes=num_classes)
    out = jax.block_until_ready(out)
    assert out.shape == (num_layers * batch, num_classes), out.shape
    assert out.dtype == jnp.float32

    ref = _reference_forward(x, raw, num_layers, hidden_size)
    max_err = float(jnp.max(jnp.abs(out - ref)))
    assert max_err < 0.1, f"mismatch vs f32 reference: max abs err {max_err}"
    print("KERNEL_OK")
</pallas_src>

<mosaic_0001>
module attributes {stable_mosaic.version = 11 : i64} {
  func.func @_probe_kernel(%arg0: i32, %arg1: memref<8x128xf32, #tpu.memory_space<vmem>>, %arg2: memref<8x128xf32, #tpu.memory_space<vmem>>) attributes {dimension_semantics = [#tpu.dimension_semantics<arbitrary>], iteration_bounds = array<i64: 1>, scalar_prefetch = 0 : i64, scratch_operands = 0 : i64, tpu.core_type = #tpu.core_type<tc>, window_params = [{pipeline_mode = #tpu.pipeline_mode<synchronous>, transform_indices = @transform_0, window_bounds = array<i64: 8, 128>}, {pipeline_mode = #tpu.pipeline_mode<synchronous>, transform_indices = @transform_1, window_bounds = array<i64: 8, 128>}]} {
    %c0 = arith.constant 0 : index
    %c0_0 = arith.constant 0 : index
    %0 = vector.load %arg1[%c0, %c0_0] : memref<8x128xf32, #tpu.memory_space<vmem>>, vector<8x128xf32>
    %c0_1 = arith.constant 0 : index
    %c0_2 = arith.constant 0 : index
    %1 = vector.load %arg2[%c0_1, %c0_2] : memref<8x128xf32, #tpu.memory_space<vmem>>, vector<8x128xf32>
    tpu.vector_store %arg2[%c0_1, %c0_2], %0 {strides = array<i32>} : memref<8x128xf32, #tpu.memory_space<vmem>>, vector<8x128xf32>,
    return
  }
  func.func @transform_0(%arg0: i32) -> (i32, i32) {
    %c0_i32 = arith.constant 0 : i32
    %c0_i32_0 = arith.constant 0 : i32
    %c0_i32_1 = arith.constant 0 : i32
    return %c0_i32, %c0_i32_0 : i32, i32
  }
  func.func @transform_1(%arg0: i32) -> (i32, i32) {
    %c0_i32 = arith.constant 0 : i32
    %c0_i32_0 = arith.constant 0 : i32
    %c0_i32_1 = arith.constant 0 : i32
    return %c0_i32, %c0_i32_0 : i32, i32
  }
}

module attributes {stable_mosaic.version = 11 : i64} {
  func.func @_lstm_layer_kernel(%arg0: i32, %arg1: i32, %arg2: memref<8x16x128xbf16, #tpu.memory_space<vmem>>, %arg3: memref<128x512xbf16, #tpu.memory_space<vmem>>, %arg4: memref<128x512xbf16, #tpu.memory_space<vmem>>, %arg5: memref<1x512xf32, #tpu.memory_space<vmem>>, %arg6: memref<16x128xf32, #tpu.memory_space<vmem>>, %arg7: memref<16x128xf32, #tpu.memory_space<vmem>>, %arg8: memref<128x512xf32, #tpu.memory_space<vmem>>) attributes {dimension_semantics = [#tpu.dimension_semantics<parallel>, #tpu.dimension_semantics<arbitrary>], iteration_bounds = array<i64: 1, 1>, scalar_prefetch = 0 : i64, scratch_operands = 2 : i64, tpu.core_type = #tpu.core_type<tc>, window_params = [{transform_indices = @transform_0, window_bounds = array<i64: 8, 16, 128>}, {pipeline_mode = #tpu.pipeline_mode<synchronous>, transform_indices = @transform_1, window_bounds = array<i64: 128, 512>}, {pipeline_mode = #tpu.pipeline_mode<synchronous>, transform_indices = @transform_2, window_bounds = array<i64: 128, 512>}, {pipeline_mode = #tpu.pipeline_mode<synchronous>, transform_indices = @transform_3, window_bounds = array<i64: 1, 512>}, {transform_indices = @transform_4, window_bounds = array<i64: 16, 128>}]} {
    %c0_i32 = arith.constant 0 : i32
    %0 = arith.cmpi eq, %arg1, %c0_i32 : i32
    %1 = arith.extui %0 : i1 to i32
    %c0_i32_0 = arith.constant 0 : i32
    %2 = arith.cmpi ne, %1, %c0_i32_0 : i32
    scf.if %2 {
      %cst_51 = arith.constant 0.000000e+00 : f32
      %200 = vector.broadcast %cst_51 : f32 to vector<16x128xf32>
      %c0_52 = arith.constant 0 : index
      %c0_53 = arith.constant 0 : index
      %201 = vector.load %arg6[%c0_52, %c0_53] : memref<16x128xf32, #tpu.memory_space<vmem>>, vector<16x128xf32>
      tpu.vector_store %arg6[%c0_52, %c0_53], %200 {strides = array<i32>} : memref<16x128xf32, #tpu.memory_space<vmem>>, vector<16x128xf32>,
      %cst_54 = arith.constant 0.000000e+00 : f32
      %202 = vector.broadcast %cst_54 : f32 to vector<16x128xf32>
      %c0_55 = arith.constant 0 : index
      %c0_56 = arith.constant 0 : index
      %203 = vector.load %arg7[%c0_55, %c0_56] : memref<16x128xf32, #tpu.memory_space<vmem>>, vector<16x128xf32>
      tpu.vector_store %arg7[%c0_55, %c0_56], %202 {strides = array<i32>} : memref<16x128xf32, #tpu.memory_space<vmem>>, vector<16x128xf32>,
    } else {
    }
    %c0 = arith.constant 0 : index
    %c0_1 = arith.constant 0 : index
    %c0_2 = arith.constant 0 : index
    %3 = vector.load %arg2[%c0, %c0_1, %c0_2] : memref<8x16x128xbf16, #tpu.memory_space<vmem>>, vector<8x16x128xbf16>
    %4 = vector.shape_cast %3 : vector<8x16x128xbf16> to vector<128x128xbf16>
    %c0_3 = arith.constant 0 : index
    %c0_4 = arith.constant 0 : index
    %5 = vector.load %arg3[%c0_3, %c0_4] : memref<128x512xbf16, #tpu.memory_space<vmem>>, vector<128x512xbf16>
    %cst = arith.constant dense<0.000000e+00> : vector<128x512xf32>
    %6 = tpu.matmul %4, %5, %cst {dimension_numbers = #tpu.dot_dimension_numbers<[1], [0], [0], [1], [0, 0, 1, 1], [], []>} : vector<128x128xbf16>, vector<128x512xbf16>, vector<128x512xf32> -> vector<128x512xf32>
    %c0_5 = arith.constant 0 : index
    %c0_6 = arith.constant 0 : index
    %7 = vector.load %arg5[%c0_5, %c0_6] : memref<1x512xf32, #tpu.memory_space<vmem>>, vector<1x512xf32>
    %8 = vector.broadcast %7 : vector<1x512xf32> to vector<128x512xf32>
    %9 = arith.addf %6, %8 : vector<128x512xf32>
    %c0_7 = arith.constant 0 : index
    %c0_8 = arith.constant 0 : index
    %10 = vector.load %arg8[%c0_7, %c0_8] : memref<128x512xf32, #tpu.memory_space<vmem>>, vector<128x512xf32>
    tpu.vector_store %arg8[%c0_7, %c0_8], %9 {strides = array<i32>} : memref<128x512xf32, #tpu.memory_space<vmem>>, vector<128x512xf32>,
    %c0_9 = arith.constant 0 : index
    %c0_10 = arith.constant 0 : index
    %11 = vector.load %arg4[%c0_9, %c0_10] : memref<128x512xbf16, #tpu.memory_space<vmem>>, vector<128x512xbf16>
    %c0_11 = arith.constant 0 : index
    %c0_12 = arith.constant 0 : index
    %12 = vector.load %arg6[%c0_11, %c0_12] : memref<16x128xf32, #tpu.memory_space<vmem>>, vector<16x128xf32>
    %c0_13 = arith.constant 0 : index
    %c0_14 = arith.constant 0 : index
    %13 = vector.load %arg7[%c0_13, %c0_14] : memref<16x128xf32, #tpu.memory_space<vmem>>, vector<16x128xf32>
    %c0_i32_15 = arith.constant 0 : i32
    %c16_i32 = arith.constant 16 : i32
    %14 = arith.muli %c0_i32_15, %c16_i32 : i32
    %15 = tpu.assume_multiple %14, 16 : i32
    %16 = arith.index_cast %15 : i32 to index
    %c0_16 = arith.constant 0 : index
    %17 = vector.load %arg8[%16, %c0_16] : memref<128x512xf32, #tpu.memory_space<vmem>>, vector<16x512xf32>
    %18 = arith.truncf %12 : vector<16x128xf32> to vector<16x128xbf16>
    %cst_17 = arith.constant dense<0.000000e+00> : vector<16x512xf32>
    %19 = tpu.matmul %18, %11, %cst_17 {dimension_numbers = #tpu.dot_dimension_numbers<[1], [0], [0], [1], [0, 0, 1, 1], [], []>} : vector<16x128xbf16>, vector<128x512xbf16>, vector<16x512xf32> -> vector<16x512xf32>
    %20 = arith.addf %17, %19 : vector<16x512xf32>
    %21 = vector.extract_strided_slice %20 {offsets = [0, 0], sizes = [16, 384], strides = [1, 1]} : vector<16x512xf32> to vector<16x384xf32>
    %22 = arith.negf %21 : vector<16x384xf32>
    %23 = math.exp %22 : vector<16x384xf32>
    %cst_18 = arith.constant 1.000000e+00 : f32
    %24 = vector.broadcast %cst_18 : f32 to vector<16x384xf32>
    %25 = arith.addf %24, %23 : vector<16x384xf32>
    %26 = arith.divf %24, %25 : vector<16x384xf32>
    %27 = vector.extract_strided_slice %26 {offsets = [0, 0], sizes = [16, 128], strides = [1, 1]} : vector<16x384xf32> to vector<16x128xf32>
    %28 = vector.extract_strided_slice %26 {offsets = [0, 128], sizes = [16, 128], strides = [1, 1]} : vector<16x384xf32> to vector<16x128xf32>
    %29 = vector.extract_strided_slice %26 {offsets = [0, 256], sizes = [16, 128], strides = [1, 1]} : vector<16x384xf32> to vector<16x128xf32>
    %30 = vector.extract_strided_slice %20 {offsets = [0, 384], sizes = [16, 128], strides = [1, 1]} : vector<16x512xf32> to vector<16x128xf32>
    %31 = math.tanh %30 : vector<16x128xf32>
    %32 = arith.mulf %28, %13 : vector<16x128xf32>
    %33 = arith.mulf %27, %31 : vector<16x128xf32>
    %34 = arith.addf %32, %33 : vector<16x128xf32>
    %35 = math.tanh %34 : vector<16x128xf32>
    %36 = arith.mulf %29, %35 : vector<16x128xf32>
    %c1_i32 = arith.constant 1 : i32
    %c16_i32_19 = arith.constant 16 : i32
    %37 = arith.muli %c1_i32, %c16_i32_19 : i32
    %38 = tpu.assume_multiple %37, 16 : i32
    %39 = arith.index_cast %38 : i32 to index
    %c0_20 = arith.constant 0 : index
    %40 = vector.load %arg8[%39, %c0_20] : memref<128x512xf32, #tpu.memory_space<vmem>>, vector<16x512xf32>
    %41 = arith.truncf %36 : vector<16x128xf32> to vector<16x128xbf16>
    %cst_21 = arith.constant dense<0.000000e+00> : vector<16x512xf32>
    %42 = tpu.matmul %41, %11, %cst_21 {dimension_numbers = #tpu.dot_dimension_numbers<[1], [0], [0], [1], [0, 0, 1, 1], [], []>} : vector<16x128xbf16>, vector<128x512xbf16>, vector<16x512xf32> -> vector<16x512xf32>
    %43 = arith.addf %40, %42 : vector<16x512xf32>
    %44 = vector.extract_strided_slice %43 {offsets = [0, 0], sizes = [16, 384], strides = [1, 1]} : vector<16x512xf32> to vector<16x384xf32>
    %45 = arith.negf %44 : vector<16x384xf32>
    %46 = math.exp %45 : vector<16x384xf32>
    %cst_22 = arith.constant 1.000000e+00 : f32
    %47 = vector.broadcast %cst_22 : f32 to vector<16x384xf32>
    %48 = arith.addf %47, %46 : vector<16x384xf32>
    %49 = arith.divf %47, %48 : vector<16x384xf32>
    %50 = vector.extract_strided_slice %49 {offsets = [0, 0], sizes = [16, 128], strides = [1, 1]} : vector<16x384xf32> to vector<16x128xf32>
    %51 = vector.extract_strided_slice %49 {offsets = [0, 128], sizes = [16, 128], strides = [1, 1]} : vector<16x384xf32> to vector<16x128xf32>
    %52 = vector.extract_strided_slice %49 {offsets = [0, 256], sizes = [16, 128], strides = [1, 1]} : vector<16x384xf32> to vector<16x128xf32>
    %53 = vector.extract_strided_slice %43 {offsets = [0, 384], sizes = [16, 128], strides = [1, 1]} : vector<16x512xf32> to vector<16x128xf32>
    %54 = math.tanh %53 : vector<16x128xf32>
    %55 = arith.mulf %51, %34 : vector<16x128xf32>
    %56 = arith.mulf %50, %54 : vector<16x128xf32>
    %57 = arith.addf %55, %56 : vector<16x128xf32>
    %58 = math.tanh %57 : vector<16x128xf32>
    %59 = arith.mulf %52, %58 : vector<16x128xf32>
    %c2_i32 = arith.constant 2 : i32
    %c16_i32_23 = arith.constant 16 : i32
    %60 = arith.muli %c2_i32, %c16_i32_23 : i32
    %61 = tpu.assume_multiple %60, 16 : i32
    %62 = arith.index_cast %61 : i32 to index
    %c0_24 = arith.constant 0 : index
    %63 = vector.load %arg8[%62, %c0_24] : memref<128x512xf32, #tpu.memory_space<vmem>>, vector<16x512xf32>
    %64 = arith.truncf %59 : vector<16x128xf32> to vector<16x128xbf16>
    %cst_25 = arith.constant dense<0.000000e+00> : vector<16x512xf32>
    %65 = tpu.matmul %64, %11, %cst_25 {dimension_numbers = #tpu.dot_dimension_numbers<[1], [0], [0], [1], [0, 0, 1, 1], [], []>} : vector<16x128xbf16>, vector<128x512xbf16>, vector<16x512xf32> -> vector<16x512xf32>
    %66 = arith.addf %63, %65 : vector<16x512xf32>
    %67 = vector.extract_strided_slice %66 {offsets = [0, 0], sizes = [16, 384], strides = [1, 1]} : vector<16x512xf32> to vector<16x384xf32>
    %68 = arith.negf %67 : vector<16x384xf32>
    %69 = math.exp %68 : vector<16x384xf32>
    %cst_26 = arith.constant 1.000000e+00 : f32
    %70 = vector.broadcast %cst_26 : f32 to vector<16x384xf32>
    %71 = arith.addf %70, %69 : vector<16x384xf32>
    %72 = arith.divf %70, %71 : vector<16x384xf32>
    %73 = vector.extract_strided_slice %72 {offsets = [0, 0], sizes = [16, 128], strides = [1, 1]} : vector<16x384xf32> to vector<16x128xf32>
    %74 = vector.extract_strided_slice %72 {offsets = [0, 128], sizes = [16, 128], strides = [1, 1]} : vector<16x384xf32> to vector<16x128xf32>
    %75 = vector.extract_strided_slice %72 {offsets = [0, 256], sizes = [16, 128], strides = [1, 1]} : vector<16x384xf32> to vector<16x128xf32>
    %76 = vector.extract_strided_slice %66 {offsets = [0, 384], sizes = [16, 128], strides = [1, 1]} : vector<16x512xf32> to vector<16x128xf32>
    %77 = math.tanh %76 : vector<16x128xf32>
    %78 = arith.mulf %74, %57 : vector<16x128xf32>
    %79 = arith.mulf %73, %77 : vector<16x128xf32>
    %80 = arith.addf %78, %79 : vector<16x128xf32>
    %81 = math.tanh %80 : vector<16x128xf32>
    %82 = arith.mulf %75, %81 : vector<16x128xf32>
    %c3_i32 = arith.constant 3 : i32
    %c16_i32_27 = arith.constant 16 : i32
    %83 = arith.muli %c3_i32, %c16_i32_27 : i32
    %84 = tpu.assume_multiple %83, 16 : i32
    %85 = arith.index_cast %84 : i32 to index
    %c0_28 = arith.constant 0 : index
    %86 = vector.load %arg8[%85, %c0_28] : memref<128x512xf32, #tpu.memory_space<vmem>>, vector<16x512xf32>
    %87 = arith.truncf %82 : vector<16x128xf32> to vector<16x128xbf16>
    %cst_29 = arith.constant dense<0.000000e+00> : vector<16x512xf32>
    %88 = tpu.matmul %87, %11, %cst_29 {dimension_numbers = #tpu.dot_dimension_numbers<[1], [0], [0], [1], [0, 0, 1, 1], [], []>} : vector<16x128xbf16>, vector<128x512xbf16>, vector<16x512xf32> -> vector<16x512xf32>
    %89 = arith.addf %86, %88 : vector<16x512xf32>
    %90 = vector.extract_strided_slice %89 {offsets = [0, 0], sizes = [16, 384], strides = [1, 1]} : vector<16x512xf32> to vector<16x384xf32>
    %91 = arith.negf %90 : vector<16x384xf32>
    %92 = math.exp %91 : vector<16x384xf32>
    %cst_30 = arith.constant 1.000000e+00 : f32
    %93 = vector.broadcast %cst_30 : f32 to vector<16x384xf32>
    %94 = arith.addf %93, %92 : vector<16x384xf32>
    %95 = arith.divf %93, %94 : vector<16x384xf32>
    %96 = vector.extract_strided_slice %95 {offsets = [0, 0], sizes = [16, 128], strides = [1, 1]} : vector<16x384xf32> to vector<16x128xf32>
    %97 = vector.extract_strided_slice %95 {offsets = [0, 128], sizes = [16, 128], strides = [1, 1]} : vector<16x384xf32> to vector<16x128xf32>
    %98 = vector.extract_strided_slice %95 {offsets = [0, 256], sizes = [16, 128], strides = [1, 1]} : vector<16x384xf32> to vector<16x128xf32>
    %99 = vector.extract_strided_slice %89 {offsets = [0, 384], sizes = [16, 128], strides = [1, 1]} : vector<16x512xf32> to vector<16x128xf32>
    %100 = math.tanh %99 : vector<16x128xf32>
    %101 = arith.mulf %97, %80 : vector<16x128xf32>
    %102 = arith.mulf %96, %100 : vector<16x128xf32>
    %103 = arith.addf %101, %102 : vector<16x128xf32>
    %104 = math.tanh %103 : vector<16x128xf32>
    %105 = arith.mulf %98, %104 : vector<16x128xf32>
    %c4_i32 = arith.constant 4 : i32
    %c16_i32_31 = arith.constant 16 : i32
    %106 = arith.muli %c4_i32, %c16_i32_31 : i32
    %107 = tpu.assume_multiple %106, 16 : i32
    %108 = arith.index_cast %107 : i32 to index
    %c0_32 = arith.constant 0 : index
    %109 = vector.load %arg8[%108, %c0_32] : memref<128x512xf32, #tpu.memory_space<vmem>>, vector<16x512xf32>
    %110 = arith.truncf %105 : vector<16x128xf32> to vector<16x128xbf16>
    %cst_33 = arith.constant dense<0.000000e+00> : vector<16x512xf32>
    %111 = tpu.matmul %110, %11, %cst_33 {dimension_numbers = #tpu.dot_dimension_numbers<[1], [0], [0], [1], [0, 0, 1, 1], [], []>} : vector<16x128xbf16>, vector<128x512xbf16>, vector<16x512xf32> -> vector<16x512xf32>
    %112 = arith.addf %109, %111 : vector<16x512xf32>
    %113 = vector.extract_strided_slice %112 {offsets = [0, 0], sizes = [16, 384], strides = [1, 1]} : vector<16x512xf32> to vector<16x384xf32>
    %114 = arith.negf %113 : vector<16x384xf32>
    %115 = math.exp %114 : vector<16x384xf32>
    %cst_34 = arith.constant 1.000000e+00 : f32
    %116 = vector.broadcast %cst_34 : f32 to vector<16x384xf32>
    %117 = arith.addf %116, %115 : vector<16x384xf32>
    %118 = arith.divf %116, %117 : vector<16x384xf32>
    %119 = vector.extract_strided_slice %118 {offsets = [0, 0], sizes = [16, 128], strides = [1, 1]} : vector<16x384xf32> to vector<16x128xf32>
    %120 = vector.extract_strided_slice %118 {offsets = [0, 128], sizes = [16, 128], strides = [1, 1]} : vector<16x384xf32> to vector<16x128xf32>
    %121 = vector.extract_strided_slice %118 {offsets = [0, 256], sizes = [16, 128], strides = [1, 1]} : vector<16x384xf32> to vector<16x128xf32>
    %122 = vector.extract_strided_slice %112 {offsets = [0, 384], sizes = [16, 128], strides = [1, 1]} : vector<16x512xf32> to vector<16x128xf32>
    %123 = math.tanh %122 : vector<16x128xf32>
    %124 = arith.mulf %120, %103 : vector<16x128xf32>
    %125 = arith.mulf %119, %123 : vector<16x128xf32>
    %126 = arith.addf %124, %125 : vector<16x128xf32>
    %127 = math.tanh %126 : vector<16x128xf32>
    %128 = arith.mulf %121, %127 : vector<16x128xf32>
    %c5_i32 = arith.constant 5 : i32
    %c16_i32_35 = arith.constant 16 : i32
    %129 = arith.muli %c5_i32, %c16_i32_35 : i32
    %130 = tpu.assume_multiple %129, 16 : i32
    %131 = arith.index_cast %130 : i32 to index
    %c0_36 = arith.constant 0 : index
    %132 = vector.load %arg8[%131, %c0_36] : memref<128x512xf32, #tpu.memory_space<vmem>>, vector<16x512xf32>
    %133 = arith.truncf %128 : vector<16x128xf32> to vector<16x128xbf16>
    %cst_37 = arith.constant dense<0.000000e+00> : vector<16x512xf32>
    %134 = tpu.matmul %133, %11, %cst_37 {dimension_numbers = #tpu.dot_dimension_numbers<[1], [0], [0], [1], [0, 0, 1, 1], [], []>} : vector<16x128xbf16>, vector<128x512xbf16>, vector<16x512xf32> -> vector<16x512xf32>
    %135 = arith.addf %132, %134 : vector<16x512xf32>
    %136 = vector.extract_strided_slice %135 {offsets = [0, 0], sizes = [16, 384], strides = [1, 1]} : vector<16x512xf32> to vector<16x384xf32>
    %137 = arith.negf %136 : vector<16x384xf32>
    %138 = math.exp %137 : vector<16x384xf32>
    %cst_38 = arith.constant 1.000000e+00 : f32
    %139 = vector.broadcast %cst_38 : f32 to vector<16x384xf32>
    %140 = arith.addf %139, %138 : vector<16x384xf32>
    %141 = arith.divf %139, %140 : vector<16x384xf32>
    %142 = vector.extract_strided_slice %141 {offsets = [0, 0], sizes = [16, 128], strides = [1, 1]} : vector<16x384xf32> to vector<16x128xf32>
    %143 = vector.extract_strided_slice %141 {offsets = [0, 128], sizes = [16, 128], strides = [1, 1]} : vector<16x384xf32> to vector<16x128xf32>
    %144 = vector.extract_strided_slice %141 {offsets = [0, 256], sizes = [16, 128], strides = [1, 1]} : vector<16x384xf32> to vector<16x128xf32>
    %145 = vector.extract_strided_slice %135 {offsets = [0, 384], sizes = [16, 128], strides = [1, 1]} : vector<16x512xf32> to vector<16x128xf32>
    %146 = math.tanh %145 : vector<16x128xf32>
    %147 = arith.mulf %143, %126 : vector<16x128xf32>
    %148 = arith.mulf %142, %146 : vector<16x128xf32>
    %149 = arith.addf %147, %148 : vector<16x128xf32>
    %150 = math.tanh %149 : vector<16x128xf32>
    %151 = arith.mulf %144, %150 : vector<16x128xf32>
    %c6_i32 = arith.constant 6 : i32
    %c16_i32_39 = arith.constant 16 : i32
    %152 = arith.muli %c6_i32, %c16_i32_39 : i32
    %153 = tpu.assume_multiple %152, 16 : i32
    %154 = arith.index_cast %153 : i32 to index
    %c0_40 = arith.constant 0 : index
    %155 = vector.load %arg8[%154, %c0_40] : memref<128x512xf32, #tpu.memory_space<vmem>>, vector<16x512xf32>
    %156 = arith.truncf %151 : vector<16x128xf32> to vector<16x128xbf16>
    %cst_41 = arith.constant dense<0.000000e+00> : vector<16x512xf32>
    %157 = tpu.matmul %156, %11, %cst_41 {dimension_numbers = #tpu.dot_dimension_numbers<[1], [0], [0], [1], [0, 0, 1, 1], [], []>} : vector<16x128xbf16>, vector<128x512xbf16>, vector<16x512xf32> -> vector<16x512xf32>
    %158 = arith.addf %155, %157 : vector<16x512xf32>
    %159 = vector.extract_strided_slice %158 {offsets = [0, 0], sizes = [16, 384], strides = [1, 1]} : vector<16x512xf32> to vector<16x384xf32>
    %160 = arith.negf %159 : vector<16x384xf32>
    %161 = math.exp %160 : vector<16x384xf32>
    %cst_42 = arith.constant 1.000000e+00 : f32
    %162 = vector.broadcast %cst_42 : f32 to vector<16x384xf32>
    %163 = arith.addf %162, %161 : vector<16x384xf32>
    %164 = arith.divf %162, %163 : vector<16x384xf32>
    %165 = vector.extract_strided_slice %164 {offsets = [0, 0], sizes = [16, 128], strides = [1, 1]} : vector<16x384xf32> to vector<16x128xf32>
    %166 = vector.extract_strided_slice %164 {offsets = [0, 128], sizes = [16, 128], strides = [1, 1]} : vector<16x384xf32> to vector<16x128xf32>
    %167 = vector.extract_strided_slice %164 {offsets = [0, 256], sizes = [16, 128], strides = [1, 1]} : vector<16x384xf32> to vector<16x128xf32>
    %168 = vector.extract_strided_slice %158 {offsets = [0, 384], sizes = [16, 128], strides = [1, 1]} : vector<16x512xf32> to vector<16x128xf32>
    %169 = math.tanh %168 : vector<16x128xf32>
    %170 = arith.mulf %166, %149 : vector<16x128xf32>
    %171 = arith.mulf %165, %169 : vector<16x128xf32>
    %172 = arith.addf %170, %171 : vector<16x128xf32>
    %173 = math.tanh %172 : vector<16x128xf32>
    %174 = arith.mulf %167, %173 : vector<16x128xf32>
    %c7_i32 = arith.constant 7 : i32
    %c16_i32_43 = arith.constant 16 : i32
    %175 = arith.muli %c7_i32, %c16_i32_43 : i32
    %176 = tpu.assume_multiple %175, 16 : i32
    %177 = arith.index_cast %176 : i32 to index
    %c0_44 = arith.constant 0 : index
    %178 = vector.load %arg8[%177, %c0_44] : memref<128x512xf32, #tpu.memory_space<vmem>>, vector<16x512xf32>
    %179 = arith.truncf %174 : vector<16x128xf32> to vector<16x128xbf16>
    %cst_45 = arith.constant dense<0.000000e+00> : vector<16x512xf32>
    %180 = tpu.matmul %179, %11, %cst_45 {dimension_numbers = #tpu.dot_dimension_numbers<[1], [0], [0], [1], [0, 0, 1, 1], [], []>} : vector<16x128xbf16>, vector<128x512xbf16>, vector<16x512xf32> -> vector<16x512xf32>
    %181 = arith.addf %178, %180 : vector<16x512xf32>
    %182 = vector.extract_strided_slice %181 {offsets = [0, 0], sizes = [16, 384], strides = [1, 1]} : vector<16x512xf32> to vector<16x384xf32>
    %183 = arith.negf %182 : vector<16x384xf32>
    %184 = math.exp %183 : vector<16x384xf32>
    %cst_46 = arith.constant 1.000000e+00 : f32
    %185 = vector.broadcast %cst_46 : f32 to vector<16x384xf32>
    %186 = arith.addf %185, %184 : vector<16x384xf32>
    %187 = arith.divf %185, %186 : vector<16x384xf32>
    %188 = vector.extract_strided_slice %187 {offsets = [0, 0], sizes = [16, 128], strides = [1, 1]} : vector<16x384xf32> to vector<16x128xf32>
    %189 = vector.extract_strided_slice %187 {offsets = [0, 128], sizes = [16, 128], strides = [1, 1]} : vector<16x384xf32> to vector<16x128xf32>
    %190 = vector.extract_strided_slice %187 {offsets = [0, 256], sizes = [16, 128], strides = [1, 1]} : vector<16x384xf32> to vector<16x128xf32>
    %191 = vector.extract_strided_slice %181 {offsets = [0, 384], sizes = [16, 128], strides = [1, 1]} : vector<16x512xf32> to vector<16x128xf32>
    %192 = math.tanh %191 : vector<16x128xf32>
    %193 = arith.mulf %189, %172 : vector<16x128xf32>
    %194 = arith.mulf %188, %192 : vector<16x128xf32>
    %195 = arith.addf %193, %194 : vector<16x128xf32>
    %196 = math.tanh %195 : vector<16x128xf32>
    %197 = arith.mulf %190, %196 : vector<16x128xf32>
    %c8_i32 = arith.constant 8 : i32
    %c0_47 = arith.constant 0 : index
    %c0_48 = arith.constant 0 : index
    %198 = vector.load %arg6[%c0_47, %c0_48] : memref<16x128xf32, #tpu.memory_space<vmem>>, vector<16x128xf32>
    tpu.vector_store %arg6[%c0_47, %c0_48], %197 {strides = array<i32>} : memref<16x128xf32, #tpu.memory_space<vmem>>, vector<16x128xf32>,
    %c0_49 = arith.constant 0 : index
    %c0_50 = arith.constant 0 : index
    %199 = vector.load %arg7[%c0_49, %c0_50] : memref<16x128xf32, #tpu.memory_space<vmem>>, vector<16x128xf32>
    tpu.vector_store %arg7[%c0_49, %c0_50], %195 {strides = array<i32>} : memref<16x128xf32, #tpu.memory_space<vmem>>, vector<16x128xf32>,
    return
  }
  func.func @transform_0(%arg0: i32, %arg1: i32) -> (i32, i32, i32) {
    %c0_i32 = arith.constant 0 : i32
    %c0_i32_0 = arith.constant 0 : i32
    return %arg1, %arg0, %c0_i32 : i32, i32, i32
  }
  func.func @transform_1(%arg0: i32, %arg1: i32) -> (i32, i32) {
    %c0_i32 = arith.constant 0 : i32
    %c0_i32_0 = arith.constant 0 : i32
    %c0_i32_1 = arith.constant 0 : i32
    return %c0_i32, %c0_i32_0 : i32, i32
  }
  func.func @transform_2(%arg0: i32, %arg1: i32) -> (i32, i32) {
    %c0_i32 = arith.constant 0 : i32
    %c0_i32_0 = arith.constant 0 : i32
    %c0_i32_1 = arith.constant 0 : i32
    return %c0_i32, %c0_i32_0 : i32, i32
  }
  func.func @transform_3(%arg0: i32, %arg1: i32) -> (i32, i32) {
    %c0_i32 = arith.constant 0 : i32
    %c0_i32_0 = arith.constant 0 : i32
    %c0_i32_1 = arith.constant 0 : i32
    return %c0_i32, %c0_i32_0 : i32, i32
  }
  func.func @transform_4(%arg0: i32, %arg1: i32) -> (i32, i32) {
    %c0_i32 = arith.constant 0 : i32
    %c0_i32_0 = arith.constant 0 : i32
    return %arg0, %c0_i32 : i32, i32
  }
}

module attributes {stable_mosaic.version = 11 : i64} {
  func.func @_lstm_layer_kernel(%arg0: i32, %arg1: i32, %arg2: memref<8x16x128xbf16, #tpu.memory_space<vmem>>, %arg3: memref<128x512xbf16, #tpu.memory_space<vmem>>, %arg4: memref<128x512xbf16, #tpu.memory_space<vmem>>, %arg5: memref<1x512xf32, #tpu.memory_space<vmem>>, %arg6: memref<8x16x128xbf16, #tpu.memory_space<vmem>>, %arg7: memref<16x128xf32, #tpu.memory_space<vmem>>, %arg8: memref<16x128xf32, #tpu.memory_space<vmem>>, %arg9: memref<128x512xf32, #tpu.memory_space<vmem>>) attributes {dimension_semantics = [#tpu.dimension_semantics<parallel>, #tpu.dimension_semantics<arbitrary>], iteration_bounds = array<i64: 1, 1>, scalar_prefetch = 0 : i64, scratch_operands = 2 : i64, tpu.core_type = #tpu.core_type<tc>, window_params = [{transform_indices = @transform_0, window_bounds = array<i64: 8, 16, 128>}, {pipeline_mode = #tpu.pipeline_mode<synchronous>, transform_indices = @transform_1, window_bounds = array<i64: 128, 512>}, {pipeline_mode = #tpu.pipeline_mode<synchronous>, transform_indices = @transform_2, window_bounds = array<i64: 128, 512>}, {pipeline_mode = #tpu.pipeline_mode<synchronous>, transform_indices = @transform_3, window_bounds = array<i64: 1, 512>}, {transform_indices = @transform_4, window_bounds = array<i64: 8, 16, 128>}, {transform_indices = @transform_5, window_bounds = array<i64: 16, 128>}]} {
    %c0_i32 = arith.constant 0 : i32
    %0 = arith.cmpi eq, %arg1, %c0_i32 : i32
    %1 = arith.extui %0 : i1 to i32
    %c0_i32_0 = arith.constant 0 : i32
    %2 = arith.cmpi ne, %1, %c0_i32_0 : i32
    scf.if %2 {
      %cst_67 = arith.constant 0.000000e+00 : f32
      %240 = vector.broadcast %cst_67 : f32 to vector<16x128xf32>
      %c0_68 = arith.constant 0 : index
      %c0_69 = arith.constant 0 : index
      %241 = vector.load %arg7[%c0_68, %c0_69] : memref<16x128xf32, #tpu.memory_space<vmem>>, vector<16x128xf32>
      tpu.vector_store %arg7[%c0_68, %c0_69], %240 {strides = array<i32>} : memref<16x128xf32, #tpu.memory_space<vmem>>, vector<16x128xf32>,
      %cst_70 = arith.constant 0.000000e+00 : f32
      %242 = vector.broadcast %cst_70 : f32 to vector<16x128xf32>
      %c0_71 = arith.constant 0 : index
      %c0_72 = arith.constant 0 : index
      %243 = vector.load %arg8[%c0_71, %c0_72] : memref<16x128xf32, #tpu.memory_space<vmem>>, vector<16x128xf32>
      tpu.vector_store %arg8[%c0_71, %c0_72], %242 {strides = array<i32>} : memref<16x128xf32, #tpu.memory_space<vmem>>, vector<16x128xf32>,
    } else {
    }
    %c0 = arith.constant 0 : index
    %c0_1 = arith.constant 0 : index
    %c0_2 = arith.constant 0 : index
    %3 = vector.load %arg2[%c0, %c0_1, %c0_2] : memref<8x16x128xbf16, #tpu.memory_space<vmem>>, vector<8x16x128xbf16>
    %4 = vector.shape_cast %3 : vector<8x16x128xbf16> to vector<128x128xbf16>
    %c0_3 = arith.constant 0 : index
    %c0_4 = arith.constant 0 : index
    %5 = vector.load %arg3[%c0_3, %c0_4] : memref<128x512xbf16, #tpu.memory_space<vmem>>, vector<128x512xbf16>
    %cst = arith.constant dense<0.000000e+00> : vector<128x512xf32>
    %6 = tpu.matmul %4, %5, %cst {dimension_numbers = #tpu.dot_dimension_numbers<[1], [0], [0], [1], [0, 0, 1, 1], [], []>} : vector<128x128xbf16>, vector<128x512xbf16>, vector<128x512xf32> -> vector<128x512xf32>
    %c0_5 = arith.constant 0 : index
    %c0_6 = arith.constant 0 : index
    %7 = vector.load %arg5[%c0_5, %c0_6] : memref<1x512xf32, #tpu.memory_space<vmem>>, vector<1x512xf32>
    %8 = vector.broadcast %7 : vector<1x512xf32> to vector<128x512xf32>
    %9 = arith.addf %6, %8 : vector<128x512xf32>
    %c0_7 = arith.constant 0 : index
    %c0_8 = arith.constant 0 : index
    %10 = vector.load %arg9[%c0_7, %c0_8] : memref<128x512xf32, #tpu.memory_space<vmem>>, vector<128x512xf32>
    tpu.vector_store %arg9[%c0_7, %c0_8], %9 {strides = array<i32>} : memref<128x512xf32, #tpu.memory_space<vmem>>, vector<128x512xf32>,
    %c0_9 = arith.constant 0 : index
    %c0_10 = arith.constant 0 : index
    %11 = vector.load %arg4[%c0_9, %c0_10] : memref<128x512xbf16, #tpu.memory_space<vmem>>, vector<128x512xbf16>
    %c0_11 = arith.constant 0 : index
    %c0_12 = arith.constant 0 : index
    %12 = vector.load %arg7[%c0_11, %c0_12] : memref<16x128xf32, #tpu.memory_space<vmem>>, vector<16x128xf32>
    %c0_13 = arith.constant 0 : index
    %c0_14 = arith.constant 0 : index
    %13 = vector.load %arg8[%c0_13, %c0_14] : memref<16x128xf32, #tpu.memory_space<vmem>>, vector<16x128xf32>
    %c0_i32_15 = arith.constant 0 : i32
    %c16_i32 = arith.constant 16 : i32
    %14 = arith.muli %c0_i32_15, %c16_i32 : i32
    %15 = tpu.assume_multiple %14, 16 : i32
    %16 = arith.index_cast %15 : i32 to index
    %c0_16 = arith.constant 0 : index
    %17 = vector.load %arg9[%16, %c0_16] : memref<128x512xf32, #tpu.memory_space<vmem>>, vector<16x512xf32>
    %18 = arith.truncf %12 : vector<16x128xf32> to vector<16x128xbf16>
    %cst_17 = arith.constant dense<0.000000e+00> : vector<16x512xf32>
    %19 = tpu.matmul %18, %11, %cst_17 {dimension_numbers = #tpu.dot_dimension_numbers<[1], [0], [0], [1], [0, 0, 1, 1], [], []>} : vector<16x128xbf16>, vector<128x512xbf16>, vector<16x512xf32> -> vector<16x512xf32>
    %20 = arith.addf %17, %19 : vector<16x512xf32>
    %21 = vector.extract_strided_slice %20 {offsets = [0, 0], sizes = [16, 384], strides = [1, 1]} : vector<16x512xf32> to vector<16x384xf32>
    %22 = arith.negf %21 : vector<16x384xf32>
    %23 = math.exp %22 : vector<16x384xf32>
    %cst_18 = arith.constant 1.000000e+00 : f32
    %24 = vector.broadcast %cst_18 : f32 to vector<16x384xf32>
    %25 = arith.addf %24, %23 : vector<16x384xf32>
    %26 = arith.divf %24, %25 : vector<16x384xf32>
    %27 = vector.extract_strided_slice %26 {offsets = [0, 0], sizes = [16, 128], strides = [1, 1]} : vector<16x384xf32> to vector<16x128xf32>
    %28 = vector.extract_strided_slice %26 {offsets = [0, 128], sizes = [16, 128], strides = [1, 1]} : vector<16x384xf32> to vector<16x128xf32>
    %29 = vector.extract_strided_slice %26 {offsets = [0, 256], sizes = [16, 128], strides = [1, 1]} : vector<16x384xf32> to vector<16x128xf32>
    %30 = vector.extract_strided_slice %20 {offsets = [0, 384], sizes = [16, 128], strides = [1, 1]} : vector<16x512xf32> to vector<16x128xf32>
    %31 = math.tanh %30 : vector<16x128xf32>
    %32 = arith.mulf %28, %13 : vector<16x128xf32>
    %33 = arith.mulf %27, %31 : vector<16x128xf32>
    %34 = arith.addf %32, %33 : vector<16x128xf32>
    %35 = math.tanh %34 : vector<16x128xf32>
    %36 = arith.mulf %29, %35 : vector<16x128xf32>
    %37 = arith.truncf %36 : vector<16x128xf32> to vector<16x128xbf16>
    %38 = arith.index_cast %c0_i32_15 : i32 to index
    %c0_19 = arith.constant 0 : index
    %c0_20 = arith.constant 0 : index
    %39 = vector.load %arg6[%38, %c0_19, %c0_20] : memref<8x16x128xbf16, #tpu.memory_space<vmem>>, vector<1x16x128xbf16>
    %40 = vector.shape_cast %39 : vector<1x16x128xbf16> to vector<16x128xbf16>
    %41 = vector.shape_cast %37 : vector<16x128xbf16> to vector<1x16x128xbf16>
    tpu.vector_store %arg6[%38, %c0_19, %c0_20], %41 {strides = array<i32>} : memref<8x16x128xbf16, #tpu.memory_space<vmem>>, vector<1x16x128xbf16>,
    %c1_i32 = arith.constant 1 : i32
    %c16_i32_21 = arith.constant 16 : i32
    %42 = arith.muli %c1_i32, %c16_i32_21 : i32
    %43 = tpu.assume_multiple %42, 16 : i32
    %44 = arith.index_cast %43 : i32 to index
    %c0_22 = arith.constant 0 : index
    %45 = vector.load %arg9[%44, %c0_22] : memref<128x512xf32, #tpu.memory_space<vmem>>, vector<16x512xf32>
    %46 = arith.truncf %36 : vector<16x128xf32> to vector<16x128xbf16>
    %cst_23 = arith.constant dense<0.000000e+00> : vector<16x512xf32>
    %47 = tpu.matmul %46, %11, %cst_23 {dimension_numbers = #tpu.dot_dimension_numbers<[1], [0], [0], [1], [0, 0, 1, 1], [], []>} : vector<16x128xbf16>, vector<128x512xbf16>, vector<16x512xf32> -> vector<16x512xf32>
    %48 = arith.addf %45, %47 : vector<16x512xf32>
    %49 = vector.extract_strided_slice %48 {offsets = [0, 0], sizes = [16, 384], strides = [1, 1]} : vector<16x512xf32> to vector<16x384xf32>
    %50 = arith.negf %49 : vector<16x384xf32>
    %51 = math.exp %50 : vector<16x384xf32>
    %cst_24 = arith.constant 1.000000e+00 : f32
    %52 = vector.broadcast %cst_24 : f32 to vector<16x384xf32>
    %53 = arith.addf %52, %51 : vector<16x384xf32>
    %54 = arith.divf %52, %53 : vector<16x384xf32>
    %55 = vector.extract_strided_slice %54 {offsets = [0, 0], sizes = [16, 128], strides = [1, 1]} : vector<16x384xf32> to vector<16x128xf32>
    %56 = vector.extract_strided_slice %54 {offsets = [0, 128], sizes = [16, 128], strides = [1, 1]} : vector<16x384xf32> to vector<16x128xf32>
    %57 = vector.extract_strided_slice %54 {offsets = [0, 256], sizes = [16, 128], strides = [1, 1]} : vector<16x384xf32> to vector<16x128xf32>
    %58 = vector.extract_strided_slice %48 {offsets = [0, 384], sizes = [16, 128], strides = [1, 1]} : vector<16x512xf32> to vector<16x128xf32>
    %59 = math.tanh %58 : vector<16x128xf32>
    %60 = arith.mulf %56, %34 : vector<16x128xf32>
    %61 = arith.mulf %55, %59 : vector<16x128xf32>
    %62 = arith.addf %60, %61 : vector<16x128xf32>
    %63 = math.tanh %62 : vector<16x128xf32>
    %64 = arith.mulf %57, %63 : vector<16x128xf32>
    %65 = arith.truncf %64 : vector<16x128xf32> to vector<16x128xbf16>
    %66 = arith.index_cast %c1_i32 : i32 to index
    %c0_25 = arith.constant 0 : index
    %c0_26 = arith.constant 0 : index
    %67 = vector.load %arg6[%66, %c0_25, %c0_26] : memref<8x16x128xbf16, #tpu.memory_space<vmem>>, vector<1x16x128xbf16>
    %68 = vector.shape_cast %67 : vector<1x16x128xbf16> to vector<16x128xbf16>
    %69 = vector.shape_cast %65 : vector<16x128xbf16> to vector<1x16x128xbf16>
    tpu.vector_store %arg6[%66, %c0_25, %c0_26], %69 {strides = array<i32>} : memref<8x16x128xbf16, #tpu.memory_space<vmem>>, vector<1x16x128xbf16>,
    %c2_i32 = arith.constant 2 : i32
    %c16_i32_27 = arith.constant 16 : i32
    %70 = arith.muli %c2_i32, %c16_i32_27 : i32
    %71 = tpu.assume_multiple %70, 16 : i32
    %72 = arith.index_cast %71 : i32 to index
    %c0_28 = arith.constant 0 : index
    %73 = vector.load %arg9[%72, %c0_28] : memref<128x512xf32, #tpu.memory_space<vmem>>, vector<16x512xf32>
    %74 = arith.truncf %64 : vector<16x128xf32> to vector<16x128xbf16>
    %cst_29 = arith.constant dense<0.000000e+00> : vector<16x512xf32>
    %75 = tpu.matmul %74, %11, %cst_29 {dimension_numbers = #tpu.dot_dimension_numbers<[1], [0], [0], [1], [0, 0, 1, 1], [], []>} : vector<16x128xbf16>, vector<128x512xbf16>, vector<16x512xf32> -> vector<16x512xf32>
    %76 = arith.addf %73, %75 : vector<16x512xf32>
    %77 = vector.extract_strided_slice %76 {offsets = [0, 0], sizes = [16, 384], strides = [1, 1]} : vector<16x512xf32> to vector<16x384xf32>
    %78 = arith.negf %77 : vector<16x384xf32>
    %79 = math.exp %78 : vector<16x384xf32>
    %cst_30 = arith.constant 1.000000e+00 : f32
    %80 = vector.broadcast %cst_30 : f32 to vector<16x384xf32>
    %81 = arith.addf %80, %79 : vector<16x384xf32>
    %82 = arith.divf %80, %81 : vector<16x384xf32>
    %83 = vector.extract_strided_slice %82 {offsets = [0, 0], sizes = [16, 128], strides = [1, 1]} : vector<16x384xf32> to vector<16x128xf32>
    %84 = vector.extract_strided_slice %82 {offsets = [0, 128], sizes = [16, 128], strides = [1, 1]} : vector<16x384xf32> to vector<16x128xf32>
    %85 = vector.extract_strided_slice %82 {offsets = [0, 256], sizes = [16, 128], strides = [1, 1]} : vector<16x384xf32> to vector<16x128xf32>
    %86 = vector.extract_strided_slice %76 {offsets = [0, 384], sizes = [16, 128], strides = [1, 1]} : vector<16x512xf32> to vector<16x128xf32>
    %87 = math.tanh %86 : vector<16x128xf32>
    %88 = arith.mulf %84, %62 : vector<16x128xf32>
    %89 = arith.mulf %83, %87 : vector<16x128xf32>
    %90 = arith.addf %88, %89 : vector<16x128xf32>
    %91 = math.tanh %90 : vector<16x128xf32>
    %92 = arith.mulf %85, %91 : vector<16x128xf32>
    %93 = arith.truncf %92 : vector<16x128xf32> to vector<16x128xbf16>
    %94 = arith.index_cast %c2_i32 : i32 to index
    %c0_31 = arith.constant 0 : index
    %c0_32 = arith.constant 0 : index
    %95 = vector.load %arg6[%94, %c0_31, %c0_32] : memref<8x16x128xbf16, #tpu.memory_space<vmem>>, vector<1x16x128xbf16>
    %96 = vector.shape_cast %95 : vector<1x16x128xbf16> to vector<16x128xbf16>
    %97 = vector.shape_cast %93 : vector<16x128xbf16> to vector<1x16x128xbf16>
    tpu.vector_store %arg6[%94, %c0_31, %c0_32], %97 {strides = array<i32>} : memref<8x16x128xbf16, #tpu.memory_space<vmem>>, vector<1x16x128xbf16>,
    %c3_i32 = arith.constant 3 : i32
    %c16_i32_33 = arith.constant 16 : i32
    %98 = arith.muli %c3_i32, %c16_i32_33 : i32
    %99 = tpu.assume_multiple %98, 16 : i32
    %100 = arith.index_cast %99 : i32 to index
    %c0_34 = arith.constant 0 : index
    %101 = vector.load %arg9[%100, %c0_34] : memref<128x512xf32, #tpu.memory_space<vmem>>, vector<16x512xf32>
    %102 = arith.truncf %92 : vector<16x128xf32> to vector<16x128xbf16>
    %cst_35 = arith.constant dense<0.000000e+00> : vector<16x512xf32>
    %103 = tpu.matmul %102, %11, %cst_35 {dimension_numbers = #tpu.dot_dimension_numbers<[1], [0], [0], [1], [0, 0, 1, 1], [], []>} : vector<16x128xbf16>, vector<128x512xbf16>, vector<16x512xf32> -> vector<16x512xf32>
    %104 = arith.addf %101, %103 : vector<16x512xf32>
    %105 = vector.extract_strided_slice %104 {offsets = [0, 0], sizes = [16, 384], strides = [1, 1]} : vector<16x512xf32> to vector<16x384xf32>
    %106 = arith.negf %105 : vector<16x384xf32>
    %107 = math.exp %106 : vector<16x384xf32>
    %cst_36 = arith.constant 1.000000e+00 : f32
    %108 = vector.broadcast %cst_36 : f32 to vector<16x384xf32>
    %109 = arith.addf %108, %107 : vector<16x384xf32>
    %110 = arith.divf %108, %109 : vector<16x384xf32>
    %111 = vector.extract_strided_slice %110 {offsets = [0, 0], sizes = [16, 128], strides = [1, 1]} : vector<16x384xf32> to vector<16x128xf32>
    %112 = vector.extract_strided_slice %110 {offsets = [0, 128], sizes = [16, 128], strides = [1, 1]} : vector<16x384xf32> to vector<16x128xf32>
    %113 = vector.extract_strided_slice %110 {offsets = [0, 256], sizes = [16, 128], strides = [1, 1]} : vector<16x384xf32> to vector<16x128xf32>
    %114 = vector.extract_strided_slice %104 {offsets = [0, 384], sizes = [16, 128], strides = [1, 1]} : vector<16x512xf32> to vector<16x128xf32>
    %115 = math.tanh %114 : vector<16x128xf32>
    %116 = arith.mulf %112, %90 : vector<16x128xf32>
    %117 = arith.mulf %111, %115 : vector<16x128xf32>
    %118 = arith.addf %116, %117 : vector<16x128xf32>
    %119 = math.tanh %118 : vector<16x128xf32>
    %120 = arith.mulf %113, %119 : vector<16x128xf32>
    %121 = arith.truncf %120 : vector<16x128xf32> to vector<16x128xbf16>
    %122 = arith.index_cast %c3_i32 : i32 to index
    %c0_37 = arith.constant 0 : index
    %c0_38 = arith.constant 0 : index
    %123 = vector.load %arg6[%122, %c0_37, %c0_38] : memref<8x16x128xbf16, #tpu.memory_space<vmem>>, vector<1x16x128xbf16>
    %124 = vector.shape_cast %123 : vector<1x16x128xbf16> to vector<16x128xbf16>
    %125 = vector.shape_cast %121 : vector<16x128xbf16> to vector<1x16x128xbf16>
    tpu.vector_store %arg6[%122, %c0_37, %c0_38], %125 {strides = array<i32>} : memref<8x16x128xbf16, #tpu.memory_space<vmem>>, vector<1x16x128xbf16>,
    %c4_i32 = arith.constant 4 : i32
    %c16_i32_39 = arith.constant 16 : i32
    %126 = arith.muli %c4_i32, %c16_i32_39 : i32
    %127 = tpu.assume_multiple %126, 16 : i32
    %128 = arith.index_cast %127 : i32 to index
    %c0_40 = arith.constant 0 : index
    %129 = vector.load %arg9[%128, %c0_40] : memref<128x512xf32, #tpu.memory_space<vmem>>, vector<16x512xf32>
    %130 = arith.truncf %120 : vector<16x128xf32> to vector<16x128xbf16>
    %cst_41 = arith.constant dense<0.000000e+00> : vector<16x512xf32>
    %131 = tpu.matmul %130, %11, %cst_41 {dimension_numbers = #tpu.dot_dimension_numbers<[1], [0], [0], [1], [0, 0, 1, 1], [], []>} : vector<16x128xbf16>, vector<128x512xbf16>, vector<16x512xf32> -> vector<16x512xf32>
    %132 = arith.addf %129, %131 : vector<16x512xf32>
    %133 = vector.extract_strided_slice %132 {offsets = [0, 0], sizes = [16, 384], strides = [1, 1]} : vector<16x512xf32> to vector<16x384xf32>
    %134 = arith.negf %133 : vector<16x384xf32>
    %135 = math.exp %134 : vector<16x384xf32>
    %cst_42 = arith.constant 1.000000e+00 : f32
    %136 = vector.broadcast %cst_42 : f32 to vector<16x384xf32>
    %137 = arith.addf %136, %135 : vector<16x384xf32>
    %138 = arith.divf %136, %137 : vector<16x384xf32>
    %139 = vector.extract_strided_slice %138 {offsets = [0, 0], sizes = [16, 128], strides = [1, 1]} : vector<16x384xf32> to vector<16x128xf32>
    %140 = vector.extract_strided_slice %138 {offsets = [0, 128], sizes = [16, 128], strides = [1, 1]} : vector<16x384xf32> to vector<16x128xf32>
    %141 = vector.extract_strided_slice %138 {offsets = [0, 256], sizes = [16, 128], strides = [1, 1]} : vector<16x384xf32> to vector<16x128xf32>
    %142 = vector.extract_strided_slice %132 {offsets = [0, 384], sizes = [16, 128], strides = [1, 1]} : vector<16x512xf32> to vector<16x128xf32>
    %143 = math.tanh %142 : vector<16x128xf32>
    %144 = arith.mulf %140, %118 : vector<16x128xf32>
    %145 = arith.mulf %139, %143 : vector<16x128xf32>
    %146 = arith.addf %144, %145 : vector<16x128xf32>
    %147 = math.tanh %146 : vector<16x128xf32>
    %148 = arith.mulf %141, %147 : vector<16x128xf32>
    %149 = arith.truncf %148 : vector<16x128xf32> to vector<16x128xbf16>
    %150 = arith.index_cast %c4_i32 : i32 to index
    %c0_43 = arith.constant 0 : index
    %c0_44 = arith.constant 0 : index
    %151 = vector.load %arg6[%150, %c0_43, %c0_44] : memref<8x16x128xbf16, #tpu.memory_space<vmem>>, vector<1x16x128xbf16>
    %152 = vector.shape_cast %151 : vector<1x16x128xbf16> to vector<16x128xbf16>
    %153 = vector.shape_cast %149 : vector<16x128xbf16> to vector<1x16x128xbf16>
    tpu.vector_store %arg6[%150, %c0_43, %c0_44], %153 {strides = array<i32>} : memref<8x16x128xbf16, #tpu.memory_space<vmem>>, vector<1x16x128xbf16>,
    %c5_i32 = arith.constant 5 : i32
    %c16_i32_45 = arith.constant 16 : i32
    %154 = arith.muli %c5_i32, %c16_i32_45 : i32
    %155 = tpu.assume_multiple %154, 16 : i32
    %156 = arith.index_cast %155 : i32 to index
    %c0_46 = arith.constant 0 : index
    %157 = vector.load %arg9[%156, %c0_46] : memref<128x512xf32, #tpu.memory_space<vmem>>, vector<16x512xf32>
    %158 = arith.truncf %148 : vector<16x128xf32> to vector<16x128xbf16>
    %cst_47 = arith.constant dense<0.000000e+00> : vector<16x512xf32>
    %159 = tpu.matmul %158, %11, %cst_47 {dimension_numbers = #tpu.dot_dimension_numbers<[1], [0], [0], [1], [0, 0, 1, 1], [], []>} : vector<16x128xbf16>, vector<128x512xbf16>, vector<16x512xf32> -> vector<16x512xf32>
    %160 = arith.addf %157, %159 : vector<16x512xf32>
    %161 = vector.extract_strided_slice %160 {offsets = [0, 0], sizes = [16, 384], strides = [1, 1]} : vector<16x512xf32> to vector<16x384xf32>
    %162 = arith.negf %161 : vector<16x384xf32>
    %163 = math.exp %162 : vector<16x384xf32>
    %cst_48 = arith.constant 1.000000e+00 : f32
    %164 = vector.broadcast %cst_48 : f32 to vector<16x384xf32>
    %165 = arith.addf %164, %163 : vector<16x384xf32>
    %166 = arith.divf %164, %165 : vector<16x384xf32>
    %167 = vector.extract_strided_slice %166 {offsets = [0, 0], sizes = [16, 128], strides = [1, 1]} : vector<16x384xf32> to vector<16x128xf32>
    %168 = vector.extract_strided_slice %166 {offsets = [0, 128], sizes = [16, 128], strides = [1, 1]} : vector<16x384xf32> to vector<16x128xf32>
    %169 = vector.extract_strided_slice %166 {offsets = [0, 256], sizes = [16, 128], strides = [1, 1]} : vector<16x384xf32> to vector<16x128xf32>
    %170 = vector.extract_strided_slice %160 {offsets = [0, 384], sizes = [16, 128], strides = [1, 1]} : vector<16x512xf32> to vector<16x128xf32>
    %171 = math.tanh %170 : vector<16x128xf32>
    %172 = arith.mulf %168, %146 : vector<16x128xf32>
    %173 = arith.mulf %167, %171 : vector<16x128xf32>
    %174 = arith.addf %172, %173 : vector<16x128xf32>
    %175 = math.tanh %174 : vector<16x128xf32>
    %176 = arith.mulf %169, %175 : vector<16x128xf32>
    %177 = arith.truncf %176 : vector<16x128xf32> to vector<16x128xbf16>
    %178 = arith.index_cast %c5_i32 : i32 to index
    %c0_49 = arith.constant 0 : index
    %c0_50 = arith.constant 0 : index
    %179 = vector.load %arg6[%178, %c0_49, %c0_50] : memref<8x16x128xbf16, #tpu.memory_space<vmem>>, vector<1x16x128xbf16>
    %180 = vector.shape_cast %179 : vector<1x16x128xbf16> to vector<16x128xbf16>
    %181 = vector.shape_cast %177 : vector<16x128xbf16> to vector<1x16x128xbf16>
    tpu.vector_store %arg6[%178, %c0_49, %c0_50], %181 {strides = array<i32>} : memref<8x16x128xbf16, #tpu.memory_space<vmem>>, vector<1x16x128xbf16>,
    %c6_i32 = arith.constant 6 : i32
    %c16_i32_51 = arith.constant 16 : i32
    %182 = arith.muli %c6_i32, %c16_i32_51 : i32
    %183 = tpu.assume_multiple %182, 16 : i32
    %184 = arith.index_cast %183 : i32 to index
    %c0_52 = arith.constant 0 : index
    %185 = vector.load %arg9[%184, %c0_52] : memref<128x512xf32, #tpu.memory_space<vmem>>, vector<16x512xf32>
    %186 = arith.truncf %176 : vector<16x128xf32> to vector<16x128xbf16>
    %cst_53 = arith.constant dense<0.000000e+00> : vector<16x512xf32>
    %187 = tpu.matmul %186, %11, %cst_53 {dimension_numbers = #tpu.dot_dimension_numbers<[1], [0], [0], [1], [0, 0, 1, 1], [], []>} : vector<16x128xbf16>, vector<128x512xbf16>, vector<16x512xf32> -> vector<16x512xf32>
    %188 = arith.addf %185, %187 : vector<16x512xf32>
    %189 = vector.extract_strided_slice %188 {offsets = [0, 0], sizes = [16, 384], strides = [1, 1]} : vector<16x512xf32> to vector<16x384xf32>
    %190 = arith.negf %189 : vector<16x384xf32>
    %191 = math.exp %190 : vector<16x384xf32>
    %cst_54 = arith.constant 1.000000e+00 : f32
    %192 = vector.broadcast %cst_54 : f32 to vector<16x384xf32>
    %193 = arith.addf %192, %191 : vector<16x384xf32>
    %194 = arith.divf %192, %193 : vector<16x384xf32>
    %195 = vector.extract_strided_slice %194 {offsets = [0, 0], sizes = [16, 128], strides = [1, 1]} : vector<16x384xf32> to vector<16x128xf32>
    %196 = vector.extract_strided_slice %194 {offsets = [0, 128], sizes = [16, 128], strides = [1, 1]} : vector<16x384xf32> to vector<16x128xf32>
    %197 = vector.extract_strided_slice %194 {offsets = [0, 256], sizes = [16, 128], strides = [1, 1]} : vector<16x384xf32> to vector<16x128xf32>
    %198 = vector.extract_strided_slice %188 {offsets = [0, 384], sizes = [16, 128], strides = [1, 1]} : vector<16x512xf32> to vector<16x128xf32>
    %199 = math.tanh %198 : vector<16x128xf32>
    %200 = arith.mulf %196, %174 : vector<16x128xf32>
    %201 = arith.mulf %195, %199 : vector<16x128xf32>
    %202 = arith.addf %200, %201 : vector<16x128xf32>
    %203 = math.tanh %202 : vector<16x128xf32>
    %204 = arith.mulf %197, %203 : vector<16x128xf32>
    %205 = arith.truncf %204 : vector<16x128xf32> to vector<16x128xbf16>
    %206 = arith.index_cast %c6_i32 : i32 to index
    %c0_55 = arith.constant 0 : index
    %c0_56 = arith.constant 0 : index
    %207 = vector.load %arg6[%206, %c0_55, %c0_56] : memref<8x16x128xbf16, #tpu.memory_space<vmem>>, vector<1x16x128xbf16>
    %208 = vector.shape_cast %207 : vector<1x16x128xbf16> to vector<16x128xbf16>
    %209 = vector.shape_cast %205 : vector<16x128xbf16> to vector<1x16x128xbf16>
    tpu.vector_store %arg6[%206, %c0_55, %c0_56], %209 {strides = array<i32>} : memref<8x16x128xbf16, #tpu.memory_space<vmem>>, vector<1x16x128xbf16>,
    %c7_i32 = arith.constant 7 : i32
    %c16_i32_57 = arith.constant 16 : i32
    %210 = arith.muli %c7_i32, %c16_i32_57 : i32
    %211 = tpu.assume_multiple %210, 16 : i32
    %212 = arith.index_cast %211 : i32 to index
    %c0_58 = arith.constant 0 : index
    %213 = vector.load %arg9[%212, %c0_58] : memref<128x512xf32, #tpu.memory_space<vmem>>, vector<16x512xf32>
    %214 = arith.truncf %204 : vector<16x128xf32> to vector<16x128xbf16>
    %cst_59 = arith.constant dense<0.000000e+00> : vector<16x512xf32>
    %215 = tpu.matmul %214, %11, %cst_59 {dimension_numbers = #tpu.dot_dimension_numbers<[1], [0], [0], [1], [0, 0, 1, 1], [], []>} : vector<16x128xbf16>, vector<128x512xbf16>, vector<16x512xf32> -> vector<16x512xf32>
    %216 = arith.addf %213, %215 : vector<16x512xf32>
    %217 = vector.extract_strided_slice %216 {offsets = [0, 0], sizes = [16, 384], strides = [1, 1]} : vector<16x512xf32> to vector<16x384xf32>
    %218 = arith.negf %217 : vector<16x384xf32>
    %219 = math.exp %218 : vector<16x384xf32>
    %cst_60 = arith.constant 1.000000e+00 : f32
    %220 = vector.broadcast %cst_60 : f32 to vector<16x384xf32>
    %221 = arith.addf %220, %219 : vector<16x384xf32>
    %222 = arith.divf %220, %221 : vector<16x384xf32>
    %223 = vector.extract_strided_slice %222 {offsets = [0, 0], sizes = [16, 128], strides = [1, 1]} : vector<16x384xf32> to vector<16x128xf32>
    %224 = vector.extract_strided_slice %222 {offsets = [0, 128], sizes = [16, 128], strides = [1, 1]} : vector<16x384xf32> to vector<16x128xf32>
    %225 = vector.extract_strided_slice %222 {offsets = [0, 256], sizes = [16, 128], strides = [1, 1]} : vector<16x384xf32> to vector<16x128xf32>
    %226 = vector.extract_strided_slice %216 {offsets = [0, 384], sizes = [16, 128], strides = [1, 1]} : vector<16x512xf32> to vector<16x128xf32>
    %227 = math.tanh %226 : vector<16x128xf32>
    %228 = arith.mulf %224, %202 : vector<16x128xf32>
    %229 = arith.mulf %223, %227 : vector<16x128xf32>
    %230 = arith.addf %228, %229 : vector<16x128xf32>
    %231 = math.tanh %230 : vector<16x128xf32>
    %232 = arith.mulf %225, %231 : vector<16x128xf32>
    %233 = arith.truncf %232 : vector<16x128xf32> to vector<16x128xbf16>
    %234 = arith.index_cast %c7_i32 : i32 to index
    %c0_61 = arith.constant 0 : index
    %c0_62 = arith.constant 0 : index
    %235 = vector.load %arg6[%234, %c0_61, %c0_62] : memref<8x16x128xbf16, #tpu.memory_space<vmem>>, vector<1x16x128xbf16>
    %236 = vector.shape_cast %235 : vector<1x16x128xbf16> to vector<16x128xbf16>
    %237 = vector.shape_cast %233 : vector<16x128xbf16> to vector<1x16x128xbf16>
    tpu.vector_store %arg6[%234, %c0_61, %c0_62], %237 {strides = array<i32>} : memref<8x16x128xbf16, #tpu.memory_space<vmem>>, vector<1x16x128xbf16>,
    %c8_i32 = arith.constant 8 : i32
    %c0_63 = arith.constant 0 : index
    %c0_64 = arith.constant 0 : index
    %238 = vector.load %arg7[%c0_63, %c0_64] : memref<16x128xf32, #tpu.memory_space<vmem>>, vector<16x128xf32>
    tpu.vector_store %arg7[%c0_63, %c0_64], %232 {strides = array<i32>} : memref<16x128xf32, #tpu.memory_space<vmem>>, vector<16x128xf32>,
    %c0_65 = arith.constant 0 : index
    %c0_66 = arith.constant 0 : index
    %239 = vector.load %arg8[%c0_65, %c0_66] : memref<16x128xf32, #tpu.memory_space<vmem>>, vector<16x128xf32>
    tpu.vector_store %arg8[%c0_65, %c0_66], %230 {strides = array<i32>} : memref<16x128xf32, #tpu.memory_space<vmem>>, vector<16x128xf32>,
    return
  }
  func.func @transform_0(%arg0: i32, %arg1: i32) -> (i32, i32, i32) {
    %c0_i32 = arith.constant 0 : i32
    %c0_i32_0 = arith.constant 0 : i32
    return %arg1, %arg0, %c0_i32 : i32, i32, i32
  }
  func.func @transform_1(%arg0: i32, %arg1: i32) -> (i32, i32) {
    %c0_i32 = arith.constant 0 : i32
    %c0_i32_0 = arith.constant 0 : i32
    %c0_i32_1 = arith.constant 0 : i32
    return %c0_i32, %c0_i32_0 : i32, i32
  }
  func.func @transform_2(%arg0: i32, %arg1: i32) -> (i32, i32) {
    %c0_i32 = arith.constant 0 : i32
    %c0_i32_0 = arith.constant 0 : i32
    %c0_i32_1 = arith.constant 0 : i32
    return %c0_i32, %c0_i32_0 : i32, i32
  }
  func.func @transform_3(%arg0: i32, %arg1: i32) -> (i32, i32) {
    %c0_i32 = arith.constant 0 : i32
    %c0_i32_0 = arith.constant 0 : i32
    %c0_i32_1 = arith.constant 0 : i32
    return %c0_i32, %c0_i32_0 : i32, i32
  }
  func.func @transform_4(%arg0: i32, %arg1: i32) -> (i32, i32, i32) {
    %c0_i32 = arith.constant 0 : i32
    %c0_i32_0 = arith.constant 0 : i32
    return %arg1, %arg0, %c0_i32 : i32, i32, i32
  }
  func.func @transform_5(%arg0: i32, %arg1: i32) -> (i32, i32) {
    %c0_i32 = arith.constant 0 : i32
    %c0_i32_0 = arith.constant 0 : i32
    return %arg0, %c0_i32 : i32, i32
  }
}

</mosaic_0001>

<bundles_post_ra>
// kernel: tpu_custom_call.1
= control target key start
LH: loop header
LB: loop body
LE: loop exit
PB: predicated region body
PF: predicated region fallthrough
CT: control target
= control target key end

     0   :  { %6 = vsyncpa [#allocation3], 0  ;;  %s124_s0 = inlined_call_operand.hbm [shape: f32[8,128], index: 0, kind: input, shape index: {}]   ;;  %s125_s1 = inlined_call_operand.hbm [shape: f32[8,128], index: 1, kind: output, shape index: {}]  }
   0x1   :  { %7 = vsyncpa [#allocation4], 0  ;;  %s88_s6 = smov [#allocation2]   ;;  %s40_s10 = scalar_lea.hbm %s124_s0, 128 }
   0x2   :  { %s14_s7 = sshll.u32 %s88_s6, 4  ;;  %p41_p0 = scmp.ne.s32.totalorder %s124_s0, %s40_s10  ;;  %s15_s7 = int_to_ptr.vmem [resolvable:$true] %s14_s7 }
   0x3   :  { %p44_p1 = scmp.lt.u32.totalorder %s40_s10, %s124_s0 }
   0x5   :  { %p46_p2 = pnand %p44_p1, %p41_p0 }
   0x7   :  { %49 = shalt.err (!%p46_p2)
}
   0x8   :  { %s50_s15 = scalar_lea.vmem %s15_s7, 128  ;;  %p55_p4 = scmp.lt.s32.totalorder %s15_s7, %s15_s7 }
   0x9   :  { %p51_p3 = scmp.ne.s32.totalorder %s15_s7, %s50_s15  ;;  %p56_p5 = scmp.lt.s32.totalorder %s50_s15, %s50_s15 }
   0xb   :  { %p57_p6 = por %p56_p5, %p55_p4 }
   0xd   :  { %p58_p7 = pnand %p57_p6, %p51_p3 }
   0xf   :  { %61 = shalt.err (!%p58_p7)
}
  0x10   :  { %17 = dma.hbm_to_vmem [thread:$0]  %s124_s0, 128, %s15_s7, [#allocation3]  }
  0x11   :  { %84 = dma.done.wait [#allocation3], 128  }
  0x12   :  { %85 = vsyncadd [#allocation3], 4294967168  ;;  %s89_s18 = smov [#allocation5]   ;;  %v21_v0 = vld [vmem:[#allocation2] sm:$0xff] }
  0x13   :  { %s29_s19 = sshll.u32 %s89_s18, 4  ;;  %22 = vst [vmem:[#allocation5] sm:$0xff] %v21_v0  ;;  %s30_s19 = int_to_ptr.vmem [resolvable:$true] %s29_s19 }
  0x14   :  { %s62_s20 = scalar_lea.vmem %s30_s19, 128  ;;  %p67_p9 = scmp.lt.s32.totalorder %s30_s19, %s30_s19 }
  0x15   :  { %p63_p8 = scmp.ne.s32.totalorder %s30_s19, %s62_s20  ;;  %p68_p10 = scmp.lt.s32.totalorder %s62_s20, %s62_s20 }
  0x17   :  { %p69_p11 = por %p68_p10, %p67_p9 }
  0x19   :  { %p70_p12 = pnand %p69_p11, %p63_p8 }
  0x1b   :  { %73 = shalt.err (!%p70_p12)
}
  0x1c   :  { %s74_s23 = scalar_lea.hbm %s125_s1, 128 }
  0x1d   :  { %p75_p13 = scmp.ne.s32.totalorder %s125_s1, %s74_s23  ;;  %p78_p0 = scmp.lt.u32.totalorder %s74_s23, %s125_s1 }
  0x1f   :  { %p80_p1 = pnand %p78_p0, %p75_p13 }
  0x21   :  { %83 = shalt.err (!%p80_p1)
}
  0x22   :  { %32 = dma.vmem_to_hbm [thread:$0]  %s30_s19, 128, %s125_s1, [#allocation4]  }
  0x23   :  { %86 = dma.done.wait [#allocation4], 128  }
  0x24   :  { %87 = vsyncadd [#allocation4], 4294967168 }
  0x25   :  { %36 = vsyncpa [#allocation3], 1 }
  0x26   :  { %37 = vsyncpa [#allocation4], 1 }

// kernel: lstm_model_forward.3
= control target key start
LH: loop header
LB: loop body
LE: loop exit
PB: predicated region body
PF: predicated region fallthrough
CT: control target
= control target key end

     0   :  { %v2679_v1 = vmov 0   ;;  %s3571_s1 = inlined_call_operand.vmem [shape: bf16[128,512], index: 1, kind: input, shape index: {}]   ;;  %s3572_s0 = inlined_call_operand.vmem [shape: bf16[8,16,128], index: 0, kind: input, shape index: {}]   ;;  %s3573_s2 = inlined_call_operand.vmem [shape: bf16[128,512], index: 2, kind: input, shape index: {}]   ;;  %s3574_s3 = inlined_call_operand.vmem [shape: f32[1,512], index: 3, kind: input, shape index: {}]   ;;  %s3575_s4 = inlined_call_operand.vmem [shape: f32[16,128], index: 4, kind: output, shape index: {}]  }
   0x1   :  { %v2287_v0 = vld [vmem:[%s3571_s1 + $0x4] ss:$16 sps:$4 sm:$0xff]   ;;  %336 = vmatprep.mubr.bf16.mxu0 %v2679_v1  ;;  %449 = vmatprep.mubr.bf16.mxu1 %v2679_v1  ;;  %v2289_v2 = vld [vmem:[%s3571_s1 + $0xc] ss:$16 sps:$4 sm:$0xff]   ;;  %v2291_v3 = vld [vmem:[%s3571_s1] ss:$16 sps:$4 sm:$0xff]  }
   0x2   :  { %304 = vmatprep.subr.bf16.mxu0 %v2287_v0  ;;  %v2292_v4 = vld [vmem:[%s3571_s1 + $0x8] ss:$16 sps:$4 sm:$0xff]   ;;  %417 = vmatprep.subr.bf16.mxu1 %v2289_v2  ;;  %v2293_v5 = vld [vmem:[%s3571_s1 + $0x24] ss:$16 sps:$4 sm:$0xff]   ;;  %v2295_v6 = vld [vmem:[%s3571_s1 + $0x2c] ss:$16 sps:$4 sm:$0xff]  }
   0x3   :  { %305 = vmatpush1.bf16.msra.mxu0 %v2291_v3  ;;  %418 = vmatpush1.bf16.msra.mxu1 %v2292_v4  ;;  %v2297_v7 = vld [vmem:[%s3571_s1 + $0x20] ss:$16 sps:$4 sm:$0xff]   ;;  %v2298_v8 = vld [vmem:[%s3571_s1 + $0x28] ss:$16 sps:$4 sm:$0xff]   ;;  %v2299_v9 = vld [vmem:[%s3571_s1 + $0x44] ss:$16 sps:$4 sm:$0xff]  }
   0x4   :  { %306 = vmatprep.subr.bf16.mxu0 %v2293_v5  ;;  %419 = vmatprep.subr.bf16.mxu1 %v2295_v6  ;;  %v2301_v10 = vld [vmem:[%s3571_s1 + $0x4c] ss:$16 sps:$4 sm:$0xff]   ;;  %v2303_v11 = vld [vmem:[%s3571_s1 + $0x40] ss:$16 sps:$4 sm:$0xff]   ;;  %v2304_v12 = vld [vmem:[%s3571_s1 + $0x48] ss:$16 sps:$4 sm:$0xff]  }
   0x5   :  { %v2305_v13 = vld [vmem:[%s3571_s1 + $0x64] ss:$16 sps:$4 sm:$0xff]   ;;  %v2307_v14 = vld [vmem:[%s3571_s1 + $0x6c] ss:$16 sps:$4 sm:$0xff]   ;;  %v2309_v15 = vld [vmem:[%s3571_s1 + $0x60] ss:$16 sps:$4 sm:$0xff]  }
   0x6   :  { %v2310_v16 = vld [vmem:[%s3571_s1 + $0x68] ss:$16 sps:$4 sm:$0xff]   ;;  %v2311_v17 = vld [vmem:[%s3571_s1 + $0x84] ss:$16 sps:$4 sm:$0xff]   ;;  %v2313_v18 = vld [vmem:[%s3571_s1 + $0x8c] ss:$16 sps:$4 sm:$0xff]  }
   0x7   :  { %307 = vmatpush1.bf16.msra.mxu0 %v2297_v7  ;;  %420 = vmatpush1.bf16.msra.mxu1 %v2298_v8  ;;  %v2315_v19 = vld [vmem:[%s3571_s1 + $0x80] ss:$16 sps:$4 sm:$0xff]   ;;  %v2316_v20 = vld [vmem:[%s3571_s1 + $0x88] ss:$16 sps:$4 sm:$0xff]   ;;  %v2317_v21 = vld [vmem:[%s3571_s1 + $0xa4] ss:$16 sps:$4 sm:$0xff]  }
   0x8   :  { %308 = vmatprep.subr.bf16.mxu0 %v2299_v9  ;;  %421 = vmatprep.subr.bf16.mxu1 %v2301_v10  ;;  %v2319_v22 = vld [vmem:[%s3571_s1 + $0xac] ss:$16 sps:$4 sm:$0xff]   ;;  %v2321_v23 = vld [vmem:[%s3571_s1 + $0xa0] ss:$16 sps:$4 sm:$0xff]   ;;  %v2322_v24 = vld [vmem:[%s3571_s1 + $0xa8] ss:$16 sps:$4 sm:$0xff]  }
   0x9   :  { %v2323_v25 = vld [vmem:[%s3571_s1 + $0xc4] ss:$16 sps:$4 sm:$0xff]   ;;  %v2325_v26 = vld [vmem:[%s3571_s1 + $0xcc] ss:$16 sps:$4 sm:$0xff]   ;;  %v2327_v27 = vld [vmem:[%s3571_s1 + $0xc0] ss:$16 sps:$4 sm:$0xff]  }
   0xa   :  { %v2328_v28 = vld [vmem:[%s3571_s1 + $0xc8] ss:$16 sps:$4 sm:$0xff]   ;;  %v2329_v29 = vld [vmem:[%s3571_s1 + $0xe4] ss:$16 sps:$4 sm:$0xff]   ;;  %v2331_v30 = vld [vmem:[%s3571_s1 + $0xec] ss:$16 sps:$4 sm:$0xff]  }
   0xb   :  { %309 = vmatpush1.bf16.msra.mxu0 %v2303_v11  ;;  %422 = vmatpush1.bf16.msra.mxu1 %v2304_v12  ;;  %v2333_v31 = vld [vmem:[%s3571_s1 + $0xe0] ss:$16 sps:$4 sm:$0xff]   ;;  %v2334_v32 = vld [vmem:[%s3571_s1 + $0xe8] ss:$16 sps:$4 sm:$0xff]   ;;  %v2807_v33 = vld [vmem:[%s3573_s2 + $0x4] ss:$16 sps:$4 sm:$0xff]   ;;  %v76_v11 = vlaneseq }
   0xc   :  { %310 = vmatprep.subr.bf16.mxu0 %v2305_v13  ;;  %423 = vmatprep.subr.bf16.mxu1 %v2307_v14  ;;  %v2812_v34 = vld [vmem:[%s3573_s2 + $0xc] ss:$16 sps:$4 sm:$0xff]   ;;  %v2335_v35 = vld [vmem:[%s3572_s0] sm:$0xff]   ;;  %v2832_v38 = vld [vmem:[%s3573_s2 + $0x8] ss:$16 sps:$4 sm:$0xff]   ;;  %v2680_v10 = vmov 0.0|0.0  }
   0xd   :  { %v2820_v36 = vld [vmem:[%s3573_s2] ss:$16 sps:$4 sm:$0xff]   ;;  %v2826_v37 = vld [vmem:[%s3573_s2 + $0x24] ss:$16 sps:$4 sm:$0xff]   ;;  %v2837_v39 = vld [vmem:[%s3573_s2 + $0x2c] ss:$16 sps:$4 sm:$0xff]  }
   0xe   :  { %v2844_v40 = vld [vmem:[%s3573_s2 + $0x20] ss:$16 sps:$4 sm:$0xff]   ;;  %v2851_v41 = vld [vmem:[%s3573_s2 + $0x44] ss:$16 sps:$4 sm:$0xff]   ;;  %v2857_v42 = vld [vmem:[%s3573_s2 + $0x28] ss:$16 sps:$4 sm:$0xff]  }
   0xf   :  { %311 = vmatpush1.bf16.msra.mxu0 %v2309_v15  ;;  %424 = vmatpush1.bf16.msra.mxu1 %v2310_v16  ;;  %v2339_v43 = vld [vmem:[%s3572_s0 + $0x8] sm:$0xff]   ;;  %v2867_v44 = vld [vmem:[%s3573_s2 + $0x40] ss:$16 sps:$4 sm:$0xff]   ;;  %v2872_v45 = vld [vmem:[%s3573_s2 + $0x64] ss:$16 sps:$4 sm:$0xff]   ;;  %v77_v12 = vshrl.u32 %v76_v11, 7 }
  0x10   :  { %312 = vmatprep.subr.bf16.mxu0 %v2311_v17  ;;  %425 = vmatprep.subr.bf16.mxu1 %v2313_v18  ;;  %v2878_v46 = vld [vmem:[%s3573_s2 + $0x4c] ss:$16 sps:$4 sm:$0xff]   ;;  %v2884_v47 = vld [vmem:[%s3573_s2 + $0x48] ss:$16 sps:$4 sm:$0xff]   ;;  %v2897_v49 = vld [vmem:[%s3573_s2 + $0x60] ss:$16 sps:$4 sm:$0xff]  }
  0x11   :  { %v2889_v48 = vld [vmem:[%s3573_s2 + $0x6c] ss:$16 sps:$4 sm:$0xff]   ;;  %v2903_v50 = vld [vmem:[%s3573_s2 + $0x84] ss:$16 sps:$4 sm:$0xff]   ;;  %v2910_v51 = vld [vmem:[%s3573_s2 + $0x68] ss:$16 sps:$4 sm:$0xff]  }
  0x12   :  { %v2345_v52 = vld [vmem:[%s3572_s0 + $0x10] sm:$0xff]   ;;  %v2925_v54 = vld [vmem:[%s3573_s2 + $0x8c] ss:$16 sps:$4 sm:$0xff]   ;;  %v2937_v56 = vld [vmem:[%s3573_s2 + $0x88] ss:$16 sps:$4 sm:$0xff]   ;;  %v78_v13 = vsub.s32 0, %v77_v12 }
  0x13   :  { %313 = vmatpush1.bf16.msra.mxu0 %v2315_v19  ;;  %426 = vmatpush1.bf16.msra.mxu1 %v2316_v20  ;;  %v2919_v53 = vld [vmem:[%s3573_s2 + $0x80] ss:$16 sps:$4 sm:$0xff]   ;;  %v2931_v55 = vld [vmem:[%s3573_s2 + $0xa4] ss:$16 sps:$4 sm:$0xff]   ;;  %v2942_v57 = vld [vmem:[%s3573_s2 + $0xac] ss:$16 sps:$4 sm:$0xff]  }
  0x14   :  { %314 = vmatprep.subr.bf16.mxu0 %v2317_v21  ;;  %427 = vmatprep.subr.bf16.mxu1 %v2319_v22  ;;  %v2950_v58 = vld [vmem:[%s3573_s2 + $0xa0] ss:$16 sps:$4 sm:$0xff]   ;;  %v2957_v59 = vld [vmem:[%s3573_s2 + $0xc4] ss:$16 sps:$4 sm:$0xff]   ;;  %v2963_v60 = vld [vmem:[%s3573_s2 + $0xa8] ss:$16 sps:$4 sm:$0xff]  }
  0x15   :  { %v2352_v61 = vld [vmem:[%s3572_s0 + $0x18] sm:$0xff]   ;;  %v2973_v62 = vld [vmem:[%s3573_s2 + $0xc0] ss:$16 sps:$4 sm:$0xff]   ;;  %v2985_v0 = vld [vmem:[%s3573_s2 + $0xe4] ss:$16 sps:$4 sm:$0xff]   ;;  %v82_v15 = vsub.s32 1, %v77_v12 }
  0x16   :  { %v2978_v63 = vld [vmem:[%s3573_s2 + $0xcc] ss:$16 sps:$4 sm:$0xff]   ;;  %v2990_v2 = vld [vmem:[%s3573_s2 + $0xc8] ss:$16 sps:$4 sm:$0xff]   ;;  %v3004_v4 = vld [vmem:[%s3573_s2 + $0xe0] ss:$16 sps:$4 sm:$0xff]  }
  0x17   :  { %315 = vmatpush1.bf16.msra.mxu0 %v2321_v23  ;;  %428 = vmatpush1.bf16.msra.mxu1 %v2322_v24  ;;  %v2995_v3 = vld [vmem:[%s3573_s2 + $0xec] ss:$16 sps:$4 sm:$0xff]   ;;  %v3011_v5 = vld [vmem:[%s3573_s2 + $0xe8] ss:$16 sps:$4 sm:$0xff]   ;;  %v2359_v6 = vld [vmem:[%s3572_s0 + $0x20] sm:$0xff]   ;;  %v86_v19 = vsub.s32 2, %v77_v12 }
  0x18   :  { %316 = vmatprep.subr.bf16.mxu0 %v2323_v25  ;;  %429 = vmatprep.subr.bf16.mxu1 %v2325_v26  ;;  %v2366_v7 = vld [vmem:[%s3572_s0 + $0x28] sm:$0xff]   ;;  %v2373_v8 = vld [vmem:[%s3572_s0 + $0x30] sm:$0xff]   ;;  %v2381_v9 = vld [vmem:[%s3572_s0 + $0x38] sm:$0xff]  }
  0x19   :  { %v74_v14 = vld [vmem:[%s3574_s3] sm:$0xf] }
  0x1a   :  { %v3075_v16 = vrot.slane %v74_v14, %v78_v13  ;;  %v3077_v17 = vrot.slane %v74_v14, %v82_v15 }
  0x1b   :  { %317 = vmatpush1.bf16.msra.mxu0 %v2327_v27  ;;  %430 = vmatpush1.bf16.msra.mxu1 %v2328_v28  ;;  %v90_v28 = vsub.s32 3, %v77_v12 }
  0x1c   :  { %318 = vmatprep.subr.bf16.mxu0 %v2329_v29  ;;  %431 = vmatprep.subr.bf16.mxu1 %v2331_v30 }
  0x1f   :  { %319 = vmatpush1.bf16.msra.mxu0 %v2333_v31  ;;  %432 = vmatpush1.bf16.msra.mxu1 %v2334_v32  ;;  %v3082_v32 = vrot.slane %v74_v14, %v86_v19 }
  0x20   :  { %802 = vmatprep.subr.bf16.mxu0 %v2807_v33  ;;  %845 = vmatprep.subr.bf16.mxu1 %v2812_v34 }
  0x22   :  { %337 = vmatmul.mubr.bf16.vlgmr.msra.gmra.mrb[0].mxu0 %v2335_v35  ;;  %450 = vmatmul.mubr.bf16.vlgmr.msra.gmra.mrb[0].mxu1 %v2335_v35 }
  0x23   :  { %803 = vmatpush1.bf16.msra.mxu0 %v2820_v36  ;;  %346 = vmatprep.mubr.bf16.mxu0 %v2679_v1 }
  0x24   :  { %459 = vmatprep.mubr.bf16.mxu1 %v2679_v1  ;;  %804 = vmatprep.subr.bf16.mxu0 %v2826_v37 }
  0x25   :  { %846 = vmatpush1.bf16.msra.mxu1 %v2832_v38 }
  0x26   :  { %847 = vmatprep.subr.bf16.mxu1 %v2837_v39 }
  0x27   :  { %805 = vmatpush1.bf16.msra.mxu0 %v2844_v40 }
  0x28   :  { %806 = vmatprep.subr.bf16.mxu0 %v2851_v41 }
  0x29   :  { %848 = vmatpush1.bf16.msra.mxu1 %v2857_v42 }
  0x2a   :  { %347 = vmatmul.mubr.bf16.gmra.mrb[4].mxu0 %v2339_v43  ;;  %460 = vmatmul.mubr.bf16.gmra.mrb[4].mxu1 %v2339_v43 }
  0x2b   :  { %356 = vmatprep.mubr.bf16.mxu0 %v2679_v1  ;;  %469 = vmatprep.mubr.bf16.mxu1 %v2679_v1 }
  0x2c   :  { %807 = vmatpush1.bf16.msra.mxu0 %v2867_v44  ;;  %849 = vmatprep.subr.bf16.mxu1 %v2878_v46 }
  0x2d   :  { %808 = vmatprep.subr.bf16.mxu0 %v2872_v45  ;;  %850 = vmatpush1.bf16.msra.mxu1 %v2884_v47 }
  0x2e   :  { %851 = vmatprep.subr.bf16.mxu1 %v2889_v48 }
  0x30   :  { %809 = vmatpush1.bf16.msra.mxu0 %v2897_v49 }
  0x31   :  { %810 = vmatprep.subr.bf16.mxu0 %v2903_v50  ;;  %852 = vmatpush1.bf16.msra.mxu1 %v2910_v51 }
  0x32   :  { %357 = vmatmul.mubr.bf16.gmra.mrb[8].mxu0 %v2345_v52  ;;  %470 = vmatmul.mubr.bf16.gmra.mrb[8].mxu1 %v2345_v52 }
  0x33   :  { %366 = vmatprep.mubr.bf16.mxu0 %v2679_v1  ;;  %479 = vmatprep.mubr.bf16.mxu1 %v2679_v1 }
  0x34   :  { %811 = vmatpush1.bf16.msra.mxu0 %v2919_v53  ;;  %853 = vmatprep.subr.bf16.mxu1 %v2925_v54 }
  0x35   :  { %812 = vmatprep.subr.bf16.mxu0 %v2931_v55  ;;  %854 = vmatpush1.bf16.msra.mxu1 %v2937_v56 }
  0x36   :  { %855 = vmatprep.subr.bf16.mxu1 %v2942_v57 }
  0x38   :  { %813 = vmatpush1.bf16.msra.mxu0 %v2950_v58 }
  0x39   :  { %814 = vmatprep.subr.bf16.mxu0 %v2957_v59  ;;  %856 = vmatpush1.bf16.msra.mxu1 %v2963_v60 }
  0x3a   :  { %367 = vmatmul.mubr.bf16.gmra.mrb[12].mxu0 %v2352_v61  ;;  %480 = vmatmul.mubr.bf16.gmra.mrb[12].mxu1 %v2352_v61 }
  0x3b   :  { %376 = vmatprep.mubr.bf16.mxu0 %v2679_v1  ;;  %489 = vmatprep.mubr.bf16.mxu1 %v2679_v1 }
  0x3c   :  { %815 = vmatpush1.bf16.msra.mxu0 %v2973_v62  ;;  %857 = vmatprep.subr.bf16.mxu1 %v2978_v63 }
  0x3d   :  { %816 = vmatprep.subr.bf16.mxu0 %v2985_v0  ;;  %858 = vmatpush1.bf16.msra.mxu1 %v2990_v2 }
  0x3e   :  { %859 = vmatprep.subr.bf16.mxu1 %v2995_v3 }
  0x40   :  { %817 = vmatpush1.bf16.msra.mxu0 %v3004_v4 }
  0x41   :  { %860 = vmatpush1.bf16.msra.mxu1 %v3011_v5  ;;  %956 = vmatprep.subr.bf16.mxu0 %v2807_v33 }
  0x42   :  { %377 = vmatmul.mubr.bf16.gmra.mrb[16].mxu0 %v2359_v6  ;;  %490 = vmatmul.mubr.bf16.gmra.mrb[16].mxu1 %v2359_v6  ;;  %v3085_v6 = vrot.slane %v74_v14, %v90_v28 }
  0x43   :  { %386 = vmatprep.mubr.bf16.mxu0 %v2679_v1  ;;  %499 = vmatprep.mubr.bf16.mxu1 %v2679_v1 }
  0x44   :  { %999 = vmatprep.subr.bf16.mxu1 %v2812_v34 }
  0x4a   :  { %387 = vmatmul.mubr.bf16.gmra.mrb[20].mxu0 %v2366_v7  ;;  %500 = vmatmul.mubr.bf16.gmra.mrb[20].mxu1 %v2366_v7 }
  0x4b   :  { %396 = vmatprep.mubr.bf16.mxu0 %v2679_v1  ;;  %509 = vmatprep.mubr.bf16.mxu1 %v2679_v1 }
  0x52   :  { %397 = vmatmul.mubr.bf16.gmra.mrb[24].mxu0 %v2373_v8  ;;  %510 = vmatmul.mubr.bf16.gmra.mrb[24].mxu1 %v2373_v8 }
  0x53   :  { %406 = vmatprep.mubr.bf16.mxu0 %v2679_v1  ;;  %519 = vmatprep.mubr.bf16.mxu1 %v2679_v1 }
  0x5a   :  { %407 = vmatmul.mubr.bf16.gmra.mrb[28].mxu0 %v2381_v9  ;;  %520 = vmatmul.mubr.bf16.gmra.mrb[28].mxu1 %v2381_v9 }
  0x5b   :  { %834 = vmatprep.mubr.bf16.mxu0 %v2679_v1  ;;  %877 = vmatprep.mubr.bf16.mxu1 %v2679_v1 }
  0x62   :  { %835 = vmatmul.mubr.bf16.vlgmr.msra.gmra.mrb[0].mxu0 %v2680_v10  ;;  %878 = vmatmul.mubr.bf16.vlgmr.msra.gmra.mrb[0].mxu1 %v2680_v10 }
  0x63   :  { %957 = vmatpush1.bf16.msra.mxu0 %v2820_v36  ;;  %1000 = vmatpush1.bf16.msra.mxu1 %v2832_v38 }
  0x64   :  { %958 = vmatprep.subr.bf16.mxu0 %v2826_v37  ;;  %1001 = vmatprep.subr.bf16.mxu1 %v2837_v39 }
  0x65   :  { %988 = vmatprep.mubr.bf16.mxu0 %v2679_v1  ;;  %1031 = vmatprep.mubr.bf16.mxu1 %v2679_v1 }
  0x67   :  { %959 = vmatpush1.bf16.msra.mxu0 %v2844_v40  ;;  %1002 = vmatpush1.bf16.msra.mxu1 %v2857_v42 }
  0x68   :  { %960 = vmatprep.subr.bf16.mxu0 %v2851_v41  ;;  %1003 = vmatprep.subr.bf16.mxu1 %v2878_v46 }
  0x6b   :  { %961 = vmatpush1.bf16.msra.mxu0 %v2867_v44  ;;  %1004 = vmatpush1.bf16.msra.mxu1 %v2884_v47 }
  0x6c   :  { %962 = vmatprep.subr.bf16.mxu0 %v2872_v45  ;;  %1005 = vmatprep.subr.bf16.mxu1 %v2889_v48 }
  0x6f   :  { %963 = vmatpush1.bf16.msra.mxu0 %v2897_v49  ;;  %1006 = vmatpush1.bf16.msra.mxu1 %v2910_v51 }
  0x70   :  { %964 = vmatprep.subr.bf16.mxu0 %v2903_v50  ;;  %1007 = vmatprep.subr.bf16.mxu1 %v2925_v54 }
  0x73   :  { %965 = vmatpush1.bf16.msra.mxu0 %v2919_v53  ;;  %1008 = vmatpush1.bf16.msra.mxu1 %v2937_v56 }
  0x74   :  { %966 = vmatprep.subr.bf16.mxu0 %v2931_v55  ;;  %1009 = vmatprep.subr.bf16.mxu1 %v2942_v57 }
  0x77   :  { %967 = vmatpush1.bf16.msra.mxu0 %v2950_v58  ;;  %1010 = vmatpush1.bf16.msra.mxu1 %v2963_v60 }
  0x78   :  { %968 = vmatprep.subr.bf16.mxu0 %v2957_v59  ;;  %1011 = vmatprep.subr.bf16.mxu1 %v2978_v63 }
  0x7b   :  { %969 = vmatpush1.bf16.msra.mxu0 %v2973_v62  ;;  %1012 = vmatpush1.bf16.msra.mxu1 %v2990_v2 }
  0x7c   :  { %970 = vmatprep.subr.bf16.mxu0 %v2985_v0  ;;  %1013 = vmatprep.subr.bf16.mxu1 %v2995_v3 }
  0x7f   :  { %971 = vmatpush1.bf16.msra.mxu0 %v3004_v4  ;;  %1014 = vmatpush1.bf16.msra.mxu1 %v3011_v5 }
  0x80   :  { %1110 = vmatprep.subr.bf16.mxu0 %v2807_v33  ;;  %1153 = vmatprep.subr.bf16.mxu1 %v2812_v34 }
 0x135   :  { %v836_v18 = vpop.f32.mrb[0].mxu0  ;;  %v879_v20 = vpop.f32.mrb[0].mxu1 }
 0x136   :  { %v2157_v21 = vadd.f32 %v836_v18, %v3075_v16  ;;  %v838_v22 = vpop.f32.mrb[1].mxu0  ;;  %v881_v23 = vpop.f32.mrb[1].mxu1  ;;  %v2189_v7 = vadd.f32 %v879_v20, %v3082_v32 }
 0x137   :  { %v2158_v24 = vadd.f32 %v838_v22, %v3077_v17  ;;  %v840_v25 = vpop.f32.mrb[2].mxu0  ;;  %v883_v26 = vpop.f32.mrb[2].mxu1  ;;  %v2190_v9 = vadd.f32 %v881_v23, %v3085_v6 }
 0x138   :  { %v2109_v27 = vmul.f32 -1.442695, %v2157_v21  ;;  %v2159_v29 = vadd.f32 %v840_v25, %v3075_v16  ;;  %v842_v30 = vpop.f32.mrb[3].mxu0  ;;  %v885_v31 = vpop.f32.mrb[3].mxu1  ;;  %v2191_v8 = vadd.f32 %v883_v26, %v3082_v32  ;;  %v2111_v10 = vmul.f32 -1.442695, %v2189_v7 }
 0x139   :  { %v2110_v35 = vmul.f32 -1.442695, %v2158_v24  ;;  %v2160_v43 = vadd.f32 %v842_v30, %v3077_v17  ;;  %v2192_v13 = vadd.f32 %v885_v31, %v3085_v6 }
 0x13a   :  { %2391 = vpow2.f32 %v2109_v27  ;;  %v2112_v52 = vmul.f32 -1.442695, %v2159_v29  ;;  %v2114_v11 = vmul.f32 -1.442695, %v2191_v8 }
 0x13b   :  { %v2113_v61 = vmul.f32 -1.442695, %v2160_v43  ;;  %2393 = vpow2.f32 %v2110_v35 }
 0x13c   :  { %2395 = vpow2.f32 %v2112_v52 }
 0x13d   :  { %2397 = vpow2.f32 %v2113_v61 }
 0x13e   :  { %2399 = vtanh.f32 %v2190_v9 }
 0x13f   :  { %2401 = vpow2.f32 %v2111_v10 }
 0x140   :  { %2403 = vpow2.f32 %v2114_v11 }
 0x144   :  { %v2392_v12 = vpop.eup %2391 }
 0x145   :  { %v914_v15 = vadd.f32 1.0, %v2392_v12  ;;  %v2394_v18 = vpop.eup %2393 }
 0x146   :  { %v2396_v14 = vpop.eup %2395  ;;  %v915_v19 = vadd.f32 1.0, %v2394_v18 }
 0x147   :  { %2405 = vrcp.f32 %v914_v15  ;;  %v917_v20 = vadd.f32 1.0, %v2396_v14  ;;  %v2398_v21 = vpop.eup %2397 }
 0x148   :  { %2407 = vtanh.f32 %v2192_v13  ;;  %v918_v22 = vadd.f32 1.0, %v2398_v21  ;;  %v2400_v23 = vpop.eup %2399 }
 0x149   :  { %2409 = vrcp.f32 %v915_v19  ;;  %v2402_v24 = vpop.eup %2401 }
 0x14a   :  { %2411 = vrcp.f32 %v917_v20  ;;  %v2404_v25 = vpop.eup %2403  ;;  %v916_v31 = vadd.f32 1.0, %v2402_v24 }
 0x14b   :  { %2413 = vrcp.f32 %v918_v22  ;;  %v919_v7 = vadd.f32 1.0, %v2404_v25 }
 0x14c   :  { %2415 = vrcp.f32 %v916_v31 }
 0x151   :  { %v2406_v26 = vpop.eup %2405 }
 0x152   :  { %v2408_v27 = vpop.eup %2407  ;;  %v936_v28 = vmul.f32 %v2406_v26, %v2400_v23 }
 0x153   :  { %v2410_v29 = vpop.eup %2409 }
 0x154   :  { %v2412_v30 = vpop.eup %2411  ;;  %v934_v35 = vmul.f32 0.0, %v2410_v29 }
 0x155   :  { %v937_v43 = vmul.f32 %v2412_v30, %v2408_v27  ;;  %v2414_v52 = vpop.eup %2413 }
 0x156   :  { %v3091_v61 = vadd.f32 %v936_v28, %v934_v35  ;;  %v935_v8 = vmul.f32 0.0, %v2414_v52  ;;  %v2416_v10 = vpop.eup %2415 }
 0x158   :  { %2417 = vtanh.f32 %v3091_v61  ;;  %v3094_v9 = vadd.f32 %v937_v43, %v935_v8 }
 0x159   :  { %2419 = vrcp.f32 %v919_v7 }
 0x15a   :  { %2421 = vtanh.f32 %v3094_v9 }
 0x162   :  { %v2418_v11 = vpop.eup %2417 }
 0x163   :  { %v2420_v12 = vpop.eup %2419  ;;  %v942_v15 = vmul.f32 %v2418_v11, %v2416_v10 }
 0x164   :  { %v2422_v13 = vpop.eup %2421 }
 0x165   :  { %v943_v18 = vmul.f32 %v2422_v13, %v2420_v12 }
 0x167   :  { %v955_v14 = vpack.c.bf16 %v943_v18, %v942_v15 }
 0x169   :  { %989 = vmatmul.mubr.bf16.vlgmr.msra.gmra.mrb[4].mxu0 %v955_v14  ;;  %1032 = vmatmul.mubr.bf16.vlgmr.msra.gmra.mrb[4].mxu1 %v955_v14 }
 0x16a   :  { %1111 = vmatpush1.bf16.msra.mxu0 %v2820_v36  ;;  %1154 = vmatpush1.bf16.msra.mxu1 %v2832_v38 }
 0x16b   :  { %1112 = vmatprep.subr.bf16.mxu0 %v2826_v37  ;;  %1155 = vmatprep.subr.bf16.mxu1 %v2837_v39 }
 0x16c   :  { %1142 = vmatprep.mubr.bf16.mxu0 %v2679_v1  ;;  %1185 = vmatprep.mubr.bf16.mxu1 %v2679_v1 }
 0x16e   :  { %1113 = vmatpush1.bf16.msra.mxu0 %v2844_v40  ;;  %1156 = vmatpush1.bf16.msra.mxu1 %v2857_v42 }
 0x16f   :  { %1114 = vmatprep.subr.bf16.mxu0 %v2851_v41  ;;  %1157 = vmatprep.subr.bf16.mxu1 %v2878_v46 }
 0x172   :  { %1115 = vmatpush1.bf16.msra.mxu0 %v2867_v44  ;;  %1158 = vmatpush1.bf16.msra.mxu1 %v2884_v47 }
 0x173   :  { %1116 = vmatprep.subr.bf16.mxu0 %v2872_v45  ;;  %1159 = vmatprep.subr.bf16.mxu1 %v2889_v48 }
 0x176   :  { %1117 = vmatpush1.bf16.msra.mxu0 %v2897_v49  ;;  %1160 = vmatpush1.bf16.msra.mxu1 %v2910_v51 }
 0x177   :  { %1118 = vmatprep.subr.bf16.mxu0 %v2903_v50  ;;  %1161 = vmatprep.subr.bf16.mxu1 %v2925_v54 }
 0x17a   :  { %1119 = vmatpush1.bf16.msra.mxu0 %v2919_v53  ;;  %1162 = vmatpush1.bf16.msra.mxu1 %v2937_v56 }
 0x17b   :  { %1120 = vmatprep.subr.bf16.mxu0 %v2931_v55  ;;  %1163 = vmatprep.subr.bf16.mxu1 %v2942_v57 }
 0x17e   :  { %1121 = vmatpush1.bf16.msra.mxu0 %v2950_v58  ;;  %1164 = vmatpush1.bf16.msra.mxu1 %v2963_v60 }
 0x17f   :  { %1122 = vmatprep.subr.bf16.mxu0 %v2957_v59  ;;  %1165 = vmatprep.subr.bf16.mxu1 %v2978_v63 }
 0x182   :  { %1123 = vmatpush1.bf16.msra.mxu0 %v2973_v62  ;;  %1166 = vmatpush1.bf16.msra.mxu1 %v2990_v2 }
 0x183   :  { %1124 = vmatprep.subr.bf16.mxu0 %v2985_v0  ;;  %1167 = vmatprep.subr.bf16.mxu1 %v2995_v3 }
 0x186   :  { %1125 = vmatpush1.bf16.msra.mxu0 %v3004_v4  ;;  %1168 = vmatpush1.bf16.msra.mxu1 %v3011_v5 }
 0x187   :  { %1264 = vmatprep.subr.bf16.mxu0 %v2807_v33  ;;  %1307 = vmatprep.subr.bf16.mxu1 %v2812_v34 }
 0x23c   :  { %v990_v19 = vpop.f32.mrb[4].mxu0  ;;  %v1033_v20 = vpop.f32.mrb[4].mxu1 }
 0x23d   :  { %v2161_v21 = vadd.f32 %v990_v19, %v3075_v16  ;;  %v992_v22 = vpop.f32.mrb[5].mxu0  ;;  %v1035_v23 = vpop.f32.mrb[5].mxu1  ;;  %v2193_v7 = vadd.f32 %v1033_v20, %v3082_v32 }
 0x23e   :  { %v2162_v24 = vadd.f32 %v992_v22, %v3077_v17  ;;  %v994_v25 = vpop.f32.mrb[6].mxu0  ;;  %v1037_v26 = vpop.f32.mrb[6].mxu1  ;;  %v2194_v10 = vadd.f32 %v1035_v23, %v3085_v6 }
 0x23f   :  { %v2115_v27 = vmul.f32 -1.442695, %v2161_v21  ;;  %v2163_v28 = vadd.f32 %v994_v25, %v3075_v16  ;;  %v996_v29 = vpop.f32.mrb[7].mxu0  ;;  %v1039_v30 = vpop.f32.mrb[7].mxu1  ;;  %v2195_v8 = vadd.f32 %v1037_v26, %v3082_v32  ;;  %v2117_v11 = vmul.f32 -1.442695, %v2193_v7 }
 0x240   :  { %v2116_v31 = vmul.f32 -1.442695, %v2162_v24  ;;  %v2164_v35 = vadd.f32 %v996_v29, %v3077_v17  ;;  %v2196_v15 = vadd.f32 %v1039_v30, %v3085_v6 }
 0x241   :  { %2423 = vpow2.f32 %v2115_v27  ;;  %v2118_v43 = vmul.f32 -1.442695, %v2163_v28  ;;  %v2120_v12 = vmul.f32 -1.442695, %v2195_v8 }
 0x242   :  { %v2119_v52 = vmul.f32 -1.442695, %v2164_v35  ;;  %2425 = vpow2.f32 %v2116_v31 }
 0x243   :  { %2427 = vpow2.f32 %v2118_v43 }
 0x244   :  { %2429 = vpow2.f32 %v2119_v52 }
 0x245   :  { %2431 = vtanh.f32 %v2194_v10 }
 0x246   :  { %2433 = vpow2.f32 %v2117_v11 }
 0x247   :  { %2435 = vpow2.f32 %v2120_v12 }
 0x24b   :  { %v2424_v13 = vpop.eup %2423 }
 0x24c   :  { %v1068_v18 = vadd.f32 1.0, %v2424_v13  ;;  %v2426_v14 = vpop.eup %2425 }
 0x24d   :  { %v2428_v19 = vpop.eup %2427  ;;  %v1069_v21 = vadd.f32 1.0, %v2426_v14 }
 0x24e   :  { %2437 = vrcp.f32 %v1068_v18  ;;  %v1071_v20 = vadd.f32 1.0, %v2428_v19  ;;  %v2430_v22 = vpop.eup %2429 }
 0x24f   :  { %2439 = vtanh.f32 %v2196_v15  ;;  %v1072_v24 = vadd.f32 1.0, %v2430_v22  ;;  %v2432_v23 = vpop.eup %2431 }
 0x250   :  { %2441 = vrcp.f32 %v1069_v21  ;;  %v2434_v25 = vpop.eup %2433 }
 0x251   :  { %2443 = vrcp.f32 %v1071_v20  ;;  %v2436_v26 = vpop.eup %2435  ;;  %v1070_v35 = vadd.f32 1.0, %v2434_v25 }
 0x252   :  { %2445 = vrcp.f32 %v1072_v24  ;;  %v1073_v10 = vadd.f32 1.0, %v2436_v26 }
 0x253   :  { %2447 = vrcp.f32 %v1070_v35 }
 0x258   :  { %v2438_v27 = vpop.eup %2437 }
 0x259   :  { %v2440_v28 = vpop.eup %2439  ;;  %v1090_v29 = vmul.f32 %v2438_v27, %v2432_v23 }
 0x25a   :  { %v2442_v30 = vpop.eup %2441 }
 0x25b   :  { %v2444_v31 = vpop.eup %2443  ;;  %v1088_v43 = vmul.f32 %v2442_v30, %v3091_v61 }
 0x25c   :  { %v1091_v52 = vmul.f32 %v2444_v31, %v2440_v28  ;;  %v2446_v7 = vpop.eup %2445 }
 0x25d   :  { %v3140_v8 = vadd.f32 %v1090_v29, %v1088_v43  ;;  %v1089_v11 = vmul.f32 %v2446_v7, %v3094_v9  ;;  %v2448_v13 = vpop.eup %2447 }
 0x25f   :  { %2449 = vtanh.f32 %v3140_v8  ;;  %v3144_v12 = vadd.f32 %v1091_v52, %v1089_v11 }
 0x260   :  { %2451 = vrcp.f32 %v1073_v10 }
 0x261   :  { %2453 = vtanh.f32 %v3144_v12 }
 0x269   :  { %v2450_v15 = vpop.eup %2449 }
 0x26a   :  { %v2452_v18 = vpop.eup %2451  ;;  %v1096_v61 = vmul.f32 %v2450_v15, %v2448_v13 }
 0x26b   :  { %v2454_v14 = vpop.eup %2453 }
 0x26c   :  { %v1097_v19 = vmul.f32 %v2454_v14, %v2452_v18 }
 0x26e   :  { %v1109_v21 = vpack.c.bf16 %v1097_v19, %v1096_v61 }
 0x270   :  { %1143 = vmatmul.mubr.bf16.vlgmr.msra.gmra.mrb[8].mxu0 %v1109_v21  ;;  %1186 = vmatmul.mubr.bf16.vlgmr.msra.gmra.mrb[8].mxu1 %v1109_v21 }
 0x271   :  { %1265 = vmatpush1.bf16.msra.mxu0 %v2820_v36  ;;  %1308 = vmatpush1.bf16.msra.mxu1 %v2832_v38 }
 0x272   :  { %1266 = vmatprep.subr.bf16.mxu0 %v2826_v37  ;;  %1309 = vmatprep.subr.bf16.mxu1 %v2837_v39 }
 0x273   :  { %1296 = vmatprep.mubr.bf16.mxu0 %v2679_v1  ;;  %1339 = vmatprep.mubr.bf16.mxu1 %v2679_v1 }
 0x275   :  { %1267 = vmatpush1.bf16.msra.mxu0 %v2844_v40  ;;  %1310 = vmatpush1.bf16.msra.mxu1 %v2857_v42 }
 0x276   :  { %1268 = vmatprep.subr.bf16.mxu0 %v2851_v41  ;;  %1311 = vmatprep.subr.bf16.mxu1 %v2878_v46 }
 0x279   :  { %1269 = vmatpush1.bf16.msra.mxu0 %v2867_v44  ;;  %1312 = vmatpush1.bf16.msra.mxu1 %v2884_v47 }
 0x27a   :  { %1270 = vmatprep.subr.bf16.mxu0 %v2872_v45  ;;  %1313 = vmatprep.subr.bf16.mxu1 %v2889_v48 }
 0x27d   :  { %1271 = vmatpush1.bf16.msra.mxu0 %v2897_v49  ;;  %1314 = vmatpush1.bf16.msra.mxu1 %v2910_v51 }
 0x27e   :  { %1272 = vmatprep.subr.bf16.mxu0 %v2903_v50  ;;  %1315 = vmatprep.subr.bf16.mxu1 %v2925_v54 }
 0x281   :  { %1273 = vmatpush1.bf16.msra.mxu0 %v2919_v53  ;;  %1316 = vmatpush1.bf16.msra.mxu1 %v2937_v56 }
 0x282   :  { %1274 = vmatprep.subr.bf16.mxu0 %v2931_v55  ;;  %1317 = vmatprep.subr.bf16.mxu1 %v2942_v57 }
 0x285   :  { %1275 = vmatpush1.bf16.msra.mxu0 %v2950_v58  ;;  %1318 = vmatpush1.bf16.msra.mxu1 %v2963_v60 }
 0x286   :  { %1276 = vmatprep.subr.bf16.mxu0 %v2957_v59  ;;  %1319 = vmatprep.subr.bf16.mxu1 %v2978_v63 }
 0x289   :  { %1277 = vmatpush1.bf16.msra.mxu0 %v2973_v62  ;;  %1320 = vmatpush1.bf16.msra.mxu1 %v2990_v2 }
 0x28a   :  { %1278 = vmatprep.subr.bf16.mxu0 %v2985_v0  ;;  %1321 = vmatprep.subr.bf16.mxu1 %v2995_v3 }
 0x28d   :  { %1279 = vmatpush1.bf16.msra.mxu0 %v3004_v4  ;;  %1322 = vmatpush1.bf16.msra.mxu1 %v3011_v5 }
 0x28e   :  { %1418 = vmatprep.subr.bf16.mxu0 %v2807_v33  ;;  %1461 = vmatprep.subr.bf16.mxu1 %v2812_v34 }
 0x343   :  { %v1144_v9 = vpop.f32.mrb[8].mxu0  ;;  %v1187_v20 = vpop.f32.mrb[8].mxu1 }
 0x344   :  { %v2165_v22 = vadd.f32 %v1144_v9, %v3075_v16  ;;  %v1146_v24 = vpop.f32.mrb[9].mxu0  ;;  %v1189_v23 = vpop.f32.mrb[9].mxu1  ;;  %v2197_v10 = vadd.f32 %v1187_v20, %v3082_v32 }
 0x345   :  { %v2166_v25 = vadd.f32 %v1146_v24, %v3077_v17  ;;  %v1148_v26 = vpop.f32.mrb[10].mxu0  ;;  %v1191_v27 = vpop.f32.mrb[10].mxu1  ;;  %v2198_v13 = vadd.f32 %v1189_v23, %v3085_v6 }
 0x346   :  { %v2121_v28 = vmul.f32 -1.442695, %v2165_v22  ;;  %v2167_v29 = vadd.f32 %v1148_v26, %v3075_v16  ;;  %v1150_v30 = vpop.f32.mrb[11].mxu0  ;;  %v1193_v31 = vpop.f32.mrb[11].mxu1  ;;  %v2199_v11 = vadd.f32 %v1191_v27, %v3082_v32  ;;  %v2123_v15 = vmul.f32 -1.442695, %v2197_v10 }
 0x347   :  { %v2122_v35 = vmul.f32 -1.442695, %v2166_v25  ;;  %v2168_v43 = vadd.f32 %v1150_v30, %v3077_v17  ;;  %v2200_v61 = vadd.f32 %v1193_v31, %v3085_v6 }
 0x348   :  { %2455 = vpow2.f32 %v2121_v28  ;;  %v2124_v52 = vmul.f32 -1.442695, %v2167_v29  ;;  %v2126_v18 = vmul.f32 -1.442695, %v2199_v11 }
 0x349   :  { %v2125_v7 = vmul.f32 -1.442695, %v2168_v43  ;;  %2457 = vpow2.f32 %v2122_v35 }
 0x34a   :  { %2459 = vpow2.f32 %v2124_v52 }
 0x34b   :  { %2461 = vpow2.f32 %v2125_v7 }
 0x34c   :  { %2463 = vtanh.f32 %v2198_v13 }
 0x34d   :  { %2465 = vpow2.f32 %v2123_v15 }
 0x34e   :  { %2467 = vpow2.f32 %v2126_v18 }
 0x352   :  { %v2456_v14 = vpop.eup %2455 }
 0x353   :  { %v1222_v19 = vadd.f32 1.0, %v2456_v14  ;;  %v2458_v21 = vpop.eup %2457 }
 0x354   :  { %v2460_v9 = vpop.eup %2459  ;;  %v1223_v22 = vadd.f32 1.0, %v2458_v21 }
 0x355   :  { %2469 = vrcp.f32 %v1222_v19  ;;  %v1225_v20 = vadd.f32 1.0, %v2460_v9  ;;  %v2462_v24 = vpop.eup %2461 }
 0x356   :  { %2471 = vtanh.f32 %v2200_v61  ;;  %v1226_v25 = vadd.f32 1.0, %v2462_v24  ;;  %v2464_v23 = vpop.eup %2463 }
 0x357   :  { %2473 = vrcp.f32 %v1223_v22  ;;  %v2466_v26 = vpop.eup %2465 }
 0x358   :  { %2475 = vrcp.f32 %v1225_v20  ;;  %v2468_v27 = vpop.eup %2467  ;;  %v1224_v43 = vadd.f32 1.0, %v2466_v26 }
 0x359   :  { %2477 = vrcp.f32 %v1226_v25  ;;  %v1227_v13 = vadd.f32 1.0, %v2468_v27 }
 0x35a   :  { %2479 = vrcp.f32 %v1224_v43 }
 0x35f   :  { %v2470_v28 = vpop.eup %2469 }
 0x360   :  { %v2472_v29 = vpop.eup %2471  ;;  %v1244_v30 = vmul.f32 %v2470_v28, %v2464_v23 }
 0x361   :  { %v2474_v31 = vpop.eup %2473 }
 0x362   :  { %v2476_v35 = vpop.eup %2475  ;;  %v1242_v52 = vmul.f32 %v2474_v31, %v3140_v8 }
 0x363   :  { %v1245_v7 = vmul.f32 %v2476_v35, %v2472_v29  ;;  %v2478_v10 = vpop.eup %2477 }
 0x364   :  { %v3190_v11 = vadd.f32 %v1244_v30, %v1242_v52  ;;  %v1243_v15 = vmul.f32 %v2478_v10, %v3144_v12  ;;  %v2480_v14 = vpop.eup %2479 }
 0x366   :  { %2481 = vtanh.f32 %v3190_v11  ;;  %v3194_v18 = vadd.f32 %v1245_v7, %v1243_v15 }
 0x367   :  { %2483 = vrcp.f32 %v1227_v13 }
 0x368   :  { %2485 = vtanh.f32 %v3194_v18 }
 0x370   :  { %v2482_v61 = vpop.eup %2481 }
 0x371   :  { %v2484_v19 = vpop.eup %2483  ;;  %v1250_v8 = vmul.f32 %v2482_v61, %v2480_v14 }
 0x372   :  { %v2486_v21 = vpop.eup %2485 }
 0x373   :  { %v1251_v9 = vmul.f32 %v2486_v21, %v2484_v19 }
 0x375   :  { %v1263_v22 = vpack.c.bf16 %v1251_v9, %v1250_v8 }
 0x377   :  { %1297 = vmatmul.mubr.bf16.vlgmr.msra.gmra.mrb[12].mxu0 %v1263_v22  ;;  %1340 = vmatmul.mubr.bf16.vlgmr.msra.gmra.mrb[12].mxu1 %v1263_v22 }
 0x378   :  { %1419 = vmatpush1.bf16.msra.mxu0 %v2820_v36  ;;  %1462 = vmatpush1.bf16.msra.mxu1 %v2832_v38 }
 0x379   :  { %1420 = vmatprep.subr.bf16.mxu0 %v2826_v37  ;;  %1463 = vmatprep.subr.bf16.mxu1 %v2837_v39 }
 0x37a   :  { %1450 = vmatprep.mubr.bf16.mxu0 %v2679_v1  ;;  %1493 = vmatprep.mubr.bf16.mxu1 %v2679_v1 }
 0x37c   :  { %1421 = vmatpush1.bf16.msra.mxu0 %v2844_v40  ;;  %1464 = vmatpush1.bf16.msra.mxu1 %v2857_v42 }
 0x37d   :  { %1422 = vmatprep.subr.bf16.mxu0 %v2851_v41  ;;  %1465 = vmatprep.subr.bf16.mxu1 %v2878_v46 }
 0x380   :  { %1423 = vmatpush1.bf16.msra.mxu0 %v2867_v44  ;;  %1466 = vmatpush1.bf16.msra.mxu1 %v2884_v47 }
 0x381   :  { %1424 = vmatprep.subr.bf16.mxu0 %v2872_v45  ;;  %1467 = vmatprep.subr.bf16.mxu1 %v2889_v48 }
 0x384   :  { %1425 = vmatpush1.bf16.msra.mxu0 %v2897_v49  ;;  %1468 = vmatpush1.bf16.msra.mxu1 %v2910_v51 }
 0x385   :  { %1426 = vmatprep.subr.bf16.mxu0 %v2903_v50  ;;  %1469 = vmatprep.subr.bf16.mxu1 %v2925_v54 }
 0x388   :  { %1427 = vmatpush1.bf16.msra.mxu0 %v2919_v53  ;;  %1470 = vmatpush1.bf16.msra.mxu1 %v2937_v56 }
 0x389   :  { %1428 = vmatprep.subr.bf16.mxu0 %v2931_v55  ;;  %1471 = vmatprep.subr.bf16.mxu1 %v2942_v57 }
 0x38c   :  { %1429 = vmatpush1.bf16.msra.mxu0 %v2950_v58  ;;  %1472 = vmatpush1.bf16.msra.mxu1 %v2963_v60 }
 0x38d   :  { %1430 = vmatprep.subr.bf16.mxu0 %v2957_v59  ;;  %1473 = vmatprep.subr.bf16.mxu1 %v2978_v63 }
 0x390   :  { %1431 = vmatpush1.bf16.msra.mxu0 %v2973_v62  ;;  %1474 = vmatpush1.bf16.msra.mxu1 %v2990_v2 }
 0x391   :  { %1432 = vmatprep.subr.bf16.mxu0 %v2985_v0  ;;  %1475 = vmatprep.subr.bf16.mxu1 %v2995_v3 }
 0x394   :  { %1433 = vmatpush1.bf16.msra.mxu0 %v3004_v4  ;;  %1476 = vmatpush1.bf16.msra.mxu1 %v3011_v5 }
 0x395   :  { %1572 = vmatprep.subr.bf16.mxu0 %v2807_v33  ;;  %1615 = vmatprep.subr.bf16.mxu1 %v2812_v34 }
 0x44a   :  { %v1298_v36 = vpop.f32.mrb[12].mxu0  ;;  %v1341_v37 = vpop.f32.mrb[12].mxu1 }
 0x44b   :  { %v2169_v38 = vadd.f32 %v1298_v36, %v3075_v16  ;;  %v1300_v39 = vpop.f32.mrb[13].mxu0  ;;  %v1343_v40 = vpop.f32.mrb[13].mxu1  ;;  %v2201_v51 = vadd.f32 %v1341_v37, %v3082_v32 }
 0x44c   :  { %v2170_v41 = vadd.f32 %v1300_v39, %v3077_v17  ;;  %v1302_v42 = vpop.f32.mrb[14].mxu0  ;;  %v1345_v44 = vpop.f32.mrb[14].mxu1  ;;  %v2202_v54 = vadd.f32 %v1343_v40, %v3085_v6 }
 0x44d   :  { %v2127_v45 = vmul.f32 -1.442695, %v2169_v38  ;;  %v2171_v46 = vadd.f32 %v1302_v42, %v3075_v16  ;;  %v1304_v47 = vpop.f32.mrb[15].mxu0  ;;  %v1347_v48 = vpop.f32.mrb[15].mxu1  ;;  %v2203_v53 = vadd.f32 %v1345_v44, %v3082_v32  ;;  %v2129_v55 = vmul.f32 -1.442695, %v2201_v51 }
 0x44e   :  { %v2128_v49 = vmul.f32 -1.442695, %v2170_v41  ;;  %v2172_v33 = vadd.f32 %v1304_v47, %v3077_v17  ;;  %v2204_v12 = vadd.f32 %v1347_v48, %v3085_v6  ;;  %v3256_v41 = vld [vmem:[%s3573_s2 + $0x8] ss:$16 sps:$4 sm:$0xff]   ;;  %v3262_v42 = vld [vmem:[%s3573_s2 + $0x24] ss:$16 sps:$4 sm:$0xff]  }
 0x44f   :  { %2487 = vpow2.f32 %v2127_v45  ;;  %v2130_v34 = vmul.f32 -1.442695, %v2171_v46  ;;  %v2132_v56 = vmul.f32 -1.442695, %v2203_v53  ;;  %v3268_v44 = vld [vmem:[%s3573_s2 + $0x2c] ss:$16 sps:$4 sm:$0xff]  }
 0x450   :  { %v2131_v50 = vmul.f32 -1.442695, %v2172_v33  ;;  %2489 = vpow2.f32 %v2128_v49  ;;  %v3276_v45 = vld [vmem:[%s3573_s2 + $0x20] ss:$16 sps:$4 sm:$0xff]   ;;  %v3282_v46 = vld [vmem:[%s3573_s2 + $0x28] ss:$16 sps:$4 sm:$0xff]  }
 0x451   :  { %2491 = vpow2.f32 %v2130_v34  ;;  %v3288_v47 = vld [vmem:[%s3573_s2 + $0x44] ss:$16 sps:$4 sm:$0xff]   ;;  %v3294_v48 = vld [vmem:[%s3573_s2 + $0x4c] ss:$16 sps:$4 sm:$0xff]   ;;  %v3300_v49 = vld [vmem:[%s3573_s2 + $0x40] ss:$16 sps:$4 sm:$0xff]  }
 0x452   :  { %2493 = vpow2.f32 %v2131_v50  ;;  %v3306_v33 = vld [vmem:[%s3573_s2 + $0x48] ss:$16 sps:$4 sm:$0xff]   ;;  %v3312_v34 = vld [vmem:[%s3573_s2 + $0x64] ss:$16 sps:$4 sm:$0xff]   ;;  %v3318_v50 = vld [vmem:[%s3573_s2 + $0x6c] ss:$16 sps:$4 sm:$0xff]  }
 0x453   :  { %2495 = vtanh.f32 %v2202_v54  ;;  %v3324_v51 = vld [vmem:[%s3573_s2 + $0x60] ss:$16 sps:$4 sm:$0xff]   ;;  %v3330_v53 = vld [vmem:[%s3573_s2 + $0x68] ss:$16 sps:$4 sm:$0xff]   ;;  %v3336_v54 = vld [vmem:[%s3573_s2 + $0x84] ss:$16 sps:$4 sm:$0xff]  }
 0x454   :  { %2497 = vpow2.f32 %v2129_v55  ;;  %v3342_v55 = vld [vmem:[%s3573_s2 + $0x8c] ss:$16 sps:$4 sm:$0xff]  }
 0x455   :  { %2499 = vpow2.f32 %v2132_v56  ;;  %v3348_v56 = vld [vmem:[%s3573_s2 + $0x80] ss:$16 sps:$4 sm:$0xff]  }
 0x459   :  { %v2488_v57 = vpop.eup %2487 }
 0x45a   :  { %v1376_v20 = vadd.f32 1.0, %v2488_v57  ;;  %v2490_v24 = vpop.eup %2489  ;;  %v3354_v57 = vld [vmem:[%s3573_s2 + $0x88] ss:$16 sps:$4 sm:$0xff]  }
 0x45b   :  { %v2492_v25 = vpop.eup %2491  ;;  %v1377_v23 = vadd.f32 1.0, %v2490_v24 }
 0x45c   :  { %2501 = vrcp.f32 %v1376_v20  ;;  %v1379_v26 = vadd.f32 1.0, %v2492_v25  ;;  %v2494_v27 = vpop.eup %2493  ;;  %v3366_v20 = vld [vmem:[%s3573_s2 + $0xac] ss:$16 sps:$4 sm:$0xff]  }
 0x45d   :  { %2503 = vtanh.f32 %v2204_v12  ;;  %v1380_v28 = vadd.f32 1.0, %v2494_v27  ;;  %v2496_v29 = vpop.eup %2495  ;;  %v3360_v12 = vld [vmem:[%s3573_s2 + $0xa4] ss:$16 sps:$4 sm:$0xff]  }
 0x45e   :  { %2505 = vrcp.f32 %v1377_v23  ;;  %v2498_v30 = vpop.eup %2497 }
 0x45f   :  { %2507 = vrcp.f32 %v1379_v26  ;;  %v2500_v31 = vpop.eup %2499  ;;  %v1378_v13 = vadd.f32 1.0, %v2498_v30 }
 0x460   :  { %2509 = vrcp.f32 %v1380_v28  ;;  %v1381_v21 = vadd.f32 1.0, %v2500_v31 }
 0x461   :  { %2511 = vrcp.f32 %v1378_v13 }
 0x466   :  { %v2502_v35 = vpop.eup %2501 }
 0x467   :  { %v2504_v43 = vpop.eup %2503  ;;  %v1398_v52 = vmul.f32 %v2502_v35, %v2496_v29 }
 0x468   :  { %v2506_v7 = vpop.eup %2505 }
 0x469   :  { %v2508_v10 = vpop.eup %2507  ;;  %v1396_v15 = vmul.f32 %v2506_v7, %v3190_v11 }
 0x46a   :  { %v1399_v14 = vmul.f32 %v2508_v10, %v2504_v43  ;;  %v2510_v61 = vpop.eup %2509 }
 0x46b   :  { %v3240_v19 = vadd.f32 %v1398_v52, %v1396_v15  ;;  %v1397_v8 = vmul.f32 %v2510_v61, %v3194_v18  ;;  %v2512_v22 = vpop.eup %2511  ;;  %v3250_v18 = vld [vmem:[%s3573_s2] ss:$16 sps:$4 sm:$0xff]  }
 0x46d   :  { %2513 = vtanh.f32 %v3240_v19  ;;  %v3244_v9 = vadd.f32 %v1399_v14, %v1397_v8 }
 0x46e   :  { %2515 = vrcp.f32 %v1381_v21 }
 0x46f   :  { %2517 = vtanh.f32 %v3244_v9 }
 0x477   :  { %v2514_v36 = vpop.eup %2513 }
 0x478   :  { %v2516_v37 = vpop.eup %2515  ;;  %v1404_v11 = vmul.f32 %v2514_v36, %v2512_v22 }
 0x479   :  { %v2518_v38 = vpop.eup %2517 }
 0x47a   :  { %v1405_v39 = vmul.f32 %v2518_v38, %v2516_v37 }
 0x47c   :  { %v1417_v40 = vpack.c.bf16 %v1405_v39, %v1404_v11 }
 0x47e   :  { %1451 = vmatmul.mubr.bf16.vlgmr.msra.gmra.mrb[16].mxu0 %v1417_v40  ;;  %1494 = vmatmul.mubr.bf16.vlgmr.msra.gmra.mrb[16].mxu1 %v1417_v40 }
 0x47f   :  { %1573 = vmatpush1.bf16.msra.mxu0 %v3250_v18  ;;  %1616 = vmatpush1.bf16.msra.mxu1 %v3256_v41 }
 0x480   :  { %1574 = vmatprep.subr.bf16.mxu0 %v3262_v42  ;;  %1617 = vmatprep.subr.bf16.mxu1 %v3268_v44 }
 0x481   :  { %1604 = vmatprep.mubr.bf16.mxu0 %v2679_v1  ;;  %1647 = vmatprep.mubr.bf16.mxu1 %v2679_v1 }
 0x483   :  { %1575 = vmatpush1.bf16.msra.mxu0 %v3276_v45  ;;  %1618 = vmatpush1.bf16.msra.mxu1 %v3282_v46 }
 0x484   :  { %1576 = vmatprep.subr.bf16.mxu0 %v3288_v47  ;;  %1619 = vmatprep.subr.bf16.mxu1 %v3294_v48 }
 0x487   :  { %1577 = vmatpush1.bf16.msra.mxu0 %v3300_v49  ;;  %1620 = vmatpush1.bf16.msra.mxu1 %v3306_v33 }
 0x488   :  { %1578 = vmatprep.subr.bf16.mxu0 %v3312_v34  ;;  %1621 = vmatprep.subr.bf16.mxu1 %v3318_v50 }
 0x48b   :  { %1579 = vmatpush1.bf16.msra.mxu0 %v3324_v51  ;;  %1622 = vmatpush1.bf16.msra.mxu1 %v3330_v53 }
 0x48c   :  { %1580 = vmatprep.subr.bf16.mxu0 %v3336_v54  ;;  %1623 = vmatprep.subr.bf16.mxu1 %v3342_v55 }
 0x48f   :  { %1581 = vmatpush1.bf16.msra.mxu0 %v3348_v56  ;;  %1624 = vmatpush1.bf16.msra.mxu1 %v3354_v57 }
 0x490   :  { %1582 = vmatprep.subr.bf16.mxu0 %v3360_v12  ;;  %1625 = vmatprep.subr.bf16.mxu1 %v3366_v20 }
 0x493   :  { %1583 = vmatpush1.bf16.msra.mxu0 %v2950_v58  ;;  %1626 = vmatpush1.bf16.msra.mxu1 %v2963_v60  ;;  %v3382_v58 = vld [vmem:[%s3573_s2 + $0x4] ss:$16 sps:$4 sm:$0xff]  }
 0x494   :  { %1584 = vmatprep.subr.bf16.mxu0 %v2957_v59  ;;  %1627 = vmatprep.subr.bf16.mxu1 %v2978_v63  ;;  %v3388_v59 = vld [vmem:[%s3573_s2 + $0xc] ss:$16 sps:$4 sm:$0xff]  }
 0x497   :  { %1585 = vmatpush1.bf16.msra.mxu0 %v2973_v62  ;;  %1628 = vmatpush1.bf16.msra.mxu1 %v2990_v2 }
 0x498   :  { %1586 = vmatprep.subr.bf16.mxu0 %v2985_v0  ;;  %1629 = vmatprep.subr.bf16.mxu1 %v2995_v3 }
 0x49b   :  { %1587 = vmatpush1.bf16.msra.mxu0 %v3004_v4  ;;  %1630 = vmatpush1.bf16.msra.mxu1 %v3011_v5 }
 0x49c   :  { %1726 = vmatprep.subr.bf16.mxu0 %v3382_v58  ;;  %1769 = vmatprep.subr.bf16.mxu1 %v3388_v59 }
 0x551   :  { %v1452_v60 = vpop.f32.mrb[16].mxu0  ;;  %v1495_v62 = vpop.f32.mrb[16].mxu1 }
 0x552   :  { %v2173_v63 = vadd.f32 %v1452_v60, %v3075_v16  ;;  %v1454_v0 = vpop.f32.mrb[17].mxu0  ;;  %v1497_v2 = vpop.f32.mrb[17].mxu1  ;;  %v2205_v31 = vadd.f32 %v1495_v62, %v3082_v32 }
 0x553   :  { %v2174_v3 = vadd.f32 %v1454_v0, %v3077_v17  ;;  %v1456_v4 = vpop.f32.mrb[18].mxu0  ;;  %v1499_v5 = vpop.f32.mrb[18].mxu1  ;;  %v2206_v43 = vadd.f32 %v1497_v2, %v3085_v6 }
 0x554   :  { %v2133_v24 = vmul.f32 -1.442695, %v2173_v63  ;;  %v2175_v25 = vadd.f32 %v1456_v4, %v3075_v16  ;;  %v1458_v23 = vpop.f32.mrb[19].mxu0  ;;  %v1501_v26 = vpop.f32.mrb[19].mxu1  ;;  %v2207_v35 = vadd.f32 %v1499_v5, %v3082_v32  ;;  %v2135_v52 = vmul.f32 -1.442695, %v2205_v31 }
 0x555   :  { %v2134_v27 = vmul.f32 -1.442695, %v2174_v3  ;;  %v2176_v28 = vadd.f32 %v1458_v23, %v3077_v17  ;;  %v2208_v13 = vadd.f32 %v1501_v26, %v3085_v6 }
 0x556   :  { %2519 = vpow2.f32 %v2133_v24  ;;  %v2136_v29 = vmul.f32 -1.442695, %v2175_v25  ;;  %v2138_v7 = vmul.f32 -1.442695, %v2207_v35  ;;  %v3438_v35 = vld [vmem:[%s3573_s2 + $0xa8] ss:$16 sps:$4 sm:$0xff]  }
 0x557   :  { %v2137_v30 = vmul.f32 -1.442695, %v2176_v28  ;;  %2521 = vpow2.f32 %v2134_v27 }
 0x558   :  { %2523 = vpow2.f32 %v2136_v29 }
 0x559   :  { %2525 = vpow2.f32 %v2137_v30 }
 0x55a   :  { %2527 = vtanh.f32 %v2206_v43  ;;  %v3444_v43 = vld [vmem:[%s3573_s2 + $0xc4] ss:$16 sps:$4 sm:$0xff]  }
 0x55b   :  { %2529 = vpow2.f32 %v2135_v52  ;;  %v3450_v52 = vld [vmem:[%s3573_s2 + $0xcc] ss:$16 sps:$4 sm:$0xff]  }
 0x55c   :  { %2531 = vpow2.f32 %v2138_v7  ;;  %v3456_v7 = vld [vmem:[%s3573_s2 + $0xc0] ss:$16 sps:$4 sm:$0xff]  }
 0x560   :  { %v2520_v10 = vpop.eup %2519 }
 0x561   :  { %v1530_v15 = vadd.f32 1.0, %v2520_v10  ;;  %v2522_v14 = vpop.eup %2521  ;;  %v3462_v10 = vld [vmem:[%s3573_s2 + $0xc8] ss:$16 sps:$4 sm:$0xff]  }
 0x562   :  { %v2524_v61 = vpop.eup %2523  ;;  %v1531_v21 = vadd.f32 1.0, %v2522_v14  ;;  %v3480_v14 = vld [vmem:[%s3573_s2 + $0xe0] ss:$16 sps:$4 sm:$0xff]  }
 0x563   :  { %2533 = vrcp.f32 %v1530_v15  ;;  %v1533_v8 = vadd.f32 1.0, %v2524_v61  ;;  %v2526_v22 = vpop.eup %2525  ;;  %v3474_v15 = vld [vmem:[%s3573_s2 + $0xec] ss:$16 sps:$4 sm:$0xff]   ;;  %v3486_v61 = vld [vmem:[%s3573_s2 + $0xe8] ss:$16 sps:$4 sm:$0xff]  }
 0x564   :  { %2535 = vtanh.f32 %v2208_v13  ;;  %v1534_v36 = vadd.f32 1.0, %v2526_v22  ;;  %v2528_v37 = vpop.eup %2527  ;;  %v3468_v13 = vld [vmem:[%s3573_s2 + $0xe4] ss:$16 sps:$4 sm:$0xff]  }
 0x565   :  { %2537 = vrcp.f32 %v1531_v21  ;;  %v2530_v38 = vpop.eup %2529 }
 0x566   :  { %2539 = vrcp.f32 %v1533_v8  ;;  %v2532_v11 = vpop.eup %2531  ;;  %v1532_v0 = vadd.f32 1.0, %v2530_v38 }
 0x567   :  { %2541 = vrcp.f32 %v1534_v36  ;;  %v1535_v24 = vadd.f32 1.0, %v2532_v11 }
 0x568   :  { %2543 = vrcp.f32 %v1532_v0 }
 0x56d   :  { %v2534_v39 = vpop.eup %2533 }
 0x56e   :  { %v2536_v40 = vpop.eup %2535  ;;  %v1552_v60 = vmul.f32 %v2534_v39, %v2528_v37 }
 0x56f   :  { %v2538_v62 = vpop.eup %2537 }
 0x570   :  { %v2540_v63 = vpop.eup %2539  ;;  %v1550_v2 = vmul.f32 %v2538_v62, %v3240_v19 }
 0x571   :  { %v1553_v3 = vmul.f32 %v2540_v63, %v2536_v40  ;;  %v2542_v4 = vpop.eup %2541 }
 0x572   :  { %v3400_v5 = vadd.f32 %v1552_v60, %v1550_v2  ;;  %v1551_v25 = vmul.f32 %v2542_v4, %v3244_v9  ;;  %v2544_v26 = vpop.eup %2543  ;;  %v3432_v9 = vld [vmem:[%s3573_s2 + $0xa0] ss:$16 sps:$4 sm:$0xff]  }
 0x574   :  { %2545 = vtanh.f32 %v3400_v5  ;;  %v3404_v23 = vadd.f32 %v1553_v3, %v1551_v25 }
 0x575   :  { %2547 = vrcp.f32 %v1535_v24 }
 0x576   :  { %2549 = vtanh.f32 %v3404_v23 }
 0x57e   :  { %v2546_v27 = vpop.eup %2545 }
 0x57f   :  { %v2548_v28 = vpop.eup %2547  ;;  %v1558_v19 = vmul.f32 %v2546_v27, %v2544_v26 }
 0x580   :  { %v2550_v29 = vpop.eup %2549 }
 0x581   :  { %v1559_v30 = vmul.f32 %v2550_v29, %v2548_v28 }
 0x583   :  { %v1571_v31 = vpack.c.bf16 %v1559_v30, %v1558_v19 }
 0x585   :  { %1605 = vmatmul.mubr.bf16.vlgmr.msra.gmra.mrb[20].mxu0 %v1571_v31  ;;  %1648 = vmatmul.mubr.bf16.vlgmr.msra.gmra.mrb[20].mxu1 %v1571_v31 }
 0x586   :  { %1727 = vmatpush1.bf16.msra.mxu0 %v3250_v18  ;;  %1770 = vmatpush1.bf16.msra.mxu1 %v3256_v41 }
 0x587   :  { %1728 = vmatprep.subr.bf16.mxu0 %v3262_v42  ;;  %1771 = vmatprep.subr.bf16.mxu1 %v3268_v44 }
 0x588   :  { %1758 = vmatprep.mubr.bf16.mxu0 %v2679_v1  ;;  %1801 = vmatprep.mubr.bf16.mxu1 %v2679_v1 }
 0x58a   :  { %1729 = vmatpush1.bf16.msra.mxu0 %v3276_v45  ;;  %1772 = vmatpush1.bf16.msra.mxu1 %v3282_v46 }
 0x58b   :  { %1730 = vmatprep.subr.bf16.mxu0 %v3288_v47  ;;  %1773 = vmatprep.subr.bf16.mxu1 %v3294_v48 }
 0x58e   :  { %1731 = vmatpush1.bf16.msra.mxu0 %v3300_v49  ;;  %1774 = vmatpush1.bf16.msra.mxu1 %v3306_v33 }
 0x58f   :  { %1732 = vmatprep.subr.bf16.mxu0 %v3312_v34  ;;  %1775 = vmatprep.subr.bf16.mxu1 %v3318_v50 }
 0x592   :  { %1733 = vmatpush1.bf16.msra.mxu0 %v3324_v51  ;;  %1776 = vmatpush1.bf16.msra.mxu1 %v3330_v53 }
 0x593   :  { %1734 = vmatprep.subr.bf16.mxu0 %v3336_v54  ;;  %1777 = vmatprep.subr.bf16.mxu1 %v3342_v55 }
 0x596   :  { %1735 = vmatpush1.bf16.msra.mxu0 %v3348_v56  ;;  %1778 = vmatpush1.bf16.msra.mxu1 %v3354_v57 }
 0x597   :  { %1736 = vmatprep.subr.bf16.mxu0 %v3360_v12  ;;  %1779 = vmatprep.subr.bf16.mxu1 %v3366_v20 }
 0x59a   :  { %1737 = vmatpush1.bf16.msra.mxu0 %v3432_v9  ;;  %1780 = vmatpush1.bf16.msra.mxu1 %v3438_v35 }
 0x59b   :  { %1738 = vmatprep.subr.bf16.mxu0 %v3444_v43  ;;  %1781 = vmatprep.subr.bf16.mxu1 %v3450_v52 }
 0x59e   :  { %1739 = vmatpush1.bf16.msra.mxu0 %v3456_v7  ;;  %1782 = vmatpush1.bf16.msra.mxu1 %v3462_v10 }
 0x59f   :  { %1740 = vmatprep.subr.bf16.mxu0 %v3468_v13  ;;  %1783 = vmatprep.subr.bf16.mxu1 %v3474_v15 }
 0x5a2   :  { %1741 = vmatpush1.bf16.msra.mxu0 %v3480_v14  ;;  %1784 = vmatpush1.bf16.msra.mxu1 %v3486_v61 }
 0x5a3   :  { %1880 = vmatprep.subr.bf16.mxu0 %v3382_v58  ;;  %1923 = vmatprep.subr.bf16.mxu1 %v3388_v59 }
 0x658   :  { %v1606_v21 = vpop.f32.mrb[20].mxu0  ;;  %v1649_v8 = vpop.f32.mrb[20].mxu1 }
 0x659   :  { %v2177_v22 = vadd.f32 %v1606_v21, %v3075_v16  ;;  %v1608_v36 = vpop.f32.mrb[21].mxu0  ;;  %v1651_v37 = vpop.f32.mrb[21].mxu1  ;;  %v2209_v3 = vadd.f32 %v1649_v8, %v3082_v32 }
 0x65a   :  { %v2178_v38 = vadd.f32 %v1608_v36, %v3077_v17  ;;  %v1610_v11 = vpop.f32.mrb[22].mxu0  ;;  %v1653_v39 = vpop.f32.mrb[22].mxu1  ;;  %v2210_v24 = vadd.f32 %v1651_v37, %v3085_v6 }
 0x65b   :  { %v2139_v40 = vmul.f32 -1.442695, %v2177_v22  ;;  %v2179_v60 = vadd.f32 %v1610_v11, %v3075_v16  ;;  %v1612_v62 = vpop.f32.mrb[23].mxu0  ;;  %v1655_v63 = vpop.f32.mrb[23].mxu1  ;;  %v2211_v4 = vadd.f32 %v1653_v39, %v3082_v32  ;;  %v2141_v25 = vmul.f32 -1.442695, %v2209_v3 }
 0x65c   :  { %v2140_v0 = vmul.f32 -1.442695, %v2178_v38  ;;  %v2180_v58 = vadd.f32 %v1612_v62, %v3077_v17  ;;  %v2212_v28 = vadd.f32 %v1655_v63, %v3085_v6 }
 0x65d   :  { %2551 = vpow2.f32 %v2139_v40  ;;  %v2142_v59 = vmul.f32 -1.442695, %v2179_v60  ;;  %v2144_v26 = vmul.f32 -1.442695, %v2211_v4 }
 0x65e   :  { %v2143_v2 = vmul.f32 -1.442695, %v2180_v58  ;;  %2553 = vpow2.f32 %v2140_v0 }
 0x65f   :  { %2555 = vpow2.f32 %v2142_v59 }
 0x660   :  { %2557 = vpow2.f32 %v2143_v2 }
 0x661   :  { %2559 = vtanh.f32 %v2210_v24 }
 0x662   :  { %2561 = vpow2.f32 %v2141_v25 }
 0x663   :  { %2563 = vpow2.f32 %v2144_v26 }
 0x667   :  { %v2552_v27 = vpop.eup %2551 }
 0x668   :  { %v1684_v29 = vadd.f32 1.0, %v2552_v27  ;;  %v2554_v19 = vpop.eup %2553 }
 0x669   :  { %v2556_v30 = vpop.eup %2555  ;;  %v1685_v31 = vadd.f32 1.0, %v2554_v19 }
 0x66a   :  { %2565 = vrcp.f32 %v1684_v29  ;;  %v1687_v21 = vadd.f32 1.0, %v2556_v30  ;;  %v2558_v8 = vpop.eup %2557 }
 0x66b   :  { %2567 = vtanh.f32 %v2212_v28  ;;  %v1688_v22 = vadd.f32 1.0, %v2558_v8  ;;  %v2560_v36 = vpop.eup %2559 }
 0x66c   :  { %2569 = vrcp.f32 %v1685_v31  ;;  %v2562_v37 = vpop.eup %2561 }
 0x66d   :  { %2571 = vrcp.f32 %v1687_v21  ;;  %v2564_v38 = vpop.eup %2563  ;;  %v1686_v63 = vadd.f32 1.0, %v2562_v37 }
 0x66e   :  { %2573 = vrcp.f32 %v1688_v22  ;;  %v1689_v3 = vadd.f32 1.0, %v2564_v38 }
 0x66f   :  { %2575 = vrcp.f32 %v1686_v63 }
 0x674   :  { %v2566_v11 = vpop.eup %2565 }
 0x675   :  { %v2568_v39 = vpop.eup %2567  ;;  %v1706_v40 = vmul.f32 %v2566_v11, %v2560_v36 }
 0x676   :  { %v2570_v60 = vpop.eup %2569 }
 0x677   :  { %v2572_v62 = vpop.eup %2571  ;;  %v1704_v0 = vmul.f32 %v2570_v60, %v3400_v5 }
 0x678   :  { %v1707_v58 = vmul.f32 %v2572_v62, %v2568_v39  ;;  %v2574_v59 = vpop.eup %2573 }
 0x679   :  { %v3500_v2 = vadd.f32 %v1706_v40, %v1704_v0  ;;  %v1705_v4 = vmul.f32 %v2574_v59, %v3404_v23  ;;  %v2576_v25 = vpop.eup %2575 }
 0x67b   :  { %2577 = vtanh.f32 %v3500_v2  ;;  %v3504_v24 = vadd.f32 %v1707_v58, %v1705_v4 }
 0x67c   :  { %2579 = vrcp.f32 %v1689_v3 }
 0x67d   :  { %2581 = vtanh.f32 %v3504_v24 }
 0x685   :  { %v2578_v26 = vpop.eup %2577 }
 0x686   :  { %v2580_v27 = vpop.eup %2579  ;;  %v1712_v5 = vmul.f32 %v2578_v26, %v2576_v25 }
 0x687   :  { %v2582_v28 = vpop.eup %2581 }
 0x688   :  { %v1713_v29 = vmul.f32 %v2582_v28, %v2580_v27 }
 0x68a   :  { %v1725_v19 = vpack.c.bf16 %v1713_v29, %v1712_v5 }
 0x68c   :  { %1759 = vmatmul.mubr.bf16.vlgmr.msra.gmra.mrb[24].mxu0 %v1725_v19  ;;  %1802 = vmatmul.mubr.bf16.vlgmr.msra.gmra.mrb[24].mxu1 %v1725_v19 }
 0x68d   :  { %1881 = vmatpush1.bf16.msra.mxu0 %v3250_v18  ;;  %1924 = vmatpush1.bf16.msra.mxu1 %v3256_v41 }
 0x68e   :  { %1882 = vmatprep.subr.bf16.mxu0 %v3262_v42  ;;  %1925 = vmatprep.subr.bf16.mxu1 %v3268_v44 }
 0x68f   :  { %1912 = vmatprep.mubr.bf16.mxu0 %v2679_v1  ;;  %1955 = vmatprep.mubr.bf16.mxu1 %v2679_v1 }
 0x691   :  { %1883 = vmatpush1.bf16.msra.mxu0 %v3276_v45  ;;  %1926 = vmatpush1.bf16.msra.mxu1 %v3282_v46 }
 0x692   :  { %1884 = vmatprep.subr.bf16.mxu0 %v3288_v47  ;;  %1927 = vmatprep.subr.bf16.mxu1 %v3294_v48 }
 0x695   :  { %1885 = vmatpush1.bf16.msra.mxu0 %v3300_v49  ;;  %1928 = vmatpush1.bf16.msra.mxu1 %v3306_v33 }
 0x696   :  { %1886 = vmatprep.subr.bf16.mxu0 %v3312_v34  ;;  %1929 = vmatprep.subr.bf16.mxu1 %v3318_v50 }
 0x699   :  { %1887 = vmatpush1.bf16.msra.mxu0 %v3324_v51  ;;  %1930 = vmatpush1.bf16.msra.mxu1 %v3330_v53 }
 0x69a   :  { %1888 = vmatprep.subr.bf16.mxu0 %v3336_v54  ;;  %1931 = vmatprep.subr.bf16.mxu1 %v3342_v55 }
 0x69d   :  { %1889 = vmatpush1.bf16.msra.mxu0 %v3348_v56  ;;  %1932 = vmatpush1.bf16.msra.mxu1 %v3354_v57 }
 0x69e   :  { %1890 = vmatprep.subr.bf16.mxu0 %v3360_v12  ;;  %1933 = vmatprep.subr.bf16.mxu1 %v3366_v20 }
 0x6a1   :  { %1891 = vmatpush1.bf16.msra.mxu0 %v3432_v9  ;;  %1934 = vmatpush1.bf16.msra.mxu1 %v3438_v35 }
 0x6a2   :  { %1892 = vmatprep.subr.bf16.mxu0 %v3444_v43  ;;  %1935 = vmatprep.subr.bf16.mxu1 %v3450_v52 }
 0x6a5   :  { %1893 = vmatpush1.bf16.msra.mxu0 %v3456_v7  ;;  %1936 = vmatpush1.bf16.msra.mxu1 %v3462_v10 }
 0x6a6   :  { %1894 = vmatprep.subr.bf16.mxu0 %v3468_v13  ;;  %1937 = vmatprep.subr.bf16.mxu1 %v3474_v15 }
 0x6a9   :  { %1895 = vmatpush1.bf16.msra.mxu0 %v3480_v14  ;;  %1938 = vmatpush1.bf16.msra.mxu1 %v3486_v61 }
 0x75f   :  { %v1760_v1 = vpop.f32.mrb[24].mxu0  ;;  %v1803_v18 = vpop.f32.mrb[24].mxu1 }
 0x760   :  { %v2181_v41 = vadd.f32 %v1760_v1, %v3075_v16  ;;  %v1762_v42 = vpop.f32.mrb[25].mxu0  ;;  %v1805_v44 = vpop.f32.mrb[25].mxu1  ;;  %v2213_v55 = vadd.f32 %v1803_v18, %v3082_v32 }
 0x761   :  { %v2182_v45 = vadd.f32 %v1762_v42, %v3077_v17  ;;  %v1764_v46 = vpop.f32.mrb[26].mxu0  ;;  %v1807_v47 = vpop.f32.mrb[26].mxu1  ;;  %v2214_v57 = vadd.f32 %v1805_v44, %v3085_v6 }
 0x762   :  { %v2145_v48 = vmul.f32 -1.442695, %v2181_v41  ;;  %v2183_v49 = vadd.f32 %v1764_v46, %v3075_v16  ;;  %v1766_v33 = vpop.f32.mrb[27].mxu0  ;;  %v1809_v34 = vpop.f32.mrb[27].mxu1  ;;  %v2215_v56 = vadd.f32 %v1807_v47, %v3082_v32  ;;  %v2147_v12 = vmul.f32 -1.442695, %v2213_v55 }
 0x763   :  { %v2146_v50 = vmul.f32 -1.442695, %v2182_v45  ;;  %v2184_v51 = vadd.f32 %v1766_v33, %v3077_v17  ;;  %v2216_v9 = vadd.f32 %v1809_v34, %v3085_v6 }
 0x764   :  { %2583 = vpow2.f32 %v2145_v48  ;;  %v2148_v53 = vmul.f32 -1.442695, %v2183_v49  ;;  %v2150_v20 = vmul.f32 -1.442695, %v2215_v56 }
 0x765   :  { %v2149_v54 = vmul.f32 -1.442695, %v2184_v51  ;;  %2585 = vpow2.f32 %v2146_v50 }
 0x766   :  { %2587 = vpow2.f32 %v2148_v53 }
 0x767   :  { %2589 = vpow2.f32 %v2149_v54 }
 0x768   :  { %2591 = vtanh.f32 %v2214_v57 }
 0x769   :  { %2593 = vpow2.f32 %v2147_v12 }
 0x76a   :  { %2595 = vpow2.f32 %v2150_v20 }
 0x76e   :  { %v2584_v23 = vpop.eup %2583 }
 0x76f   :  { %v1838_v35 = vadd.f32 1.0, %v2584_v23  ;;  %v2586_v43 = vpop.eup %2585 }
 0x770   :  { %v2588_v52 = vpop.eup %2587  ;;  %v1839_v7 = vadd.f32 1.0, %v2586_v43 }
 0x771   :  { %2597 = vrcp.f32 %v1838_v35  ;;  %v1841_v10 = vadd.f32 1.0, %v2588_v52  ;;  %v2590_v13 = vpop.eup %2589 }
 0x772   :  { %2599 = vtanh.f32 %v2216_v9  ;;  %v1842_v15 = vadd.f32 1.0, %v2590_v13  ;;  %v2592_v14 = vpop.eup %2591 }
 0x773   :  { %2601 = vrcp.f32 %v1839_v7  ;;  %v2594_v61 = vpop.eup %2593 }
 0x774   :  { %2603 = vrcp.f32 %v1841_v10  ;;  %v2596_v30 = vpop.eup %2595  ;;  %v1840_v37 = vadd.f32 1.0, %v2594_v61 }
 0x775   :  { %2605 = vrcp.f32 %v1842_v15  ;;  %v1843_v60 = vadd.f32 1.0, %v2596_v30 }
 0x776   :  { %2607 = vrcp.f32 %v1840_v37 }
 0x77b   :  { %v2598_v31 = vpop.eup %2597 }
 0x77c   :  { %v2600_v21 = vpop.eup %2599  ;;  %v1860_v8 = vmul.f32 %v2598_v31, %v2592_v14 }
 0x77d   :  { %v2602_v22 = vpop.eup %2601 }
 0x77e   :  { %v2604_v36 = vpop.eup %2603  ;;  %v1858_v38 = vmul.f32 %v2602_v22, %v3500_v2 }
 0x77f   :  { %v1861_v11 = vmul.f32 %v2604_v36, %v2600_v21  ;;  %v2606_v39 = vpop.eup %2605 }
 0x780   :  { %v3548_v40 = vadd.f32 %v1860_v8, %v1858_v38  ;;  %v1859_v62 = vmul.f32 %v2606_v39, %v3504_v24  ;;  %v2608_v0 = vpop.eup %2607 }
 0x782   :  { %2609 = vtanh.f32 %v3548_v40  ;;  %v3552_v63 = vadd.f32 %v1861_v11, %v1859_v62 }
 0x783   :  { %2611 = vrcp.f32 %v1843_v60 }
 0x784   :  { %2613 = vtanh.f32 %v3552_v63 }
 0x78c   :  { %v2610_v58 = vpop.eup %2609 }
 0x78d   :  { %v2612_v59 = vpop.eup %2611  ;;  %v1866_v2 = vmul.f32 %v2610_v58, %v2608_v0 }
 0x78e   :  { %v2614_v3 = vpop.eup %2613 }
 0x78f   :  { %v1867_v4 = vmul.f32 %v2614_v3, %v2612_v59 }
 0x791   :  { %v1879_v25 = vpack.c.bf16 %v1867_v4, %v1866_v2 }
 0x793   :  { %1913 = vmatmul.mubr.bf16.vlgmr.msra.gmra.mrb[28].mxu0 %v1879_v25  ;;  %1956 = vmatmul.mubr.bf16.vlgmr.msra.gmra.mrb[28].mxu1 %v1879_v25 }
 0x866   :  { %v1914_v26 = vpop.f32.mrb[28].mxu0  ;;  %v1957_v27 = vpop.f32.mrb[28].mxu1 }
 0x867   :  { %v2185_v24 = vadd.f32 %v1914_v26, %v3075_v16  ;;  %v1916_v28 = vpop.f32.mrb[29].mxu0  ;;  %v1959_v5 = vpop.f32.mrb[29].mxu1  ;;  %v2217_v49 = vadd.f32 %v1957_v27, %v3082_v32 }
 0x868   :  { %v2186_v29 = vadd.f32 %v1916_v28, %v3077_v17  ;;  %v1918_v19 = vpop.f32.mrb[30].mxu0  ;;  %v1961_v1 = vpop.f32.mrb[30].mxu1  ;;  %v2218_v34 = vadd.f32 %v1959_v5, %v3085_v6 }
 0x869   :  { %v2151_v18 = vmul.f32 -1.442695, %v2185_v24  ;;  %v2187_v41 = vadd.f32 %v1918_v19, %v3075_v16  ;;  %v1920_v42 = vpop.f32.mrb[31].mxu0  ;;  %v1963_v44 = vpop.f32.mrb[31].mxu1  ;;  %v2219_v33 = vadd.f32 %v1961_v1, %v3082_v32  ;;  %v2153_v50 = vmul.f32 -1.442695, %v2217_v49 }
 0x86a   :  { %v2152_v45 = vmul.f32 -1.442695, %v2186_v29  ;;  %v2188_v46 = vadd.f32 %v1920_v42, %v3077_v17  ;;  %v2220_v53 = vadd.f32 %v1963_v44, %v3085_v6 }
 0x86b   :  { %2615 = vpow2.f32 %v2151_v18  ;;  %v2154_v47 = vmul.f32 -1.442695, %v2187_v41  ;;  %v2156_v51 = vmul.f32 -1.442695, %v2219_v33 }
 0x86c   :  { %v2155_v48 = vmul.f32 -1.442695, %v2188_v46  ;;  %2617 = vpow2.f32 %v2152_v45 }
 0x86d   :  { %2619 = vpow2.f32 %v2154_v47 }
 0x86e   :  { %2621 = vpow2.f32 %v2155_v48 }
 0x86f   :  { %2623 = vtanh.f32 %v2218_v34 }
 0x870   :  { %2625 = vpow2.f32 %v2153_v50 }
 0x871   :  { %2627 = vpow2.f32 %v2156_v51 }
 0x875   :  { %v2616_v16 = vpop.eup %2615 }
 0x876   :  { %v1992_v54 = vadd.f32 1.0, %v2616_v16  ;;  %v2618_v17 = vpop.eup %2617 }
 0x877   :  { %v2620_v55 = vpop.eup %2619  ;;  %v1993_v56 = vadd.f32 1.0, %v2618_v17 }
 0x878   :  { %2629 = vrcp.f32 %v1992_v54  ;;  %v1995_v57 = vadd.f32 1.0, %v2620_v55  ;;  %v2622_v12 = vpop.eup %2621 }
 0x879   :  { %2631 = vtanh.f32 %v2220_v53  ;;  %v1996_v32 = vadd.f32 1.0, %v2622_v12  ;;  %v2624_v20 = vpop.eup %2623 }
 0x87a   :  { %2633 = vrcp.f32 %v1993_v56  ;;  %v2626_v23 = vpop.eup %2625 }
 0x87b   :  { %2635 = vrcp.f32 %v1995_v57  ;;  %v2628_v9 = vpop.eup %2627  ;;  %v1994_v7 = vadd.f32 1.0, %v2626_v23 }
 0x87c   :  { %2637 = vrcp.f32 %v1996_v32  ;;  %v1997_v30 = vadd.f32 1.0, %v2628_v9 }
 0x87d   :  { %2639 = vrcp.f32 %v1994_v7 }
 0x882   :  { %v2630_v35 = vpop.eup %2629 }
 0x883   :  { %v2632_v43 = vpop.eup %2631  ;;  %v2014_v6 = vmul.f32 %v2630_v35, %v2624_v20 }
 0x884   :  { %v2634_v52 = vpop.eup %2633 }
 0x885   :  { %v2636_v10 = vpop.eup %2635  ;;  %v2012_v13 = vmul.f32 %v2634_v52, %v3548_v40 }
 0x886   :  { %v2015_v15 = vmul.f32 %v2636_v10, %v2632_v43  ;;  %v2638_v14 = vpop.eup %2637 }
 0x887   :  { %v2016_v61 = vadd.f32 %v2014_v6, %v2012_v13  ;;  %v2013_v31 = vmul.f32 %v2638_v14, %v3552_v63  ;;  %v2640_v8 = vpop.eup %2639 }
 0x889   :  { %2641 = vtanh.f32 %v2016_v61  ;;  %v2017_v21 = vadd.f32 %v2015_v15, %v2013_v31 }
 0x88a   :  { %2643 = vrcp.f32 %v1997_v30 }
 0x88b   :  { %2645 = vtanh.f32 %v2017_v21 }
 0x893   :  { %v2642_v22 = vpop.eup %2641 }
 0x894   :  { %v2020_v36 = vmul.f32 %v2642_v22, %v2640_v8  ;;  %v2644_v37 = vpop.eup %2643 }
 0x895   :  { %v2646_v38 = vpop.eup %2645 }
 0x896   :  { %2022 = vst [vmem:[%s3575_s4] sm:$0xff] %v2020_v36  ;;  %v2021_v11 = vmul.f32 %v2646_v38, %v2644_v37 }
 0x898   :  { %2023 = vst [vmem:[%s3575_s4 + $0x8] sm:$0xff] %v2021_v11 }

// kernel: lstm_model_forward.2
= control target key start
LH: loop header
LB: loop body
LE: loop exit
PB: predicated region body
PF: predicated region fallthrough
CT: control target
= control target key end

     0   :  { %11 = vsyncpa [#allocation5], 0  ;;  %s3601_s0 = inlined_call_operand.vmem [shape: bf16[8,16,128], index: 0, kind: input, shape index: {}]   ;;  %s3602_s1 = inlined_call_operand.hbm [shape: bf16[128,512], index: 1, kind: input, shape index: {}]   ;;  %s3603_s2 = inlined_call_operand.hbm [shape: bf16[128,512], index: 2, kind: input, shape index: {}]   ;;  %s3604_s3 = inlined_call_operand.vmem [shape: f32[1,512], index: 3, kind: input, shape index: {}]   ;;  %s3605_s4 = inlined_call_operand.vmem [shape: bf16[8,16,128], index: 4, kind: output, shape index: {0}]   ;;  %s3606_s5 = inlined_call_operand.vmem [shape: f32[16,128], index: 5, kind: output, shape index: {1}]  }
   0x1   :  { %12 = vsyncpa [#allocation7], 0  ;;  %s2940_s18 = smov [#allocation4]   ;;  %s2892_s22 = scalar_lea.hbm %s3602_s1, 4096 }
   0x2   :  { %s20_s19 = sshll.u32 %s2940_s18, 4  ;;  %p2893_p0 = scmp.ne.s32.totalorder %s3602_s1, %s2892_s22  ;;  %s21_s19 = int_to_ptr.vmem [resolvable:$true] %s20_s19 }
   0x3   :  { %p2896_p1 = scmp.lt.u32.totalorder %s2892_s22, %s3602_s1 }
   0x5   :  { %p2898_p2 = pnand %p2896_p1, %p2893_p0 }
   0x7   :  { %2901 = shalt.err (!%p2898_p2)
}
   0x8   :  { %s2902_s27 = scalar_lea.vmem %s21_s19, 4096  ;;  %p2907_p4 = scmp.lt.s32.totalorder %s21_s19, %s21_s19 }
   0x9   :  { %p2903_p3 = scmp.ne.s32.totalorder %s21_s19, %s2902_s27  ;;  %p2908_p5 = scmp.lt.s32.totalorder %s2902_s27, %s2902_s27 }
   0xb   :  { %p2909_p6 = por %p2908_p5, %p2907_p4 }
   0xd   :  { %p2910_p7 = pnand %p2909_p6, %p2903_p3 }
   0xf   :  { %2913 = shalt.err (!%p2910_p7)
}
  0x10   :  { %s2941_s28 = smov 256   ;;  %s2942_s29 = smov 16  }
  0x11   :  { %26 = dma.hbm_to_vmem [thread:$0]  %s3602_s1, 4096, %s21_s19, [#allocation5], %s2941_s28, %s2941_s28, %s2942_s29  }
  0x12   :  { %s2943_s7 = smov [#allocation6]   ;;  %s2914_s11 = scalar_lea.hbm %s3603_s2, 4096 }
  0x13   :  { %s32_s8 = sshll.u32 %s2943_s7, 4  ;;  %p2915_p8 = scmp.ne.s32.totalorder %s3603_s2, %s2914_s11  ;;  %s33_s8 = int_to_ptr.vmem [resolvable:$true] %s32_s8 }
  0x14   :  { %p2918_p9 = scmp.lt.u32.totalorder %s2914_s11, %s3603_s2 }
  0x16   :  { %p2920_p10 = pnand %p2918_p9, %p2915_p8 }
  0x18   :  { %2923 = shalt.err (!%p2920_p10)
}
  0x19   :  { %s2924_s16 = scalar_lea.vmem %s33_s8, 4096  ;;  %p2929_p12 = scmp.lt.s32.totalorder %s33_s8, %s33_s8 }
  0x1a   :  { %p2925_p11 = scmp.ne.s32.totalorder %s33_s8, %s2924_s16  ;;  %p2930_p13 = scmp.lt.s32.totalorder %s2924_s16, %s2924_s16 }
  0x1c   :  { %p2931_p0 = por %p2930_p13, %p2929_p12 }
  0x1e   :  { %p2932_p1 = pnand %p2931_p0, %p2925_p11 }
  0x20   :  { %2935 = shalt.err (!%p2932_p1)
}
  0x21   :  { %38 = dma.hbm_to_vmem [thread:$0]  %s3603_s2, 4096, %s33_s8, [#allocation7], %s2941_s28, %s2941_s28, %s2942_s29  }
  0x22   :  { %2936 = dma.done.wait [#allocation5], 4096  }
  0x23   :  { %2937 = vsyncadd [#allocation5], 4294963200 }
  0x24   :  { %2938 = dma.done.wait [#allocation7], 4096  }
  0x25   :  { %2939 = vsyncadd [#allocation7], 4294963200  ;;  %v2944_v0 = vmov 0   ;;  %v2500_v1 = vld [vmem:[#allocation4 + $0x4] ss:$16 sps:$4 sm:$0xff]   ;;  %v2552_v43 = vld [vmem:[%s3601_s0 + $0x8] sm:$0xff]  }
  0x26   :  { %366 = vmatprep.mubr.bf16.mxu0 %v2944_v0  ;;  %479 = vmatprep.mubr.bf16.mxu1 %v2944_v0  ;;  %v2502_v2 = vld [vmem:[#allocation4 + $0xc] ss:$16 sps:$4 sm:$0xff]   ;;  %v2504_v3 = vld [vmem:[#allocation4] ss:$16 sps:$4 sm:$0xff]   ;;  %v2505_v4 = vld [vmem:[#allocation4 + $0x8] ss:$16 sps:$4 sm:$0xff]  }
  0x27   :  { %334 = vmatprep.subr.bf16.mxu0 %v2500_v1  ;;  %447 = vmatprep.subr.bf16.mxu1 %v2502_v2  ;;  %v2506_v5 = vld [vmem:[#allocation4 + $0x24] ss:$16 sps:$4 sm:$0xff]   ;;  %v2508_v6 = vld [vmem:[#allocation4 + $0x2c] ss:$16 sps:$4 sm:$0xff]   ;;  %v2510_v7 = vld [vmem:[#allocation4 + $0x20] ss:$16 sps:$4 sm:$0xff]  }
  0x28   :  { %335 = vmatpush1.bf16.msra.mxu0 %v2504_v3  ;;  %448 = vmatpush1.bf16.msra.mxu1 %v2505_v4  ;;  %v2511_v8 = vld [vmem:[#allocation4 + $0x28] ss:$16 sps:$4 sm:$0xff]   ;;  %v2512_v9 = vld [vmem:[#allocation4 + $0x44] ss:$16 sps:$4 sm:$0xff]   ;;  %v2514_v10 = vld [vmem:[#allocation4 + $0x4c] ss:$16 sps:$4 sm:$0xff]  }
  0x29   :  { %336 = vmatprep.subr.bf16.mxu0 %v2506_v5  ;;  %449 = vmatprep.subr.bf16.mxu1 %v2508_v6  ;;  %v2516_v11 = vld [vmem:[#allocation4 + $0x40] ss:$16 sps:$4 sm:$0xff]   ;;  %v2517_v12 = vld [vmem:[#allocation4 + $0x48] ss:$16 sps:$4 sm:$0xff]   ;;  %v2518_v13 = vld [vmem:[#allocation4 + $0x64] ss:$16 sps:$4 sm:$0xff]  }
  0x2a   :  { %v2520_v14 = vld [vmem:[#allocation4 + $0x6c] ss:$16 sps:$4 sm:$0xff]   ;;  %v2522_v15 = vld [vmem:[#allocation4 + $0x60] ss:$16 sps:$4 sm:$0xff]   ;;  %v2523_v16 = vld [vmem:[#allocation4 + $0x68] ss:$16 sps:$4 sm:$0xff]  }
  0x2b   :  { %v2524_v17 = vld [vmem:[#allocation4 + $0x84] ss:$16 sps:$4 sm:$0xff]   ;;  %v2526_v18 = vld [vmem:[#allocation4 + $0x8c] ss:$16 sps:$4 sm:$0xff]   ;;  %v2528_v19 = vld [vmem:[#allocation4 + $0x80] ss:$16 sps:$4 sm:$0xff]  }
  0x2c   :  { %337 = vmatpush1.bf16.msra.mxu0 %v2510_v7  ;;  %450 = vmatpush1.bf16.msra.mxu1 %v2511_v8  ;;  %v2529_v20 = vld [vmem:[#allocation4 + $0x88] ss:$16 sps:$4 sm:$0xff]   ;;  %v2530_v21 = vld [vmem:[#allocation4 + $0xa4] ss:$16 sps:$4 sm:$0xff]   ;;  %v2532_v22 = vld [vmem:[#allocation4 + $0xac] ss:$16 sps:$4 sm:$0xff]  }
  0x2d   :  { %338 = vmatprep.subr.bf16.mxu0 %v2512_v9  ;;  %451 = vmatprep.subr.bf16.mxu1 %v2514_v10  ;;  %v2534_v23 = vld [vmem:[#allocation4 + $0xa0] ss:$16 sps:$4 sm:$0xff]   ;;  %v2535_v24 = vld [vmem:[#allocation4 + $0xa8] ss:$16 sps:$4 sm:$0xff]   ;;  %v2536_v25 = vld [vmem:[#allocation4 + $0xc4] ss:$16 sps:$4 sm:$0xff]  }
  0x2e   :  { %v2538_v26 = vld [vmem:[#allocation4 + $0xcc] ss:$16 sps:$4 sm:$0xff]   ;;  %v2540_v27 = vld [vmem:[#allocation4 + $0xc0] ss:$16 sps:$4 sm:$0xff]   ;;  %v2541_v28 = vld [vmem:[#allocation4 + $0xc8] ss:$16 sps:$4 sm:$0xff]  }
  0x2f   :  { %v2542_v29 = vld [vmem:[#allocation4 + $0xe4] ss:$16 sps:$4 sm:$0xff]   ;;  %v2544_v30 = vld [vmem:[#allocation4 + $0xec] ss:$16 sps:$4 sm:$0xff]   ;;  %v2546_v31 = vld [vmem:[#allocation4 + $0xe0] ss:$16 sps:$4 sm:$0xff]  }
  0x30   :  { %339 = vmatpush1.bf16.msra.mxu0 %v2516_v11  ;;  %452 = vmatpush1.bf16.msra.mxu1 %v2517_v12  ;;  %v2547_v32 = vld [vmem:[#allocation4 + $0xe8] ss:$16 sps:$4 sm:$0xff]   ;;  %v3002_v33 = vld [vmem:[#allocation6 + $0x4] ss:$16 sps:$4 sm:$0xff]   ;;  %v3004_v34 = vld [vmem:[#allocation6 + $0xc] ss:$16 sps:$4 sm:$0xff]   ;;  %v106_v11 = vlaneseq }
  0x31   :  { %340 = vmatprep.subr.bf16.mxu0 %v2518_v13  ;;  %453 = vmatprep.subr.bf16.mxu1 %v2520_v14  ;;  %v2548_v35 = vld [vmem:[%s3601_s0] sm:$0xff]   ;;  %v3015_v38 = vld [vmem:[#allocation6 + $0x8] ss:$16 sps:$4 sm:$0xff]   ;;  %v3017_v39 = vld [vmem:[#allocation6 + $0x2c] ss:$16 sps:$4 sm:$0xff]   ;;  %v2945_v10 = vmov 0.0|0.0  }
  0x32   :  { %v3009_v36 = vld [vmem:[#allocation6] ss:$16 sps:$4 sm:$0xff]   ;;  %v3012_v37 = vld [vmem:[#allocation6 + $0x24] ss:$16 sps:$4 sm:$0xff]   ;;  %v3028_v42 = vld [vmem:[#allocation6 + $0x28] ss:$16 sps:$4 sm:$0xff]  }
  0x33   :  { %v3021_v40 = vld [vmem:[#allocation6 + $0x20] ss:$16 sps:$4 sm:$0xff]   ;;  %v3025_v41 = vld [vmem:[#allocation6 + $0x44] ss:$16 sps:$4 sm:$0xff]   ;;  %v3040_v46 = vld [vmem:[#allocation6 + $0x4c] ss:$16 sps:$4 sm:$0xff]  }
  0x34   :  { %341 = vmatpush1.bf16.msra.mxu0 %v2522_v15  ;;  %454 = vmatpush1.bf16.msra.mxu1 %v2523_v16  ;;  %v3035_v44 = vld [vmem:[#allocation6 + $0x40] ss:$16 sps:$4 sm:$0xff]   ;;  %v3037_v45 = vld [vmem:[#allocation6 + $0x64] ss:$16 sps:$4 sm:$0xff]   ;;  %v3043_v47 = vld [vmem:[#allocation6 + $0x48] ss:$16 sps:$4 sm:$0xff]  }
  0x35   :  { %342 = vmatprep.subr.bf16.mxu0 %v2524_v17  ;;  %455 = vmatprep.subr.bf16.mxu1 %v2526_v18  ;;  %v3045_v48 = vld [vmem:[#allocation6 + $0x6c] ss:$16 sps:$4 sm:$0xff]   ;;  %v3050_v49 = vld [vmem:[#allocation6 + $0x60] ss:$16 sps:$4 sm:$0xff]   ;;  %v3053_v50 = vld [vmem:[#allocation6 + $0x84] ss:$16 sps:$4 sm:$0xff]  }
  0x36   :  { %v3057_v51 = vld [vmem:[#allocation6 + $0x68] ss:$16 sps:$4 sm:$0xff]   ;;  %v2558_v52 = vld [vmem:[%s3601_s0 + $0x10] sm:$0xff]   ;;  %v3066_v54 = vld [vmem:[#allocation6 + $0x8c] ss:$16 sps:$4 sm:$0xff]   ;;  %v107_v12 = vshrl.u32 %v106_v11, 7 }
  0x37   :  { %v3063_v53 = vld [vmem:[#allocation6 + $0x80] ss:$16 sps:$4 sm:$0xff]   ;;  %v3069_v55 = vld [vmem:[#allocation6 + $0xa4] ss:$16 sps:$4 sm:$0xff]   ;;  %v3072_v56 = vld [vmem:[#allocation6 + $0x88] ss:$16 sps:$4 sm:$0xff]  }
  0x38   :  { %343 = vmatpush1.bf16.msra.mxu0 %v2528_v19  ;;  %456 = vmatpush1.bf16.msra.mxu1 %v2529_v20  ;;  %v3074_v57 = vld [vmem:[#allocation6 + $0xac] ss:$16 sps:$4 sm:$0xff]   ;;  %v3079_v58 = vld [vmem:[#allocation6 + $0xa0] ss:$16 sps:$4 sm:$0xff]   ;;  %v3083_v59 = vld [vmem:[#allocation6 + $0xc4] ss:$16 sps:$4 sm:$0xff]  }
  0x39   :  { %344 = vmatprep.subr.bf16.mxu0 %v2530_v21  ;;  %457 = vmatprep.subr.bf16.mxu1 %v2532_v22  ;;  %v3086_v60 = vld [vmem:[#allocation6 + $0xa8] ss:$16 sps:$4 sm:$0xff]   ;;  %v3093_v62 = vld [vmem:[#allocation6 + $0xc0] ss:$16 sps:$4 sm:$0xff]   ;;  %v3095_v63 = vld [vmem:[#allocation6 + $0xcc] ss:$16 sps:$4 sm:$0xff]  }
  0x3a   :  { %v2565_v61 = vld [vmem:[%s3601_s0 + $0x18] sm:$0xff]   ;;  %v3099_v1 = vld [vmem:[#allocation6 + $0xe4] ss:$16 sps:$4 sm:$0xff]   ;;  %v3109_v4 = vld [vmem:[#allocation6 + $0xe0] ss:$16 sps:$4 sm:$0xff]   ;;  %v108_v13 = vsub.s32 0, %v107_v12 }
  0x3b   :  { %v3101_v2 = vld [vmem:[#allocation6 + $0xc8] ss:$16 sps:$4 sm:$0xff]   ;;  %v3103_v3 = vld [vmem:[#allocation6 + $0xec] ss:$16 sps:$4 sm:$0xff]   ;;  %v2572_v6 = vld [vmem:[%s3601_s0 + $0x20] sm:$0xff]   ;;  %v112_v15 = vsub.s32 1, %v107_v12 }
  0x3c   :  { %345 = vmatpush1.bf16.msra.mxu0 %v2534_v23  ;;  %458 = vmatpush1.bf16.msra.mxu1 %v2535_v24  ;;  %v3113_v5 = vld [vmem:[#allocation6 + $0xe8] ss:$16 sps:$4 sm:$0xff]   ;;  %v2586_v8 = vld [vmem:[%s3601_s0 + $0x30] sm:$0xff]   ;;  %v104_v14 = vld [vmem:[%s3604_s3] sm:$0xf]  ;;  %v116_v19 = vsub.s32 2, %v107_v12 }
  0x3d   :  { %346 = vmatprep.subr.bf16.mxu0 %v2536_v25  ;;  %459 = vmatprep.subr.bf16.mxu1 %v2538_v26  ;;  %v2579_v7 = vld [vmem:[%s3601_s0 + $0x28] sm:$0xff]   ;;  %v2594_v9 = vld [vmem:[%s3601_s0 + $0x38] sm:$0xff]   ;;  %v3177_v16 = vrot.slane %v104_v14, %v108_v13  ;;  %v3179_v17 = vrot.slane %v104_v14, %v112_v15 }
  0x40   :  { %347 = vmatpush1.bf16.msra.mxu0 %v2540_v27  ;;  %460 = vmatpush1.bf16.msra.mxu1 %v2541_v28  ;;  %v120_v28 = vsub.s32 3, %v107_v12 }
  0x41   :  { %348 = vmatprep.subr.bf16.mxu0 %v2542_v29  ;;  %461 = vmatprep.subr.bf16.mxu1 %v2544_v30 }
  0x44   :  { %349 = vmatpush1.bf16.msra.mxu0 %v2546_v31  ;;  %462 = vmatpush1.bf16.msra.mxu1 %v2547_v32  ;;  %v3184_v32 = vrot.slane %v104_v14, %v116_v19 }
  0x45   :  { %832 = vmatprep.subr.bf16.mxu0 %v3002_v33  ;;  %875 = vmatprep.subr.bf16.mxu1 %v3004_v34 }
  0x47   :  { %367 = vmatmul.mubr.bf16.vlgmr.msra.gmra.mrb[0].mxu0 %v2548_v35  ;;  %480 = vmatmul.mubr.bf16.vlgmr.msra.gmra.mrb[0].mxu1 %v2548_v35 }
  0x48   :  { %833 = vmatpush1.bf16.msra.mxu0 %v3009_v36  ;;  %376 = vmatprep.mubr.bf16.mxu0 %v2944_v0 }
  0x49   :  { %489 = vmatprep.mubr.bf16.mxu1 %v2944_v0  ;;  %834 = vmatprep.subr.bf16.mxu0 %v3012_v37 }
  0x4a   :  { %876 = vmatpush1.bf16.msra.mxu1 %v3015_v38 }
  0x4b   :  { %877 = vmatprep.subr.bf16.mxu1 %v3017_v39 }
  0x4c   :  { %835 = vmatpush1.bf16.msra.mxu0 %v3021_v40 }
  0x4d   :  { %836 = vmatprep.subr.bf16.mxu0 %v3025_v41 }
  0x4e   :  { %878 = vmatpush1.bf16.msra.mxu1 %v3028_v42 }
  0x4f   :  { %377 = vmatmul.mubr.bf16.gmra.mrb[4].mxu0 %v2552_v43  ;;  %490 = vmatmul.mubr.bf16.gmra.mrb[4].mxu1 %v2552_v43 }
  0x50   :  { %386 = vmatprep.mubr.bf16.mxu0 %v2944_v0  ;;  %499 = vmatprep.mubr.bf16.mxu1 %v2944_v0 }
  0x51   :  { %837 = vmatpush1.bf16.msra.mxu0 %v3035_v44  ;;  %879 = vmatprep.subr.bf16.mxu1 %v3040_v46 }
  0x52   :  { %838 = vmatprep.subr.bf16.mxu0 %v3037_v45  ;;  %880 = vmatpush1.bf16.msra.mxu1 %v3043_v47 }
  0x53   :  { %881 = vmatprep.subr.bf16.mxu1 %v3045_v48 }
  0x55   :  { %839 = vmatpush1.bf16.msra.mxu0 %v3050_v49 }
  0x56   :  { %840 = vmatprep.subr.bf16.mxu0 %v3053_v50  ;;  %882 = vmatpush1.bf16.msra.mxu1 %v3057_v51 }
  0x57   :  { %387 = vmatmul.mubr.bf16.gmra.mrb[8].mxu0 %v2558_v52  ;;  %500 = vmatmul.mubr.bf16.gmra.mrb[8].mxu1 %v2558_v52 }
  0x58   :  { %396 = vmatprep.mubr.bf16.mxu0 %v2944_v0  ;;  %509 = vmatprep.mubr.bf16.mxu1 %v2944_v0 }
  0x59   :  { %841 = vmatpush1.bf16.msra.mxu0 %v3063_v53  ;;  %883 = vmatprep.subr.bf16.mxu1 %v3066_v54 }
  0x5a   :  { %842 = vmatprep.subr.bf16.mxu0 %v3069_v55  ;;  %884 = vmatpush1.bf16.msra.mxu1 %v3072_v56 }
  0x5b   :  { %885 = vmatprep.subr.bf16.mxu1 %v3074_v57 }
  0x5d   :  { %843 = vmatpush1.bf16.msra.mxu0 %v3079_v58 }
  0x5e   :  { %844 = vmatprep.subr.bf16.mxu0 %v3083_v59  ;;  %886 = vmatpush1.bf16.msra.mxu1 %v3086_v60 }
  0x5f   :  { %397 = vmatmul.mubr.bf16.gmra.mrb[12].mxu0 %v2565_v61  ;;  %510 = vmatmul.mubr.bf16.gmra.mrb[12].mxu1 %v2565_v61 }
  0x60   :  { %406 = vmatprep.mubr.bf16.mxu0 %v2944_v0  ;;  %519 = vmatprep.mubr.bf16.mxu1 %v2944_v0 }
  0x61   :  { %845 = vmatpush1.bf16.msra.mxu0 %v3093_v62  ;;  %887 = vmatprep.subr.bf16.mxu1 %v3095_v63 }
  0x62   :  { %846 = vmatprep.subr.bf16.mxu0 %v3099_v1  ;;  %888 = vmatpush1.bf16.msra.mxu1 %v3101_v2 }
  0x63   :  { %889 = vmatprep.subr.bf16.mxu1 %v3103_v3 }
  0x65   :  { %847 = vmatpush1.bf16.msra.mxu0 %v3109_v4 }
  0x66   :  { %890 = vmatpush1.bf16.msra.mxu1 %v3113_v5  ;;  %995 = vmatprep.subr.bf16.mxu0 %v3002_v33 }
  0x67   :  { %407 = vmatmul.mubr.bf16.gmra.mrb[16].mxu0 %v2572_v6  ;;  %520 = vmatmul.mubr.bf16.gmra.mrb[16].mxu1 %v2572_v6  ;;  %v3187_v6 = vrot.slane %v104_v14, %v120_v28 }
  0x68   :  { %416 = vmatprep.mubr.bf16.mxu0 %v2944_v0  ;;  %529 = vmatprep.mubr.bf16.mxu1 %v2944_v0 }
  0x69   :  { %1038 = vmatprep.subr.bf16.mxu1 %v3004_v34 }
  0x6f   :  { %417 = vmatmul.mubr.bf16.gmra.mrb[20].mxu0 %v2579_v7  ;;  %530 = vmatmul.mubr.bf16.gmra.mrb[20].mxu1 %v2579_v7 }
  0x70   :  { %426 = vmatprep.mubr.bf16.mxu0 %v2944_v0  ;;  %539 = vmatprep.mubr.bf16.mxu1 %v2944_v0 }
  0x77   :  { %427 = vmatmul.mubr.bf16.gmra.mrb[24].mxu0 %v2586_v8  ;;  %540 = vmatmul.mubr.bf16.gmra.mrb[24].mxu1 %v2586_v8 }
  0x78   :  { %436 = vmatprep.mubr.bf16.mxu0 %v2944_v0  ;;  %549 = vmatprep.mubr.bf16.mxu1 %v2944_v0 }
  0x7f   :  { %437 = vmatmul.mubr.bf16.gmra.mrb[28].mxu0 %v2594_v9  ;;  %550 = vmatmul.mubr.bf16.gmra.mrb[28].mxu1 %v2594_v9 }
  0x80   :  { %864 = vmatprep.mubr.bf16.mxu0 %v2944_v0  ;;  %907 = vmatprep.mubr.bf16.mxu1 %v2944_v0 }
  0x87   :  { %865 = vmatmul.mubr.bf16.vlgmr.msra.gmra.mrb[0].mxu0 %v2945_v10  ;;  %908 = vmatmul.mubr.bf16.vlgmr.msra.gmra.mrb[0].mxu1 %v2945_v10 }
  0x88   :  { %996 = vmatpush1.bf16.msra.mxu0 %v3009_v36  ;;  %1039 = vmatpush1.bf16.msra.mxu1 %v3015_v38 }
  0x89   :  { %997 = vmatprep.subr.bf16.mxu0 %v3012_v37  ;;  %1040 = vmatprep.subr.bf16.mxu1 %v3017_v39 }
  0x8a   :  { %1027 = vmatprep.mubr.bf16.mxu0 %v2944_v0  ;;  %1070 = vmatprep.mubr.bf16.mxu1 %v2944_v0 }
  0x8c   :  { %998 = vmatpush1.bf16.msra.mxu0 %v3021_v40  ;;  %1041 = vmatpush1.bf16.msra.mxu1 %v3028_v42 }
  0x8d   :  { %999 = vmatprep.subr.bf16.mxu0 %v3025_v41  ;;  %1042 = vmatprep.subr.bf16.mxu1 %v3040_v46 }
  0x90   :  { %1000 = vmatpush1.bf16.msra.mxu0 %v3035_v44  ;;  %1043 = vmatpush1.bf16.msra.mxu1 %v3043_v47 }
  0x91   :  { %1001 = vmatprep.subr.bf16.mxu0 %v3037_v45  ;;  %1044 = vmatprep.subr.bf16.mxu1 %v3045_v48 }
  0x94   :  { %1002 = vmatpush1.bf16.msra.mxu0 %v3050_v49  ;;  %1045 = vmatpush1.bf16.msra.mxu1 %v3057_v51 }
  0x95   :  { %1003 = vmatprep.subr.bf16.mxu0 %v3053_v50  ;;  %1046 = vmatprep.subr.bf16.mxu1 %v3066_v54 }
  0x98   :  { %1004 = vmatpush1.bf16.msra.mxu0 %v3063_v53  ;;  %1047 = vmatpush1.bf16.msra.mxu1 %v3072_v56 }
  0x99   :  { %1005 = vmatprep.subr.bf16.mxu0 %v3069_v55  ;;  %1048 = vmatprep.subr.bf16.mxu1 %v3074_v57 }
  0x9c   :  { %1006 = vmatpush1.bf16.msra.mxu0 %v3079_v58  ;;  %1049 = vmatpush1.bf16.msra.mxu1 %v3086_v60 }
  0x9d   :  { %1007 = vmatprep.subr.bf16.mxu0 %v3083_v59  ;;  %1050 = vmatprep.subr.bf16.mxu1 %v3095_v63 }
  0xa0   :  { %1008 = vmatpush1.bf16.msra.mxu0 %v3093_v62  ;;  %1051 = vmatpush1.bf16.msra.mxu1 %v3101_v2 }
  0xa1   :  { %1009 = vmatprep.subr.bf16.mxu0 %v3099_v1  ;;  %1052 = vmatprep.subr.bf16.mxu1 %v3103_v3 }
  0xa4   :  { %1010 = vmatpush1.bf16.msra.mxu0 %v3109_v4  ;;  %1053 = vmatpush1.bf16.msra.mxu1 %v3113_v5 }
  0xa5   :  { %1159 = vmatprep.subr.bf16.mxu0 %v3002_v33  ;;  %1202 = vmatprep.subr.bf16.mxu1 %v3004_v34 }
 0x15a   :  { %v866_v18 = vpop.f32.mrb[0].mxu0  ;;  %v909_v20 = vpop.f32.mrb[0].mxu1 }
 0x15b   :  { %v2366_v21 = vadd.f32 %v866_v18, %v3177_v16  ;;  %v868_v22 = vpop.f32.mrb[1].mxu0  ;;  %v911_v23 = vpop.f32.mrb[1].mxu1  ;;  %v2398_v7 = vadd.f32 %v909_v20, %v3184_v32 }
 0x15c   :  { %v2367_v24 = vadd.f32 %v868_v22, %v3179_v17  ;;  %v870_v25 = vpop.f32.mrb[2].mxu0  ;;  %v913_v26 = vpop.f32.mrb[2].mxu1  ;;  %v2399_v9 = vadd.f32 %v911_v23, %v3187_v6 }
 0x15d   :  { %v2225_v27 = vmul.f32 -1.442695, %v2366_v21  ;;  %v2368_v29 = vadd.f32 %v870_v25, %v3177_v16  ;;  %v872_v30 = vpop.f32.mrb[3].mxu0  ;;  %v915_v31 = vpop.f32.mrb[3].mxu1  ;;  %v2400_v8 = vadd.f32 %v913_v26, %v3184_v32  ;;  %v2227_v10 = vmul.f32 -1.442695, %v2398_v7 }
 0x15e   :  { %v2226_v35 = vmul.f32 -1.442695, %v2367_v24  ;;  %v2369_v43 = vadd.f32 %v872_v30, %v3179_v17  ;;  %v2401_v13 = vadd.f32 %v915_v31, %v3187_v6 }
 0x15f   :  { %2604 = vpow2.f32 %v2225_v27  ;;  %v2228_v52 = vmul.f32 -1.442695, %v2368_v29  ;;  %v2230_v11 = vmul.f32 -1.442695, %v2400_v8 }
 0x160   :  { %v2229_v61 = vmul.f32 -1.442695, %v2369_v43  ;;  %2606 = vpow2.f32 %v2226_v35 }
 0x161   :  { %2608 = vpow2.f32 %v2228_v52 }
 0x162   :  { %2610 = vpow2.f32 %v2229_v61 }
 0x163   :  { %2612 = vtanh.f32 %v2399_v9 }
 0x164   :  { %2614 = vpow2.f32 %v2227_v10 }
 0x165   :  { %2616 = vpow2.f32 %v2230_v11 }
 0x169   :  { %v2605_v12 = vpop.eup %2604 }
 0x16a   :  { %v944_v15 = vadd.f32 1.0, %v2605_v12  ;;  %v2607_v18 = vpop.eup %2606 }
 0x16b   :  { %v2609_v14 = vpop.eup %2608  ;;  %v945_v19 = vadd.f32 1.0, %v2607_v18 }
 0x16c   :  { %2618 = vrcp.f32 %v944_v15  ;;  %v947_v20 = vadd.f32 1.0, %v2609_v14  ;;  %v2611_v21 = vpop.eup %2610 }
 0x16d   :  { %2620 = vtanh.f32 %v2401_v13  ;;  %v948_v22 = vadd.f32 1.0, %v2611_v21  ;;  %v2613_v23 = vpop.eup %2612 }
 0x16e   :  { %2622 = vrcp.f32 %v945_v19  ;;  %v2615_v24 = vpop.eup %2614 }
 0x16f   :  { %2624 = vrcp.f32 %v947_v20  ;;  %v2617_v25 = vpop.eup %2616  ;;  %v946_v31 = vadd.f32 1.0, %v2615_v24 }
 0x170   :  { %2626 = vrcp.f32 %v948_v22  ;;  %v949_v7 = vadd.f32 1.0, %v2617_v25 }
 0x171   :  { %2628 = vrcp.f32 %v946_v31 }
 0x176   :  { %v2619_v26 = vpop.eup %2618 }
 0x177   :  { %v2621_v27 = vpop.eup %2620  ;;  %v966_v28 = vmul.f32 %v2619_v26, %v2613_v23 }
 0x178   :  { %v2623_v29 = vpop.eup %2622 }
 0x179   :  { %v2625_v30 = vpop.eup %2624  ;;  %v964_v35 = vmul.f32 0.0, %v2623_v29 }
 0x17a   :  { %v967_v43 = vmul.f32 %v2625_v30, %v2621_v27  ;;  %v2627_v52 = vpop.eup %2626 }
 0x17b   :  { %v3193_v61 = vadd.f32 %v966_v28, %v964_v35  ;;  %v965_v8 = vmul.f32 0.0, %v2627_v52  ;;  %v2629_v10 = vpop.eup %2628 }
 0x17d   :  { %2630 = vtanh.f32 %v3193_v61  ;;  %v3196_v9 = vadd.f32 %v967_v43, %v965_v8 }
 0x17e   :  { %2632 = vrcp.f32 %v949_v7 }
 0x17f   :  { %2634 = vtanh.f32 %v3196_v9 }
 0x187   :  { %v2631_v11 = vpop.eup %2630 }
 0x188   :  { %v2633_v12 = vpop.eup %2632  ;;  %v972_v15 = vmul.f32 %v2631_v11, %v2629_v10 }
 0x189   :  { %v2635_v13 = vpop.eup %2634 }
 0x18a   :  { %v973_v18 = vmul.f32 %v2635_v13, %v2633_v12 }
 0x18c   :  { %v974_v14 = vpack.c.bf16 %v973_v18, %v972_v15 }
 0x18e   :  { %2323 = vst [vmem:[%s3605_s4] sm:$0xff] %v974_v14   ;;  %1028 = vmatmul.mubr.bf16.vlgmr.msra.gmra.mrb[4].mxu0 %v974_v14  ;;  %1071 = vmatmul.mubr.bf16.vlgmr.msra.gmra.mrb[4].mxu1 %v974_v14 }
 0x18f   :  { %1160 = vmatpush1.bf16.msra.mxu0 %v3009_v36  ;;  %1203 = vmatpush1.bf16.msra.mxu1 %v3015_v38 }
 0x190   :  { %1161 = vmatprep.subr.bf16.mxu0 %v3012_v37  ;;  %1204 = vmatprep.subr.bf16.mxu1 %v3017_v39 }
 0x191   :  { %1191 = vmatprep.mubr.bf16.mxu0 %v2944_v0  ;;  %1234 = vmatprep.mubr.bf16.mxu1 %v2944_v0 }
 0x193   :  { %1162 = vmatpush1.bf16.msra.mxu0 %v3021_v40  ;;  %1205 = vmatpush1.bf16.msra.mxu1 %v3028_v42 }
 0x194   :  { %1163 = vmatprep.subr.bf16.mxu0 %v3025_v41  ;;  %1206 = vmatprep.subr.bf16.mxu1 %v3040_v46 }
 0x197   :  { %1164 = vmatpush1.bf16.msra.mxu0 %v3035_v44  ;;  %1207 = vmatpush1.bf16.msra.mxu1 %v3043_v47 }
 0x198   :  { %1165 = vmatprep.subr.bf16.mxu0 %v3037_v45  ;;  %1208 = vmatprep.subr.bf16.mxu1 %v3045_v48 }
 0x19b   :  { %1166 = vmatpush1.bf16.msra.mxu0 %v3050_v49  ;;  %1209 = vmatpush1.bf16.msra.mxu1 %v3057_v51 }
 0x19c   :  { %1167 = vmatprep.subr.bf16.mxu0 %v3053_v50  ;;  %1210 = vmatprep.subr.bf16.mxu1 %v3066_v54 }
 0x19f   :  { %1168 = vmatpush1.bf16.msra.mxu0 %v3063_v53  ;;  %1211 = vmatpush1.bf16.msra.mxu1 %v3072_v56 }
 0x1a0   :  { %1169 = vmatprep.subr.bf16.mxu0 %v3069_v55  ;;  %1212 = vmatprep.subr.bf16.mxu1 %v3074_v57 }
 0x1a3   :  { %1170 = vmatpush1.bf16.msra.mxu0 %v3079_v58  ;;  %1213 = vmatpush1.bf16.msra.mxu1 %v3086_v60 }
 0x1a4   :  { %1171 = vmatprep.subr.bf16.mxu0 %v3083_v59  ;;  %1214 = vmatprep.subr.bf16.mxu1 %v3095_v63 }
 0x1a7   :  { %1172 = vmatpush1.bf16.msra.mxu0 %v3093_v62  ;;  %1215 = vmatpush1.bf16.msra.mxu1 %v3101_v2 }
 0x1a8   :  { %1173 = vmatprep.subr.bf16.mxu0 %v3099_v1  ;;  %1216 = vmatprep.subr.bf16.mxu1 %v3103_v3 }
 0x1ab   :  { %1174 = vmatpush1.bf16.msra.mxu0 %v3109_v4  ;;  %1217 = vmatpush1.bf16.msra.mxu1 %v3113_v5 }
 0x1ac   :  { %1323 = vmatprep.subr.bf16.mxu0 %v3002_v33  ;;  %1366 = vmatprep.subr.bf16.mxu1 %v3004_v34 }
 0x261   :  { %v1029_v19 = vpop.f32.mrb[4].mxu0  ;;  %v1072_v20 = vpop.f32.mrb[4].mxu1 }
 0x262   :  { %v2370_v21 = vadd.f32 %v1029_v19, %v3177_v16  ;;  %v1031_v22 = vpop.f32.mrb[5].mxu0  ;;  %v1074_v23 = vpop.f32.mrb[5].mxu1  ;;  %v2402_v7 = vadd.f32 %v1072_v20, %v3184_v32 }
 0x263   :  { %v2371_v24 = vadd.f32 %v1031_v22, %v3179_v17  ;;  %v1033_v25 = vpop.f32.mrb[6].mxu0  ;;  %v1076_v26 = vpop.f32.mrb[6].mxu1  ;;  %v2403_v10 = vadd.f32 %v1074_v23, %v3187_v6 }
 0x264   :  { %v2233_v27 = vmul.f32 -1.442695, %v2370_v21  ;;  %v2372_v28 = vadd.f32 %v1033_v25, %v3177_v16  ;;  %v1035_v29 = vpop.f32.mrb[7].mxu0  ;;  %v1078_v30 = vpop.f32.mrb[7].mxu1  ;;  %v2404_v8 = vadd.f32 %v1076_v26, %v3184_v32  ;;  %v2235_v11 = vmul.f32 -1.442695, %v2402_v7 }
 0x265   :  { %v2234_v31 = vmul.f32 -1.442695, %v2371_v24  ;;  %v2373_v35 = vadd.f32 %v1035_v29, %v3179_v17  ;;  %v2405_v15 = vadd.f32 %v1078_v30, %v3187_v6 }
 0x266   :  { %2636 = vpow2.f32 %v2233_v27  ;;  %v2236_v43 = vmul.f32 -1.442695, %v2372_v28  ;;  %v2238_v12 = vmul.f32 -1.442695, %v2404_v8 }
 0x267   :  { %v2237_v52 = vmul.f32 -1.442695, %v2373_v35  ;;  %2638 = vpow2.f32 %v2234_v31 }
 0x268   :  { %2640 = vpow2.f32 %v2236_v43 }
 0x269   :  { %2642 = vpow2.f32 %v2237_v52 }
 0x26a   :  { %2644 = vtanh.f32 %v2403_v10 }
 0x26b   :  { %2646 = vpow2.f32 %v2235_v11 }
 0x26c   :  { %2648 = vpow2.f32 %v2238_v12 }
 0x270   :  { %v2637_v13 = vpop.eup %2636 }
 0x271   :  { %v1107_v18 = vadd.f32 1.0, %v2637_v13  ;;  %v2639_v14 = vpop.eup %2638 }
 0x272   :  { %v2641_v19 = vpop.eup %2640  ;;  %v1108_v21 = vadd.f32 1.0, %v2639_v14 }
 0x273   :  { %2650 = vrcp.f32 %v1107_v18  ;;  %v1110_v20 = vadd.f32 1.0, %v2641_v19  ;;  %v2643_v22 = vpop.eup %2642 }
 0x274   :  { %2652 = vtanh.f32 %v2405_v15  ;;  %v1111_v24 = vadd.f32 1.0, %v2643_v22  ;;  %v2645_v23 = vpop.eup %2644 }
 0x275   :  { %2654 = vrcp.f32 %v1108_v21  ;;  %v2647_v25 = vpop.eup %2646 }
 0x276   :  { %2656 = vrcp.f32 %v1110_v20  ;;  %v2649_v26 = vpop.eup %2648  ;;  %v1109_v35 = vadd.f32 1.0, %v2647_v25 }
 0x277   :  { %2658 = vrcp.f32 %v1111_v24  ;;  %v1112_v10 = vadd.f32 1.0, %v2649_v26 }
 0x278   :  { %2660 = vrcp.f32 %v1109_v35 }
 0x27d   :  { %v2651_v27 = vpop.eup %2650 }
 0x27e   :  { %v2653_v28 = vpop.eup %2652  ;;  %v1129_v29 = vmul.f32 %v2651_v27, %v2645_v23 }
 0x27f   :  { %v2655_v30 = vpop.eup %2654 }
 0x280   :  { %v2657_v31 = vpop.eup %2656  ;;  %v1127_v43 = vmul.f32 %v2655_v30, %v3193_v61 }
 0x281   :  { %v1130_v52 = vmul.f32 %v2657_v31, %v2653_v28  ;;  %v2659_v7 = vpop.eup %2658 }
 0x282   :  { %v3245_v8 = vadd.f32 %v1129_v29, %v1127_v43  ;;  %v1128_v11 = vmul.f32 %v2659_v7, %v3196_v9  ;;  %v2661_v13 = vpop.eup %2660 }
 0x284   :  { %2662 = vtanh.f32 %v3245_v8  ;;  %v3249_v12 = vadd.f32 %v1130_v52, %v1128_v11 }
 0x285   :  { %2664 = vrcp.f32 %v1112_v10 }
 0x286   :  { %2666 = vtanh.f32 %v3249_v12 }
 0x28e   :  { %v2663_v15 = vpop.eup %2662 }
 0x28f   :  { %v2665_v18 = vpop.eup %2664  ;;  %v1135_v61 = vmul.f32 %v2663_v15, %v2661_v13 }
 0x290   :  { %v2667_v14 = vpop.eup %2666 }
 0x291   :  { %v1136_v19 = vmul.f32 %v2667_v14, %v2665_v18 }
 0x293   :  { %v1137_v21 = vpack.c.bf16 %v1136_v19, %v1135_v61 }
 0x295   :  { %2359 = vst [vmem:[%s3605_s4 + $0x8] sm:$0xff] %v1137_v21   ;;  %1192 = vmatmul.mubr.bf16.vlgmr.msra.gmra.mrb[8].mxu0 %v1137_v21  ;;  %1235 = vmatmul.mubr.bf16.vlgmr.msra.gmra.mrb[8].mxu1 %v1137_v21 }
 0x296   :  { %1324 = vmatpush1.bf16.msra.mxu0 %v3009_v36  ;;  %1367 = vmatpush1.bf16.msra.mxu1 %v3015_v38 }
 0x297   :  { %1325 = vmatprep.subr.bf16.mxu0 %v3012_v37  ;;  %1368 = vmatprep.subr.bf16.mxu1 %v3017_v39 }
 0x298   :  { %1355 = vmatprep.mubr.bf16.mxu0 %v2944_v0  ;;  %1398 = vmatprep.mubr.bf16.mxu1 %v2944_v0 }
 0x29a   :  { %1326 = vmatpush1.bf16.msra.mxu0 %v3021_v40  ;;  %1369 = vmatpush1.bf16.msra.mxu1 %v3028_v42 }
 0x29b   :  { %1327 = vmatprep.subr.bf16.mxu0 %v3025_v41  ;;  %1370 = vmatprep.subr.bf16.mxu1 %v3040_v46 }
 0x29e   :  { %1328 = vmatpush1.bf16.msra.mxu0 %v3035_v44  ;;  %1371 = vmatpush1.bf16.msra.mxu1 %v3043_v47 }
 0x29f   :  { %1329 = vmatprep.subr.bf16.mxu0 %v3037_v45  ;;  %1372 = vmatprep.subr.bf16.mxu1 %v3045_v48 }
 0x2a2   :  { %1330 = vmatpush1.bf16.msra.mxu0 %v3050_v49  ;;  %1373 = vmatpush1.bf16.msra.mxu1 %v3057_v51 }
 0x2a3   :  { %1331 = vmatprep.subr.bf16.mxu0 %v3053_v50  ;;  %1374 = vmatprep.subr.bf16.mxu1 %v3066_v54 }
 0x2a6   :  { %1332 = vmatpush1.bf16.msra.mxu0 %v3063_v53  ;;  %1375 = vmatpush1.bf16.msra.mxu1 %v3072_v56 }
 0x2a7   :  { %1333 = vmatprep.subr.bf16.mxu0 %v3069_v55  ;;  %1376 = vmatprep.subr.bf16.mxu1 %v3074_v57 }
 0x2aa   :  { %1334 = vmatpush1.bf16.msra.mxu0 %v3079_v58  ;;  %1377 = vmatpush1.bf16.msra.mxu1 %v3086_v60 }
 0x2ab   :  { %1335 = vmatprep.subr.bf16.mxu0 %v3083_v59  ;;  %1378 = vmatprep.subr.bf16.mxu1 %v3095_v63 }
 0x2ae   :  { %1336 = vmatpush1.bf16.msra.mxu0 %v3093_v62  ;;  %1379 = vmatpush1.bf16.msra.mxu1 %v3101_v2 }
 0x2af   :  { %1337 = vmatprep.subr.bf16.mxu0 %v3099_v1  ;;  %1380 = vmatprep.subr.bf16.mxu1 %v3103_v3 }
 0x2b2   :  { %1338 = vmatpush1.bf16.msra.mxu0 %v3109_v4  ;;  %1381 = vmatpush1.bf16.msra.mxu1 %v3113_v5 }
 0x2b3   :  { %1487 = vmatprep.subr.bf16.mxu0 %v3002_v33  ;;  %1530 = vmatprep.subr.bf16.mxu1 %v3004_v34 }
 0x368   :  { %v1193_v9 = vpop.f32.mrb[8].mxu0  ;;  %v1236_v20 = vpop.f32.mrb[8].mxu1 }
 0x369   :  { %v2374_v22 = vadd.f32 %v1193_v9, %v3177_v16  ;;  %v1195_v24 = vpop.f32.mrb[9].mxu0  ;;  %v1238_v23 = vpop.f32.mrb[9].mxu1  ;;  %v2406_v10 = vadd.f32 %v1236_v20, %v3184_v32 }
 0x36a   :  { %v2375_v25 = vadd.f32 %v1195_v24, %v3179_v17  ;;  %v1197_v26 = vpop.f32.mrb[10].mxu0  ;;  %v1240_v27 = vpop.f32.mrb[10].mxu1  ;;  %v2407_v13 = vadd.f32 %v1238_v23, %v3187_v6 }
 0x36b   :  { %v2243_v28 = vmul.f32 -1.442695, %v2374_v22  ;;  %v2376_v29 = vadd.f32 %v1197_v26, %v3177_v16  ;;  %v1199_v30 = vpop.f32.mrb[11].mxu0  ;;  %v1242_v31 = vpop.f32.mrb[11].mxu1  ;;  %v2408_v11 = vadd.f32 %v1240_v27, %v3184_v32  ;;  %v2245_v15 = vmul.f32 -1.442695, %v2406_v10 }
 0x36c   :  { %v2244_v35 = vmul.f32 -1.442695, %v2375_v25  ;;  %v2377_v43 = vadd.f32 %v1199_v30, %v3179_v17  ;;  %v2409_v61 = vadd.f32 %v1242_v31, %v3187_v6 }
 0x36d   :  { %2668 = vpow2.f32 %v2243_v28  ;;  %v2246_v52 = vmul.f32 -1.442695, %v2376_v29  ;;  %v2248_v18 = vmul.f32 -1.442695, %v2408_v11 }
 0x36e   :  { %v2247_v7 = vmul.f32 -1.442695, %v2377_v43  ;;  %2670 = vpow2.f32 %v2244_v35 }
 0x36f   :  { %2672 = vpow2.f32 %v2246_v52 }
 0x370   :  { %2674 = vpow2.f32 %v2247_v7 }
 0x371   :  { %2676 = vtanh.f32 %v2407_v13 }
 0x372   :  { %2678 = vpow2.f32 %v2245_v15 }
 0x373   :  { %2680 = vpow2.f32 %v2248_v18 }
 0x377   :  { %v2669_v14 = vpop.eup %2668 }
 0x378   :  { %v1271_v19 = vadd.f32 1.0, %v2669_v14  ;;  %v2671_v21 = vpop.eup %2670 }
 0x379   :  { %v2673_v9 = vpop.eup %2672  ;;  %v1272_v22 = vadd.f32 1.0, %v2671_v21 }
 0x37a   :  { %2682 = vrcp.f32 %v1271_v19  ;;  %v1274_v20 = vadd.f32 1.0, %v2673_v9  ;;  %v2675_v24 = vpop.eup %2674 }
 0x37b   :  { %2684 = vtanh.f32 %v2409_v61  ;;  %v1275_v25 = vadd.f32 1.0, %v2675_v24  ;;  %v2677_v23 = vpop.eup %2676 }
 0x37c   :  { %2686 = vrcp.f32 %v1272_v22  ;;  %v2679_v26 = vpop.eup %2678 }
 0x37d   :  { %2688 = vrcp.f32 %v1274_v20  ;;  %v2681_v27 = vpop.eup %2680  ;;  %v1273_v43 = vadd.f32 1.0, %v2679_v26 }
 0x37e   :  { %2690 = vrcp.f32 %v1275_v25  ;;  %v1276_v13 = vadd.f32 1.0, %v2681_v27 }
 0x37f   :  { %2692 = vrcp.f32 %v1273_v43 }
 0x384   :  { %v2683_v28 = vpop.eup %2682 }
 0x385   :  { %v2685_v29 = vpop.eup %2684  ;;  %v1293_v30 = vmul.f32 %v2683_v28, %v2677_v23 }
 0x386   :  { %v2687_v31 = vpop.eup %2686 }
 0x387   :  { %v2689_v35 = vpop.eup %2688  ;;  %v1291_v52 = vmul.f32 %v2687_v31, %v3245_v8 }
 0x388   :  { %v1294_v7 = vmul.f32 %v2689_v35, %v2685_v29  ;;  %v2691_v10 = vpop.eup %2690 }
 0x389   :  { %v3298_v11 = vadd.f32 %v1293_v30, %v1291_v52  ;;  %v1292_v15 = vmul.f32 %v2691_v10, %v3249_v12  ;;  %v2693_v14 = vpop.eup %2692 }
 0x38b   :  { %2694 = vtanh.f32 %v3298_v11  ;;  %v3302_v18 = vadd.f32 %v1294_v7, %v1292_v15 }
 0x38c   :  { %2696 = vrcp.f32 %v1276_v13 }
 0x38d   :  { %2698 = vtanh.f32 %v3302_v18 }
 0x395   :  { %v2695_v61 = vpop.eup %2694 }
 0x396   :  { %v2697_v19 = vpop.eup %2696  ;;  %v1299_v8 = vmul.f32 %v2695_v61, %v2693_v14 }
 0x397   :  { %v2699_v21 = vpop.eup %2698 }
 0x398   :  { %v1300_v9 = vmul.f32 %v2699_v21, %v2697_v19 }
 0x39a   :  { %v1301_v22 = vpack.c.bf16 %v1300_v9, %v1299_v8 }
 0x39c   :  { %2360 = vst [vmem:[%s3605_s4 + $0x10] sm:$0xff] %v1301_v22   ;;  %1356 = vmatmul.mubr.bf16.vlgmr.msra.gmra.mrb[12].mxu0 %v1301_v22  ;;  %1399 = vmatmul.mubr.bf16.vlgmr.msra.gmra.mrb[12].mxu1 %v1301_v22 }
 0x39d   :  { %1488 = vmatpush1.bf16.msra.mxu0 %v3009_v36  ;;  %1531 = vmatpush1.bf16.msra.mxu1 %v3015_v38 }
 0x39e   :  { %1489 = vmatprep.subr.bf16.mxu0 %v3012_v37  ;;  %1532 = vmatprep.subr.bf16.mxu1 %v3017_v39 }
 0x39f   :  { %1519 = vmatprep.mubr.bf16.mxu0 %v2944_v0  ;;  %1562 = vmatprep.mubr.bf16.mxu1 %v2944_v0 }
 0x3a1   :  { %1490 = vmatpush1.bf16.msra.mxu0 %v3021_v40  ;;  %1533 = vmatpush1.bf16.msra.mxu1 %v3028_v42 }
 0x3a2   :  { %1491 = vmatprep.subr.bf16.mxu0 %v3025_v41  ;;  %1534 = vmatprep.subr.bf16.mxu1 %v3040_v46 }
 0x3a5   :  { %1492 = vmatpush1.bf16.msra.mxu0 %v3035_v44  ;;  %1535 = vmatpush1.bf16.msra.mxu1 %v3043_v47 }
 0x3a6   :  { %1493 = vmatprep.subr.bf16.mxu0 %v3037_v45  ;;  %1536 = vmatprep.subr.bf16.mxu1 %v3045_v48 }
 0x3a9   :  { %1494 = vmatpush1.bf16.msra.mxu0 %v3050_v49  ;;  %1537 = vmatpush1.bf16.msra.mxu1 %v3057_v51 }
 0x3aa   :  { %1495 = vmatprep.subr.bf16.mxu0 %v3053_v50  ;;  %1538 = vmatprep.subr.bf16.mxu1 %v3066_v54 }
 0x3ad   :  { %1496 = vmatpush1.bf16.msra.mxu0 %v3063_v53  ;;  %1539 = vmatpush1.bf16.msra.mxu1 %v3072_v56 }
 0x3ae   :  { %1497 = vmatprep.subr.bf16.mxu0 %v3069_v55  ;;  %1540 = vmatprep.subr.bf16.mxu1 %v3074_v57 }
 0x3b1   :  { %1498 = vmatpush1.bf16.msra.mxu0 %v3079_v58  ;;  %1541 = vmatpush1.bf16.msra.mxu1 %v3086_v60 }
 0x3b2   :  { %1499 = vmatprep.subr.bf16.mxu0 %v3083_v59  ;;  %1542 = vmatprep.subr.bf16.mxu1 %v3095_v63 }
 0x3b5   :  { %1500 = vmatpush1.bf16.msra.mxu0 %v3093_v62  ;;  %1543 = vmatpush1.bf16.msra.mxu1 %v3101_v2 }
 0x3b6   :  { %1501 = vmatprep.subr.bf16.mxu0 %v3099_v1  ;;  %1544 = vmatprep.subr.bf16.mxu1 %v3103_v3 }
 0x3b9   :  { %1502 = vmatpush1.bf16.msra.mxu0 %v3109_v4  ;;  %1545 = vmatpush1.bf16.msra.mxu1 %v3113_v5 }
 0x3ba   :  { %1651 = vmatprep.subr.bf16.mxu0 %v3002_v33  ;;  %1694 = vmatprep.subr.bf16.mxu1 %v3004_v34 }
 0x46f   :  { %v1357_v36 = vpop.f32.mrb[12].mxu0  ;;  %v1400_v37 = vpop.f32.mrb[12].mxu1 }
 0x470   :  { %v2378_v38 = vadd.f32 %v1357_v36, %v3177_v16  ;;  %v1359_v39 = vpop.f32.mrb[13].mxu0  ;;  %v1402_v40 = vpop.f32.mrb[13].mxu1  ;;  %v2410_v51 = vadd.f32 %v1400_v37, %v3184_v32 }
 0x471   :  { %v2379_v41 = vadd.f32 %v1359_v39, %v3179_v17  ;;  %v1361_v42 = vpop.f32.mrb[14].mxu0  ;;  %v1404_v44 = vpop.f32.mrb[14].mxu1  ;;  %v2411_v54 = vadd.f32 %v1402_v40, %v3187_v6  ;;  %v3364_v40 = vld [vmem:[#allocation6 + $0x8] ss:$16 sps:$4 sm:$0xff]  }
 0x472   :  { %v2253_v45 = vmul.f32 -1.442695, %v2378_v38  ;;  %v2380_v46 = vadd.f32 %v1361_v42, %v3177_v16  ;;  %v1363_v47 = vpop.f32.mrb[15].mxu0  ;;  %v1406_v48 = vpop.f32.mrb[15].mxu1  ;;  %v2412_v53 = vadd.f32 %v1404_v44, %v3184_v32  ;;  %v2255_v55 = vmul.f32 -1.442695, %v2410_v51 }
 0x473   :  { %v2254_v49 = vmul.f32 -1.442695, %v2379_v41  ;;  %v2381_v33 = vadd.f32 %v1363_v47, %v3179_v17  ;;  %v2413_v58 = vadd.f32 %v1406_v48, %v3187_v6  ;;  %v3367_v41 = vld [vmem:[#allocation6 + $0x24] ss:$16 sps:$4 sm:$0xff]   ;;  %v3370_v42 = vld [vmem:[#allocation6 + $0x2c] ss:$16 sps:$4 sm:$0xff]  }
 0x474   :  { %2700 = vpow2.f32 %v2253_v45  ;;  %v2256_v34 = vmul.f32 -1.442695, %v2380_v46  ;;  %v2258_v56 = vmul.f32 -1.442695, %v2412_v53  ;;  %v3375_v44 = vld [vmem:[#allocation6 + $0x20] ss:$16 sps:$4 sm:$0xff]  }
 0x475   :  { %v2257_v50 = vmul.f32 -1.442695, %v2381_v33  ;;  %2702 = vpow2.f32 %v2254_v49  ;;  %v3378_v45 = vld [vmem:[#allocation6 + $0x28] ss:$16 sps:$4 sm:$0xff]   ;;  %v3381_v46 = vld [vmem:[#allocation6 + $0x44] ss:$16 sps:$4 sm:$0xff]  }
 0x476   :  { %2704 = vpow2.f32 %v2256_v34  ;;  %v3384_v47 = vld [vmem:[#allocation6 + $0x4c] ss:$16 sps:$4 sm:$0xff]   ;;  %v3387_v48 = vld [vmem:[#allocation6 + $0x40] ss:$16 sps:$4 sm:$0xff]   ;;  %v3390_v49 = vld [vmem:[#allocation6 + $0x48] ss:$16 sps:$4 sm:$0xff]  }
 0x477   :  { %2706 = vpow2.f32 %v2257_v50  ;;  %v3393_v33 = vld [vmem:[#allocation6 + $0x64] ss:$16 sps:$4 sm:$0xff]   ;;  %v3396_v34 = vld [vmem:[#allocation6 + $0x6c] ss:$16 sps:$4 sm:$0xff]   ;;  %v3399_v50 = vld [vmem:[#allocation6 + $0x60] ss:$16 sps:$4 sm:$0xff]  }
 0x478   :  { %2708 = vtanh.f32 %v2411_v54  ;;  %v3402_v51 = vld [vmem:[#allocation6 + $0x68] ss:$16 sps:$4 sm:$0xff]   ;;  %v3405_v53 = vld [vmem:[#allocation6 + $0x84] ss:$16 sps:$4 sm:$0xff]   ;;  %v3408_v54 = vld [vmem:[#allocation6 + $0x8c] ss:$16 sps:$4 sm:$0xff]  }
 0x479   :  { %2710 = vpow2.f32 %v2255_v55  ;;  %v3411_v55 = vld [vmem:[#allocation6 + $0x80] ss:$16 sps:$4 sm:$0xff]  }
 0x47a   :  { %2712 = vpow2.f32 %v2258_v56  ;;  %v3414_v56 = vld [vmem:[#allocation6 + $0x88] ss:$16 sps:$4 sm:$0xff]  }
 0x47e   :  { %v2701_v57 = vpop.eup %2700 }
 0x47f   :  { %v1435_v12 = vadd.f32 1.0, %v2701_v57  ;;  %v2703_v20 = vpop.eup %2702  ;;  %v3417_v57 = vld [vmem:[#allocation6 + $0xa4] ss:$16 sps:$4 sm:$0xff]  }
 0x480   :  { %v2705_v24 = vpop.eup %2704  ;;  %v1436_v25 = vadd.f32 1.0, %v2703_v20  ;;  %v3435_v20 = vld [vmem:[#allocation6 + $0x4] ss:$16 sps:$4 sm:$0xff]  }
 0x481   :  { %2714 = vrcp.f32 %v1435_v12  ;;  %v1438_v23 = vadd.f32 1.0, %v2705_v24  ;;  %v2707_v26 = vpop.eup %2706  ;;  %v3423_v12 = vld [vmem:[#allocation6 + $0xa0] ss:$16 sps:$4 sm:$0xff]  }
 0x482   :  { %2716 = vtanh.f32 %v2413_v58  ;;  %v1439_v27 = vadd.f32 1.0, %v2707_v26  ;;  %v2709_v28 = vpop.eup %2708  ;;  %v3420_v58 = vld [vmem:[#allocation6 + $0xac] ss:$16 sps:$4 sm:$0xff]  }
 0x483   :  { %2718 = vrcp.f32 %v1436_v25  ;;  %v2711_v29 = vpop.eup %2710 }
 0x484   :  { %2720 = vrcp.f32 %v1438_v23  ;;  %v2713_v30 = vpop.eup %2712  ;;  %v1437_v10 = vadd.f32 1.0, %v2711_v29 }
 0x485   :  { %2722 = vrcp.f32 %v1439_v27  ;;  %v1440_v19 = vadd.f32 1.0, %v2713_v30 }
 0x486   :  { %2724 = vrcp.f32 %v1437_v10 }
 0x48b   :  { %v2715_v31 = vpop.eup %2714 }
 0x48c   :  { %v2717_v35 = vpop.eup %2716  ;;  %v1457_v43 = vmul.f32 %v2715_v31, %v2709_v28 }
 0x48d   :  { %v2719_v52 = vpop.eup %2718 }
 0x48e   :  { %v2721_v7 = vpop.eup %2720  ;;  %v1455_v13 = vmul.f32 %v2719_v52, %v3298_v11 }
 0x48f   :  { %v1458_v15 = vmul.f32 %v2721_v7, %v2717_v35  ;;  %v2723_v14 = vpop.eup %2722 }
 0x490   :  { %v3351_v61 = vadd.f32 %v1457_v43, %v1455_v13  ;;  %v1456_v21 = vmul.f32 %v2723_v14, %v3302_v18  ;;  %v2725_v9 = vpop.eup %2724  ;;  %v3361_v18 = vld [vmem:[#allocation6] ss:$16 sps:$4 sm:$0xff]  }
 0x492   :  { %2726 = vtanh.f32 %v3351_v61  ;;  %v3355_v8 = vadd.f32 %v1458_v15, %v1456_v21 }
 0x493   :  { %2728 = vrcp.f32 %v1440_v19 }
 0x494   :  { %2730 = vtanh.f32 %v3355_v8 }
 0x49c   :  { %v2727_v22 = vpop.eup %2726 }
 0x49d   :  { %v2729_v36 = vpop.eup %2728  ;;  %v1463_v11 = vmul.f32 %v2727_v22, %v2725_v9 }
 0x49e   :  { %v2731_v37 = vpop.eup %2730 }
 0x49f   :  { %v1464_v38 = vmul.f32 %v2731_v37, %v2729_v36 }
 0x4a1   :  { %v1465_v39 = vpack.c.bf16 %v1464_v38, %v1463_v11 }
 0x4a3   :  { %2361 = vst [vmem:[%s3605_s4 + $0x18] sm:$0xff] %v1465_v39   ;;  %1520 = vmatmul.mubr.bf16.vlgmr.msra.gmra.mrb[16].mxu0 %v1465_v39  ;;  %1563 = vmatmul.mubr.bf16.vlgmr.msra.gmra.mrb[16].mxu1 %v1465_v39 }
 0x4a4   :  { %1652 = vmatpush1.bf16.msra.mxu0 %v3361_v18  ;;  %1695 = vmatpush1.bf16.msra.mxu1 %v3364_v40 }
 0x4a5   :  { %1653 = vmatprep.subr.bf16.mxu0 %v3367_v41  ;;  %1696 = vmatprep.subr.bf16.mxu1 %v3370_v42 }
 0x4a6   :  { %1683 = vmatprep.mubr.bf16.mxu0 %v2944_v0  ;;  %1726 = vmatprep.mubr.bf16.mxu1 %v2944_v0 }
 0x4a8   :  { %1654 = vmatpush1.bf16.msra.mxu0 %v3375_v44  ;;  %1697 = vmatpush1.bf16.msra.mxu1 %v3378_v45 }
 0x4a9   :  { %1655 = vmatprep.subr.bf16.mxu0 %v3381_v46  ;;  %1698 = vmatprep.subr.bf16.mxu1 %v3384_v47 }
 0x4ac   :  { %1656 = vmatpush1.bf16.msra.mxu0 %v3387_v48  ;;  %1699 = vmatpush1.bf16.msra.mxu1 %v3390_v49 }
 0x4ad   :  { %1657 = vmatprep.subr.bf16.mxu0 %v3393_v33  ;;  %1700 = vmatprep.subr.bf16.mxu1 %v3396_v34 }
 0x4b0   :  { %1658 = vmatpush1.bf16.msra.mxu0 %v3399_v50  ;;  %1701 = vmatpush1.bf16.msra.mxu1 %v3402_v51 }
 0x4b1   :  { %1659 = vmatprep.subr.bf16.mxu0 %v3405_v53  ;;  %1702 = vmatprep.subr.bf16.mxu1 %v3408_v54 }
 0x4b4   :  { %1660 = vmatpush1.bf16.msra.mxu0 %v3411_v55  ;;  %1703 = vmatpush1.bf16.msra.mxu1 %v3414_v56 }
 0x4b5   :  { %1661 = vmatprep.subr.bf16.mxu0 %v3417_v57  ;;  %1704 = vmatprep.subr.bf16.mxu1 %v3420_v58 }
 0x4b8   :  { %1662 = vmatpush1.bf16.msra.mxu0 %v3423_v12  ;;  %1705 = vmatpush1.bf16.msra.mxu1 %v3086_v60  ;;  %v3438_v60 = vld [vmem:[#allocation6 + $0xc] ss:$16 sps:$4 sm:$0xff]  }
 0x4b9   :  { %1663 = vmatprep.subr.bf16.mxu0 %v3083_v59  ;;  %1706 = vmatprep.subr.bf16.mxu1 %v3095_v63 }
 0x4bc   :  { %1664 = vmatpush1.bf16.msra.mxu0 %v3093_v62  ;;  %1707 = vmatpush1.bf16.msra.mxu1 %v3101_v2 }
 0x4bd   :  { %1665 = vmatprep.subr.bf16.mxu0 %v3099_v1  ;;  %1708 = vmatprep.subr.bf16.mxu1 %v3103_v3 }
 0x4c0   :  { %1666 = vmatpush1.bf16.msra.mxu0 %v3109_v4  ;;  %1709 = vmatpush1.bf16.msra.mxu1 %v3113_v5 }
 0x4c1   :  { %1815 = vmatprep.subr.bf16.mxu0 %v3435_v20  ;;  %1858 = vmatprep.subr.bf16.mxu1 %v3438_v60 }
 0x576   :  { %v1521_v59 = vpop.f32.mrb[16].mxu0  ;;  %v1564_v62 = vpop.f32.mrb[16].mxu1 }
 0x577   :  { %v2382_v63 = vadd.f32 %v1521_v59, %v3177_v16  ;;  %v1523_v2 = vpop.f32.mrb[17].mxu0  ;;  %v1566_v1 = vpop.f32.mrb[17].mxu1  ;;  %v2414_v31 = vadd.f32 %v1564_v62, %v3184_v32 }
 0x578   :  { %v2383_v3 = vadd.f32 %v1523_v2, %v3179_v17  ;;  %v1525_v24 = vpop.f32.mrb[18].mxu0  ;;  %v1568_v4 = vpop.f32.mrb[18].mxu1  ;;  %v2415_v43 = vadd.f32 %v1566_v1, %v3187_v6 }
 0x579   :  { %v2263_v25 = vmul.f32 -1.442695, %v2382_v63  ;;  %v2384_v5 = vadd.f32 %v1525_v24, %v3177_v16  ;;  %v1527_v23 = vpop.f32.mrb[19].mxu0  ;;  %v1570_v26 = vpop.f32.mrb[19].mxu1  ;;  %v2416_v35 = vadd.f32 %v1568_v4, %v3184_v32  ;;  %v2265_v52 = vmul.f32 -1.442695, %v2414_v31 }
 0x57a   :  { %v2264_v27 = vmul.f32 -1.442695, %v2383_v3  ;;  %v2385_v28 = vadd.f32 %v1527_v23, %v3179_v17  ;;  %v2417_v13 = vadd.f32 %v1570_v26, %v3187_v6 }
 0x57b   :  { %2732 = vpow2.f32 %v2263_v25  ;;  %v2266_v29 = vmul.f32 -1.442695, %v2384_v5  ;;  %v2268_v7 = vmul.f32 -1.442695, %v2416_v35 }
 0x57c   :  { %v2267_v30 = vmul.f32 -1.442695, %v2385_v28  ;;  %2734 = vpow2.f32 %v2264_v27 }
 0x57d   :  { %2736 = vpow2.f32 %v2266_v29 }
 0x57e   :  { %2738 = vpow2.f32 %v2267_v30 }
 0x57f   :  { %2740 = vtanh.f32 %v2415_v43  ;;  %v3486_v43 = vld [vmem:[#allocation6 + $0xc4] ss:$16 sps:$4 sm:$0xff]  }
 0x580   :  { %2742 = vpow2.f32 %v2265_v52  ;;  %v3489_v52 = vld [vmem:[#allocation6 + $0xcc] ss:$16 sps:$4 sm:$0xff]  }
 0x581   :  { %2744 = vpow2.f32 %v2268_v7  ;;  %v3492_v7 = vld [vmem:[#allocation6 + $0xc0] ss:$16 sps:$4 sm:$0xff]  }
 0x585   :  { %v2733_v10 = vpop.eup %2732 }
 0x586   :  { %v1599_v15 = vadd.f32 1.0, %v2733_v10  ;;  %v2735_v14 = vpop.eup %2734  ;;  %v3495_v10 = vld [vmem:[#allocation6 + $0xc8] ss:$16 sps:$4 sm:$0xff]  }
 0x587   :  { %v2737_v19 = vpop.eup %2736  ;;  %v1600_v21 = vadd.f32 1.0, %v2735_v14  ;;  %v3504_v14 = vld [vmem:[#allocation6 + $0xe0] ss:$16 sps:$4 sm:$0xff]  }
 0x588   :  { %2746 = vrcp.f32 %v1599_v15  ;;  %v1602_v9 = vadd.f32 1.0, %v2737_v19  ;;  %v2739_v22 = vpop.eup %2738  ;;  %v3501_v15 = vld [vmem:[#allocation6 + $0xec] ss:$16 sps:$4 sm:$0xff]   ;;  %v3507_v19 = vld [vmem:[#allocation6 + $0xe8] ss:$16 sps:$4 sm:$0xff]  }
 0x589   :  { %2748 = vtanh.f32 %v2417_v13  ;;  %v1603_v36 = vadd.f32 1.0, %v2739_v22  ;;  %v2741_v37 = vpop.eup %2740  ;;  %v3498_v13 = vld [vmem:[#allocation6 + $0xe4] ss:$16 sps:$4 sm:$0xff]  }
 0x58a   :  { %2750 = vrcp.f32 %v1600_v21  ;;  %v2743_v11 = vpop.eup %2742 }
 0x58b   :  { %2752 = vrcp.f32 %v1602_v9  ;;  %v2745_v38 = vpop.eup %2744  ;;  %v1601_v1 = vadd.f32 1.0, %v2743_v11 }
 0x58c   :  { %2754 = vrcp.f32 %v1603_v36  ;;  %v1604_v5 = vadd.f32 1.0, %v2745_v38 }
 0x58d   :  { %2756 = vrcp.f32 %v1601_v1 }
 0x592   :  { %v2747_v39 = vpop.eup %2746 }
 0x593   :  { %v2749_v59 = vpop.eup %2748  ;;  %v1621_v62 = vmul.f32 %v2747_v39, %v2741_v37 }
 0x594   :  { %v2751_v63 = vpop.eup %2750 }
 0x595   :  { %v2753_v2 = vpop.eup %2752  ;;  %v1619_v3 = vmul.f32 %v2751_v63, %v3351_v61 }
 0x596   :  { %v1622_v24 = vmul.f32 %v2753_v2, %v2749_v59  ;;  %v2755_v4 = vpop.eup %2754 }
 0x597   :  { %v3450_v25 = vadd.f32 %v1621_v62, %v1619_v3  ;;  %v1620_v23 = vmul.f32 %v2755_v4, %v3355_v8  ;;  %v2757_v27 = vpop.eup %2756  ;;  %v3483_v8 = vld [vmem:[#allocation6 + $0xa8] ss:$16 sps:$4 sm:$0xff]  }
 0x599   :  { %2758 = vtanh.f32 %v3450_v25  ;;  %v3454_v26 = vadd.f32 %v1622_v24, %v1620_v23 }
 0x59a   :  { %2760 = vrcp.f32 %v1604_v5 }
 0x59b   :  { %2762 = vtanh.f32 %v3454_v26 }
 0x5a3   :  { %v2759_v28 = vpop.eup %2758 }
 0x5a4   :  { %v2761_v29 = vpop.eup %2760  ;;  %v1627_v61 = vmul.f32 %v2759_v28, %v2757_v27 }
 0x5a5   :  { %v2763_v30 = vpop.eup %2762 }
 0x5a6   :  { %v1628_v31 = vmul.f32 %v2763_v30, %v2761_v29 }
 0x5a8   :  { %v1629_v35 = vpack.c.bf16 %v1628_v31, %v1627_v61 }
 0x5aa   :  { %2362 = vst [vmem:[%s3605_s4 + $0x20] sm:$0xff] %v1629_v35   ;;  %1684 = vmatmul.mubr.bf16.vlgmr.msra.gmra.mrb[20].mxu0 %v1629_v35  ;;  %1727 = vmatmul.mubr.bf16.vlgmr.msra.gmra.mrb[20].mxu1 %v1629_v35 }
 0x5ab   :  { %1816 = vmatpush1.bf16.msra.mxu0 %v3361_v18  ;;  %1859 = vmatpush1.bf16.msra.mxu1 %v3364_v40 }
 0x5ac   :  { %1817 = vmatprep.subr.bf16.mxu0 %v3367_v41  ;;  %1860 = vmatprep.subr.bf16.mxu1 %v3370_v42 }
 0x5ad   :  { %1847 = vmatprep.mubr.bf16.mxu0 %v2944_v0  ;;  %1890 = vmatprep.mubr.bf16.mxu1 %v2944_v0 }
 0x5af   :  { %1818 = vmatpush1.bf16.msra.mxu0 %v3375_v44  ;;  %1861 = vmatpush1.bf16.msra.mxu1 %v3378_v45 }
 0x5b0   :  { %1819 = vmatprep.subr.bf16.mxu0 %v3381_v46  ;;  %1862 = vmatprep.subr.bf16.mxu1 %v3384_v47 }
 0x5b3   :  { %1820 = vmatpush1.bf16.msra.mxu0 %v3387_v48  ;;  %1863 = vmatpush1.bf16.msra.mxu1 %v3390_v49 }
 0x5b4   :  { %1821 = vmatprep.subr.bf16.mxu0 %v3393_v33  ;;  %1864 = vmatprep.subr.bf16.mxu1 %v3396_v34 }
 0x5b7   :  { %1822 = vmatpush1.bf16.msra.mxu0 %v3399_v50  ;;  %1865 = vmatpush1.bf16.msra.mxu1 %v3402_v51 }
 0x5b8   :  { %1823 = vmatprep.subr.bf16.mxu0 %v3405_v53  ;;  %1866 = vmatprep.subr.bf16.mxu1 %v3408_v54 }
 0x5bb   :  { %1824 = vmatpush1.bf16.msra.mxu0 %v3411_v55  ;;  %1867 = vmatpush1.bf16.msra.mxu1 %v3414_v56 }
 0x5bc   :  { %1825 = vmatprep.subr.bf16.mxu0 %v3417_v57  ;;  %1868 = vmatprep.subr.bf16.mxu1 %v3420_v58 }
 0x5bf   :  { %1826 = vmatpush1.bf16.msra.mxu0 %v3423_v12  ;;  %1869 = vmatpush1.bf16.msra.mxu1 %v3483_v8 }
 0x5c0   :  { %1827 = vmatprep.subr.bf16.mxu0 %v3486_v43  ;;  %1870 = vmatprep.subr.bf16.mxu1 %v3489_v52 }
 0x5c3   :  { %1828 = vmatpush1.bf16.msra.mxu0 %v3492_v7  ;;  %1871 = vmatpush1.bf16.msra.mxu1 %v3495_v10 }
 0x5c4   :  { %1829 = vmatprep.subr.bf16.mxu0 %v3498_v13  ;;  %1872 = vmatprep.subr.bf16.mxu1 %v3501_v15 }
 0x5c7   :  { %1830 = vmatpush1.bf16.msra.mxu0 %v3504_v14  ;;  %1873 = vmatpush1.bf16.msra.mxu1 %v3507_v19 }
 0x5c8   :  { %1979 = vmatprep.subr.bf16.mxu0 %v3435_v20  ;;  %2022 = vmatprep.subr.bf16.mxu1 %v3438_v60 }
 0x67d   :  { %v1685_v21 = vpop.f32.mrb[20].mxu0  ;;  %v1728_v9 = vpop.f32.mrb[20].mxu1 }
 0x67e   :  { %v2386_v22 = vadd.f32 %v1685_v21, %v3177_v16  ;;  %v1687_v36 = vpop.f32.mrb[21].mxu0  ;;  %v1730_v37 = vpop.f32.mrb[21].mxu1  ;;  %v2418_v24 = vadd.f32 %v1728_v9, %v3184_v32 }
 0x67f   :  { %v2387_v11 = vadd.f32 %v1687_v36, %v3179_v17  ;;  %v1689_v38 = vpop.f32.mrb[22].mxu0  ;;  %v1732_v39 = vpop.f32.mrb[22].mxu1  ;;  %v2419_v5 = vadd.f32 %v1730_v37, %v3187_v6 }
 0x680   :  { %v2273_v59 = vmul.f32 -1.442695, %v2386_v22  ;;  %v2388_v62 = vadd.f32 %v1689_v38, %v3177_v16  ;;  %v1691_v63 = vpop.f32.mrb[23].mxu0  ;;  %v1734_v2 = vpop.f32.mrb[23].mxu1  ;;  %v2420_v4 = vadd.f32 %v1732_v39, %v3184_v32  ;;  %v2275_v23 = vmul.f32 -1.442695, %v2418_v24 }
 0x681   :  { %v2274_v1 = vmul.f32 -1.442695, %v2387_v11  ;;  %v2389_v20 = vadd.f32 %v1691_v63, %v3179_v17  ;;  %v2421_v29 = vadd.f32 %v1734_v2, %v3187_v6 }
 0x682   :  { %2764 = vpow2.f32 %v2273_v59  ;;  %v2276_v60 = vmul.f32 -1.442695, %v2388_v62  ;;  %v2278_v27 = vmul.f32 -1.442695, %v2420_v4 }
 0x683   :  { %v2277_v3 = vmul.f32 -1.442695, %v2389_v20  ;;  %2766 = vpow2.f32 %v2274_v1 }
 0x684   :  { %2768 = vpow2.f32 %v2276_v60 }
 0x685   :  { %2770 = vpow2.f32 %v2277_v3 }
 0x686   :  { %2772 = vtanh.f32 %v2419_v5 }
 0x687   :  { %2774 = vpow2.f32 %v2275_v23 }
 0x688   :  { %2776 = vpow2.f32 %v2278_v27 }
 0x68c   :  { %v2765_v28 = vpop.eup %2764 }
 0x68d   :  { %v1763_v30 = vadd.f32 1.0, %v2765_v28  ;;  %v2767_v61 = vpop.eup %2766 }
 0x68e   :  { %v2769_v31 = vpop.eup %2768  ;;  %v1764_v35 = vadd.f32 1.0, %v2767_v61 }
 0x68f   :  { %2778 = vrcp.f32 %v1763_v30  ;;  %v1766_v21 = vadd.f32 1.0, %v2769_v31  ;;  %v2771_v9 = vpop.eup %2770 }
 0x690   :  { %2780 = vtanh.f32 %v2421_v29  ;;  %v1767_v22 = vadd.f32 1.0, %v2771_v9  ;;  %v2773_v36 = vpop.eup %2772 }
 0x691   :  { %2782 = vrcp.f32 %v1764_v35  ;;  %v2775_v37 = vpop.eup %2774 }
 0x692   :  { %2784 = vrcp.f32 %v1766_v21  ;;  %v2777_v11 = vpop.eup %2776  ;;  %v1765_v2 = vadd.f32 1.0, %v2775_v37 }
 0x693   :  { %2786 = vrcp.f32 %v1767_v22  ;;  %v1768_v24 = vadd.f32 1.0, %v2777_v11 }
 0x694   :  { %2788 = vrcp.f32 %v1765_v2 }
 0x699   :  { %v2779_v38 = vpop.eup %2778 }
 0x69a   :  { %v2781_v39 = vpop.eup %2780  ;;  %v1785_v59 = vmul.f32 %v2779_v38, %v2773_v36 }
 0x69b   :  { %v2783_v62 = vpop.eup %2782 }
 0x69c   :  { %v2785_v63 = vpop.eup %2784  ;;  %v1783_v1 = vmul.f32 %v2783_v62, %v3450_v25 }
 0x69d   :  { %v1786_v20 = vmul.f32 %v2785_v63, %v2781_v39  ;;  %v2787_v60 = vpop.eup %2786 }
 0x69e   :  { %v3521_v3 = vadd.f32 %v1785_v59, %v1783_v1  ;;  %v1784_v4 = vmul.f32 %v2787_v60, %v3454_v26  ;;  %v2789_v23 = vpop.eup %2788 }
 0x6a0   :  { %2790 = vtanh.f32 %v3521_v3  ;;  %v3525_v5 = vadd.f32 %v1786_v20, %v1784_v4 }
 0x6a1   :  { %2792 = vrcp.f32 %v1768_v24 }
 0x6a2   :  { %2794 = vtanh.f32 %v3525_v5 }
 0x6aa   :  { %v2791_v27 = vpop.eup %2790 }
 0x6ab   :  { %v2793_v28 = vpop.eup %2792  ;;  %v1791_v25 = vmul.f32 %v2791_v27, %v2789_v23 }
 0x6ac   :  { %v2795_v29 = vpop.eup %2794 }
 0x6ad   :  { %v1792_v30 = vmul.f32 %v2795_v29, %v2793_v28 }
 0x6af   :  { %v1793_v61 = vpack.c.bf16 %v1792_v30, %v1791_v25 }
 0x6b1   :  { %2363 = vst [vmem:[%s3605_s4 + $0x28] sm:$0xff] %v1793_v61   ;;  %1848 = vmatmul.mubr.bf16.vlgmr.msra.gmra.mrb[24].mxu0 %v1793_v61  ;;  %1891 = vmatmul.mubr.bf16.vlgmr.msra.gmra.mrb[24].mxu1 %v1793_v61 }
 0x6b2   :  { %1980 = vmatpush1.bf16.msra.mxu0 %v3361_v18  ;;  %2023 = vmatpush1.bf16.msra.mxu1 %v3364_v40 }
 0x6b3   :  { %1981 = vmatprep.subr.bf16.mxu0 %v3367_v41  ;;  %2024 = vmatprep.subr.bf16.mxu1 %v3370_v42 }
 0x6b4   :  { %2011 = vmatprep.mubr.bf16.mxu0 %v2944_v0  ;;  %2054 = vmatprep.mubr.bf16.mxu1 %v2944_v0 }
 0x6b6   :  { %1982 = vmatpush1.bf16.msra.mxu0 %v3375_v44  ;;  %2025 = vmatpush1.bf16.msra.mxu1 %v3378_v45 }
 0x6b7   :  { %1983 = vmatprep.subr.bf16.mxu0 %v3381_v46  ;;  %2026 = vmatprep.subr.bf16.mxu1 %v3384_v47 }
 0x6ba   :  { %1984 = vmatpush1.bf16.msra.mxu0 %v3387_v48  ;;  %2027 = vmatpush1.bf16.msra.mxu1 %v3390_v49 }
 0x6bb   :  { %1985 = vmatprep.subr.bf16.mxu0 %v3393_v33  ;;  %2028 = vmatprep.subr.bf16.mxu1 %v3396_v34 }
 0x6be   :  { %1986 = vmatpush1.bf16.msra.mxu0 %v3399_v50  ;;  %2029 = vmatpush1.bf16.msra.mxu1 %v3402_v51 }
 0x6bf   :  { %1987 = vmatprep.subr.bf16.mxu0 %v3405_v53  ;;  %2030 = vmatprep.subr.bf16.mxu1 %v3408_v54 }
 0x6c2   :  { %1988 = vmatpush1.bf16.msra.mxu0 %v3411_v55  ;;  %2031 = vmatpush1.bf16.msra.mxu1 %v3414_v56 }
 0x6c3   :  { %1989 = vmatprep.subr.bf16.mxu0 %v3417_v57  ;;  %2032 = vmatprep.subr.bf16.mxu1 %v3420_v58 }
 0x6c6   :  { %1990 = vmatpush1.bf16.msra.mxu0 %v3423_v12  ;;  %2033 = vmatpush1.bf16.msra.mxu1 %v3483_v8 }
 0x6c7   :  { %1991 = vmatprep.subr.bf16.mxu0 %v3486_v43  ;;  %2034 = vmatprep.subr.bf16.mxu1 %v3489_v52 }
 0x6ca   :  { %1992 = vmatpush1.bf16.msra.mxu0 %v3492_v7  ;;  %2035 = vmatpush1.bf16.msra.mxu1 %v3495_v10 }
 0x6cb   :  { %1993 = vmatprep.subr.bf16.mxu0 %v3498_v13  ;;  %2036 = vmatprep.subr.bf16.mxu1 %v3501_v15 }
 0x6ce   :  { %1994 = vmatpush1.bf16.msra.mxu0 %v3504_v14  ;;  %2037 = vmatpush1.bf16.msra.mxu1 %v3507_v19 }
 0x784   :  { %v1849_v0 = vpop.f32.mrb[24].mxu0  ;;  %v1892_v18 = vpop.f32.mrb[24].mxu1 }
 0x785   :  { %v2390_v40 = vadd.f32 %v1849_v0, %v3177_v16  ;;  %v1851_v41 = vpop.f32.mrb[25].mxu0  ;;  %v1894_v42 = vpop.f32.mrb[25].mxu1  ;;  %v2422_v54 = vadd.f32 %v1892_v18, %v3184_v32 }
 0x786   :  { %v2391_v44 = vadd.f32 %v1851_v41, %v3179_v17  ;;  %v1853_v45 = vpop.f32.mrb[26].mxu0  ;;  %v1896_v46 = vpop.f32.mrb[26].mxu1  ;;  %v2423_v56 = vadd.f32 %v1894_v42, %v3187_v6 }
 0x787   :  { %v2283_v47 = vmul.f32 -1.442695, %v2390_v40  ;;  %v2392_v48 = vadd.f32 %v1853_v45, %v3177_v16  ;;  %v1855_v49 = vpop.f32.mrb[27].mxu0  ;;  %v1898_v33 = vpop.f32.mrb[27].mxu1  ;;  %v2424_v55 = vadd.f32 %v1896_v46, %v3184_v32  ;;  %v2285_v57 = vmul.f32 -1.442695, %v2422_v54 }
 0x788   :  { %v2284_v34 = vmul.f32 -1.442695, %v2391_v44  ;;  %v2393_v50 = vadd.f32 %v1855_v49, %v3179_v17  ;;  %v2425_v26 = vadd.f32 %v1898_v33, %v3187_v6 }
 0x789   :  { %2796 = vpow2.f32 %v2283_v47  ;;  %v2286_v51 = vmul.f32 -1.442695, %v2392_v48  ;;  %v2288_v58 = vmul.f32 -1.442695, %v2424_v55 }
 0x78a   :  { %v2287_v53 = vmul.f32 -1.442695, %v2393_v50  ;;  %2798 = vpow2.f32 %v2284_v34 }
 0x78b   :  { %2800 = vpow2.f32 %v2286_v51 }
 0x78c   :  { %2802 = vpow2.f32 %v2287_v53 }
 0x78d   :  { %2804 = vtanh.f32 %v2423_v56 }
 0x78e   :  { %2806 = vpow2.f32 %v2285_v57 }
 0x78f   :  { %2808 = vpow2.f32 %v2288_v58 }
 0x793   :  { %v2797_v12 = vpop.eup %2796 }
 0x794   :  { %v1927_v8 = vadd.f32 1.0, %v2797_v12  ;;  %v2799_v43 = vpop.eup %2798 }
 0x795   :  { %v2801_v52 = vpop.eup %2800  ;;  %v1928_v7 = vadd.f32 1.0, %v2799_v43 }
 0x796   :  { %2810 = vrcp.f32 %v1927_v8  ;;  %v1930_v10 = vadd.f32 1.0, %v2801_v52  ;;  %v2803_v13 = vpop.eup %2802 }
 0x797   :  { %2812 = vtanh.f32 %v2425_v26  ;;  %v1931_v15 = vadd.f32 1.0, %v2803_v13  ;;  %v2805_v14 = vpop.eup %2804 }
 0x798   :  { %2814 = vrcp.f32 %v1928_v7  ;;  %v2807_v19 = vpop.eup %2806 }
 0x799   :  { %2816 = vrcp.f32 %v1930_v10  ;;  %v2809_v31 = vpop.eup %2808  ;;  %v1929_v37 = vadd.f32 1.0, %v2807_v19 }
 0x79a   :  { %2818 = vrcp.f32 %v1931_v15  ;;  %v1932_v62 = vadd.f32 1.0, %v2809_v31 }
 0x79b   :  { %2820 = vrcp.f32 %v1929_v37 }
 0x7a0   :  { %v2811_v35 = vpop.eup %2810 }
 0x7a1   :  { %v2813_v21 = vpop.eup %2812  ;;  %v1949_v9 = vmul.f32 %v2811_v35, %v2805_v14 }
 0x7a2   :  { %v2815_v22 = vpop.eup %2814 }
 0x7a3   :  { %v2817_v36 = vpop.eup %2816  ;;  %v1947_v11 = vmul.f32 %v2815_v22, %v3521_v3 }
 0x7a4   :  { %v1950_v38 = vmul.f32 %v2817_v36, %v2813_v21  ;;  %v2819_v39 = vpop.eup %2818 }
 0x7a5   :  { %v3572_v59 = vadd.f32 %v1949_v9, %v1947_v11  ;;  %v1948_v63 = vmul.f32 %v2819_v39, %v3525_v5  ;;  %v2821_v1 = vpop.eup %2820 }
 0x7a7   :  { %2822 = vtanh.f32 %v3572_v59  ;;  %v3576_v2 = vadd.f32 %v1950_v38, %v1948_v63 }
 0x7a8   :  { %2824 = vrcp.f32 %v1932_v62 }
 0x7a9   :  { %2826 = vtanh.f32 %v3576_v2 }
 0x7b1   :  { %v2823_v20 = vpop.eup %2822 }
 0x7b2   :  { %v2825_v60 = vpop.eup %2824  ;;  %v1955_v3 = vmul.f32 %v2823_v20, %v2821_v1 }
 0x7b3   :  { %v2827_v24 = vpop.eup %2826 }
 0x7b4   :  { %v1956_v4 = vmul.f32 %v2827_v24, %v2825_v60 }
 0x7b6   :  { %v1957_v23 = vpack.c.bf16 %v1956_v4, %v1955_v3 }
 0x7b8   :  { %2364 = vst [vmem:[%s3605_s4 + $0x30] sm:$0xff] %v1957_v23   ;;  %2012 = vmatmul.mubr.bf16.vlgmr.msra.gmra.mrb[28].mxu0 %v1957_v23  ;;  %2055 = vmatmul.mubr.bf16.vlgmr.msra.gmra.mrb[28].mxu1 %v1957_v23 }
 0x88b   :  { %v2013_v5 = vpop.f32.mrb[28].mxu0  ;;  %v2056_v27 = vpop.f32.mrb[28].mxu1 }
 0x88c   :  { %v2394_v28 = vadd.f32 %v2013_v5, %v3177_v16  ;;  %v2015_v29 = vpop.f32.mrb[29].mxu0  ;;  %v2058_v25 = vpop.f32.mrb[29].mxu1  ;;  %v2426_v48 = vadd.f32 %v2056_v27, %v3184_v32 }
 0x88d   :  { %v2395_v30 = vadd.f32 %v2015_v29, %v3179_v17  ;;  %v2017_v61 = vpop.f32.mrb[30].mxu0  ;;  %v2060_v0 = vpop.f32.mrb[30].mxu1  ;;  %v2427_v33 = vadd.f32 %v2058_v25, %v3187_v6 }
 0x88e   :  { %v2293_v18 = vmul.f32 -1.442695, %v2394_v28  ;;  %v2396_v40 = vadd.f32 %v2017_v61, %v3177_v16  ;;  %v2019_v41 = vpop.f32.mrb[31].mxu0  ;;  %v2062_v42 = vpop.f32.mrb[31].mxu1  ;;  %v2428_v49 = vadd.f32 %v2060_v0, %v3184_v32  ;;  %v2295_v34 = vmul.f32 -1.442695, %v2426_v48 }
 0x88f   :  { %v2294_v44 = vmul.f32 -1.442695, %v2395_v30  ;;  %v2397_v45 = vadd.f32 %v2019_v41, %v3179_v17  ;;  %v2429_v51 = vadd.f32 %v2062_v42, %v3187_v6 }
 0x890   :  { %2828 = vpow2.f32 %v2293_v18  ;;  %v2296_v46 = vmul.f32 -1.442695, %v2396_v40  ;;  %v2298_v50 = vmul.f32 -1.442695, %v2428_v49 }
 0x891   :  { %v2297_v47 = vmul.f32 -1.442695, %v2397_v45  ;;  %2830 = vpow2.f32 %v2294_v44 }
 0x892   :  { %2832 = vpow2.f32 %v2296_v46 }
 0x893   :  { %2834 = vpow2.f32 %v2297_v47 }
 0x894   :  { %2836 = vtanh.f32 %v2427_v33 }
 0x895   :  { %2838 = vpow2.f32 %v2295_v34 }
 0x896   :  { %2840 = vpow2.f32 %v2298_v50 }
 0x89a   :  { %v2829_v16 = vpop.eup %2828 }
 0x89b   :  { %v2091_v53 = vadd.f32 1.0, %v2829_v16  ;;  %v2831_v17 = vpop.eup %2830 }
 0x89c   :  { %v2833_v54 = vpop.eup %2832  ;;  %v2092_v55 = vadd.f32 1.0, %v2831_v17 }
 0x89d   :  { %2842 = vrcp.f32 %v2091_v53  ;;  %v2094_v56 = vadd.f32 1.0, %v2833_v54  ;;  %v2835_v57 = vpop.eup %2834 }
 0x89e   :  { %2844 = vtanh.f32 %v2429_v51  ;;  %v2095_v32 = vadd.f32 1.0, %v2835_v57  ;;  %v2837_v58 = vpop.eup %2836 }
 0x89f   :  { %2846 = vrcp.f32 %v2092_v55  ;;  %v2839_v12 = vpop.eup %2838 }
 0x8a0   :  { %2848 = vrcp.f32 %v2094_v56  ;;  %v2841_v26 = vpop.eup %2840  ;;  %v2093_v7 = vadd.f32 1.0, %v2839_v12 }
 0x8a1   :  { %2850 = vrcp.f32 %v2095_v32  ;;  %v2096_v31 = vadd.f32 1.0, %v2841_v26 }
 0x8a2   :  { %2852 = vrcp.f32 %v2093_v7 }
 0x8a7   :  { %v2843_v8 = vpop.eup %2842 }
 0x8a8   :  { %v2845_v43 = vpop.eup %2844  ;;  %v2113_v6 = vmul.f32 %v2843_v8, %v2837_v58 }
 0x8a9   :  { %v2847_v52 = vpop.eup %2846 }
 0x8aa   :  { %v2849_v10 = vpop.eup %2848  ;;  %v2111_v13 = vmul.f32 %v2847_v52, %v3572_v59 }
 0x8ab   :  { %v2114_v15 = vmul.f32 %v2849_v10, %v2845_v43  ;;  %v2851_v14 = vpop.eup %2850 }
 0x8ac   :  { %v2115_v19 = vadd.f32 %v2113_v6, %v2111_v13  ;;  %v2112_v35 = vmul.f32 %v2851_v14, %v3576_v2  ;;  %v2853_v9 = vpop.eup %2852 }
 0x8ae   :  { %2854 = vtanh.f32 %v2115_v19  ;;  %v2116_v21 = vadd.f32 %v2114_v15, %v2112_v35 }
 0x8af   :  { %2856 = vrcp.f32 %v2096_v31 }
 0x8b0   :  { %2858 = vtanh.f32 %v2116_v21 }
 0x8b8   :  { %v2855_v22 = vpop.eup %2854 }
 0x8b9   :  { %v2119_v36 = vmul.f32 %v2855_v22, %v2853_v9  ;;  %v2857_v37 = vpop.eup %2856 }
 0x8ba   :  { %v2859_v11 = vpop.eup %2858 }
 0x8bb   :  { %2132 = vst [vmem:[%s3606_s5] sm:$0xff] %v2119_v36  ;;  %v2120_v38 = vmul.f32 %v2859_v11, %v2857_v37 }
 0x8bd   :  { %v2357_v39 = vpack.c.bf16 %v2120_v38, %v2119_v36  ;;  %2133 = vst [vmem:[%s3606_s5 + $0x8] sm:$0xff] %v2120_v38 }
 0x8bf   :  { %2365 = vst [vmem:[%s3605_s4 + $0x38] sm:$0xff] %v2357_v39  }
 0x8c0   :  { %2144 = vsyncpa [#allocation5], 1 }
 0x8c1   :  { %2145 = vsyncpa [#allocation7], 1 }

</bundles_post_ra>
